<compile_context>
chip_gen: v5e
topology: v5e:2x2
jax: 0.10.0
libtpu: 0.0.40
codegen_flags: <defaults>
</compile_context>

<pallas_src>
import functools
import math

import jax
import jax.numpy as jnp
from jax.experimental import pallas as pl
from jax.experimental.pallas import tpu as pltpu

# ----------------------------- config -----------------------------
VOCAB = 100
MAX_POS = 32
H = 128            # BERT hidden_size (synthetic small)
NUM_HEADS = 2
HEAD_DIM = H // NUM_HEADS      # 64
HEAD_PAD = 128                 # per-head width padded to a full 128-lane tile
FFN = 256
NUM_LAYERS = 2
LSTM_H = 64        # hidden_dim // 2 per direction (hidden_dim = 128)
NUM_LABELS = 7     # 'O' + B/I for 3 entity types
CLS_PAD = 128      # classifier output padded to a lane-dense width
LN_EPS = 1e-12


# ----------------------------- helpers -----------------------------

def _ln(x, g, b, eps=LN_EPS):
    mean = jnp.mean(x, axis=-1, keepdims=True)
    var = jnp.mean((x - mean) ** 2, axis=-1, keepdims=True)
    return (x - mean) * jax.lax.rsqrt(var + eps) * g + b


def _bf16_dot(a, w_bf16, bias=None):
    acc = jnp.dot(a.astype(jnp.bfloat16), w_bf16, preferred_element_type=jnp.float32)
    if bias is not None:
        acc = acc + bias
    return acc


def _const_spec(a):
    # full-array block, constant across the grid
    n = a.ndim
    return pl.BlockSpec(a.shape, lambda l, _n=n: (0,) * _n)


def _layer_spec(a):
    # stacked-per-layer array: leading dim indexed by the layer grid axis and squeezed
    n = a.ndim
    return pl.BlockSpec((pl.Squeezed(),) + a.shape[1:],
                        lambda l, _n=n: (l,) + (0,) * (_n - 1))


# ----------------------------- fused BERT encoder-stack kernel -----------------------------
# grid=(NUM_LAYERS,) ; x lives in the output VMEM block across layers (constant index_map).

def _bert_stack_kernel(x0_ref, mask_ref, ln0g_ref, ln0b_ref,
                       wqkv_ref, bqkv_ref, wo_ref, bo_ref,
                       ln1g_ref, ln1b_ref, w1_ref, b1_ref, w2_ref, b2_ref,
                       ln2g_ref, ln2b_ref, o_ref):
    @pl.when(pl.program_id(0) == 0)
    def _():
        # fused embedding LayerNorm -> seeds the resident activation block
        o_ref[...] = _ln(x0_ref[...], ln0g_ref[...], ln0b_ref[...])

    x = o_ref[...]                                        # (M, H) f32, resident across layers
    mask2d = mask_ref[...]                                # (M, M) additive (block-diag + key pad)
    scale = 1.0 / math.sqrt(HEAD_DIM)

    # fused QKV projection with per-head lane padding (bf16 MXU, f32 accumulate)
    qkv = _bf16_dot(x, wqkv_ref[...], bqkv_ref[...])      # (M, 3*NUM_HEADS*HEAD_PAD) f32

    ctx_heads = []
    for hh in range(NUM_HEADS):                           # per-head, batched over all M rows
        q_h = qkv[:, hh * HEAD_PAD:(hh + 1) * HEAD_PAD].astype(jnp.bfloat16)
        k_h = qkv[:, (NUM_HEADS + hh) * HEAD_PAD:(NUM_HEADS + hh + 1) * HEAD_PAD].astype(jnp.bfloat16)
        v_h = qkv[:, (2 * NUM_HEADS + hh) * HEAD_PAD:(2 * NUM_HEADS + hh + 1) * HEAD_PAD].astype(jnp.bfloat16)
        sc = jax.lax.dot_general(q_h, k_h, (((1,), (1,)), ((), ())),
                                 preferred_element_type=jnp.float32)      # (M, M)
        sc = sc * scale + mask2d
        mx = jnp.max(sc, axis=-1, keepdims=True)
        p = jnp.exp(sc - mx)
        denom = jnp.sum(p, axis=-1, keepdims=True)
        ctx = jnp.dot(p.astype(jnp.bfloat16), v_h, preferred_element_type=jnp.float32)
        # deferred softmax normalization (scale the context, not the (M,M) prob matrix)
        ctx_heads.append(ctx * pl.reciprocal(denom, approx=True))         # (M, HEAD_PAD)
    ctx_all = jnp.concatenate(ctx_heads, axis=-1)          # (M, NUM_HEADS*HEAD_PAD), lane-aligned

    attn_out = _bf16_dot(ctx_all, wo_ref[...], bo_ref[...])
    x1 = _ln(x + attn_out, ln1g_ref[...], ln1b_ref[...])

    h1 = _bf16_dot(x1, w1_ref[...], b1_ref[...])
    # TODO(synk): HF BERT uses exact erf GELU; tanh approximation kept (Mosaic-safe).
    h1 = jax.nn.gelu(h1, approximate=True)
    h2 = _bf16_dot(h1, w2_ref[...], b2_ref[...])
    o_ref[...] = _ln(x1 + h2, ln2g_ref[...], ln2b_ref[...])


def bert_stack(x0, mask2d, p, B, S):
    M = B * S
    per_call = [x0, mask2d, p["emb_ln_g"], p["emb_ln_b"]]
    stacked = [p["wqkv"], p["bqkv"], p["wo"], p["bo"],
               p["ln1_g"], p["ln1_b"], p["w1"], p["b1"],
               p["w2"], p["b2"], p["ln2_g"], p["ln2_b"]]
    in_specs = [_const_spec(a) for a in per_call] + [_layer_spec(a) for a in stacked]
    # TODO(synk): at real SciBERT sizes (H=768, S>=128, 12 layers) add an M-tiled grid, a
    #             (batch*head) axis for attention (parallel on v7x's 2nd TC), fori_loop
    #             instead of Python unrolls, and an explicit vmem_limit_bytes.
    return pl.pallas_call(
        _bert_stack_kernel,
        out_shape=jax.ShapeDtypeStruct((M, H), jnp.float32),
        grid=(NUM_LAYERS,),
        in_specs=in_specs,
        out_specs=pl.BlockSpec((M, H), lambda l: (0, 0)),
        compiler_params=pltpu.CompilerParams(dimension_semantics=("arbitrary",)),
    )(*per_call, *stacked)


# ----------------------------- fused BiLSTM + classifier kernel -----------------------------
# Input is TIME-MAJOR (S*B, H): row = t*B + b, so each step's gate inputs are a contiguous
# static slice.  State h, c are (B, 128): forward direction lanes 0:63, backward 64:127.
# Gate layout: 4 gate blocks (i, f, g, o), each 128 lanes = [fwd(64) | bwd(64)]; W_hh is
# block-diagonal (bf16) so one MXU dot per step covers both directions.

def _bilstm_cls_kernel(x_ref, wih_ref, bih_ref, whh_ref, wcls_ref, bcls_ref, o_ref, *, B, S):
    D2 = 2 * LSTM_H       # 128
    G = 8 * LSTM_H        # 512

    x = x_ref[...]                                         # (S*B, H) f32, time-major
    xp = _bf16_dot(x, wih_ref[...], bih_ref[...])          # (S*B, G) f32 input projection

    lane_g = jax.lax.broadcasted_iota(jnp.int32, (B, G), 1)
    fwd_g = (lane_g & LSTM_H) == 0                         # forward half of each gate block
    lane_h = jax.lax.broadcasted_iota(jnp.int32, (B, D2), 1)
    fwd_h = lane_h < LSTM_H

    # Hoisted out of the recurrence: per-step gate inputs (fwd sees time t, bwd sees S-1-t).
    gx = [jnp.where(fwd_g, xp[t * B:(t + 1) * B, :], xp[(S - 1 - t) * B:(S - t) * B, :])
          for t in range(S)]

    whh = whh_ref[...]                                     # (D2, G) bf16, block-diagonal
    h = jnp.zeros((B, D2), jnp.float32)
    c = jnp.zeros((B, D2), jnp.float32)
    h_steps = []
    for t in range(S):                                     # fully unrolled serial recurrence
        gates = gx[t] + jnp.dot(h.astype(jnp.bfloat16), whh,
                                preferred_element_type=jnp.float32)   # (B, G)
        i_g = jax.nn.sigmoid(gates[:, 0 * D2:1 * D2])
        f_g = jax.nn.sigmoid(gates[:, 1 * D2:2 * D2])
        g_g = jnp.tanh(gates[:, 2 * D2:3 * D2])
        o_g = jax.nn.sigmoid(gates[:, 3 * D2:4 * D2])
        c = f_g * c + i_g * g_g
        h = o_g * jnp.tanh(c)
        h_steps.append(h)

    # time-major LSTM output: fwd half from step t, bwd half from step S-1-t
    lstm_tm = jnp.concatenate(
        [jnp.where(fwd_h, h_steps[t], h_steps[S - 1 - t]) for t in range(S)], axis=0)  # (S*B, D2)

    o_ref[...] = _bf16_dot(lstm_tm, wcls_ref[...], bcls_ref[...])     # (S*B, CLS_PAD) lane-dense


def bilstm_classifier(x_tm, params, B, S):
    M = B * S
    inputs = [x_tm, params["wih_comb"], params["b_comb"], params["whh_comb"],
              params["w_cls_pad"], params["b_cls_pad"]]
    return pl.pallas_call(
        functools.partial(_bilstm_cls_kernel, B=B, S=S),
        out_shape=jax.ShapeDtypeStruct((M, CLS_PAD), jnp.float32),
        grid=(1,),
        in_specs=[_const_spec(a) for a in inputs],
        out_specs=pl.BlockSpec((M, CLS_PAD), lambda i: (0, 0)),
        compiler_params=pltpu.CompilerParams(dimension_semantics=("arbitrary",)),
    )(*inputs)


# ----------------------------- CRF decode (plain JAX) -----------------------------

def crf_viterbi_decode(emissions, mask, start_t, end_t, trans):
    # torchcrf-style Viterbi decode.  emissions: (B,S,L), mask: (B,S) {0,1}
    # TODO(synk): sequential argmax backtracking over 7 labels kept in plain JAX
    #             lax.scan (too small / irregular to benefit from a Pallas kernel).
    B, S, L = emissions.shape
    m = mask.astype(bool)
    em_t = jnp.transpose(emissions, (1, 0, 2))      # (S, B, L)
    m_t = jnp.transpose(m, (1, 0))                  # (S, B)

    score0 = start_t[None, :] + em_t[0]             # (B, L)

    def fwd(score, inp):
        em, mk = inp
        nxt = score[:, :, None] + trans[None, :, :] + em[:, None, :]   # (B, Lp, Lc)
        nxt_max = jnp.max(nxt, axis=1)
        idx = jnp.argmax(nxt, axis=1).astype(jnp.int32)
        new_score = jnp.where(mk[:, None], nxt_max, score)
        return new_score, idx

    final_score, hist = jax.lax.scan(fwd, score0, (em_t[1:], m_t[1:]))
    final_score = final_score + end_t[None, :]
    hist = jnp.concatenate([jnp.zeros((1, B, L), jnp.int32), hist], axis=0)  # (S,B,L)

    init_tag = jnp.argmax(final_score, axis=-1).astype(jnp.int32)   # (B,)

    def bwd(cur, inp):
        mk, ht = inp                                  # (B,), (B,L)
        out_tag = jnp.where(mk, cur, 0)
        prev = jnp.take_along_axis(ht, cur[:, None], axis=1)[:, 0]
        new_cur = jnp.where(mk, prev, cur)
        return new_cur, out_tag

    _, tags_rev = jax.lax.scan(bwd, init_tag, (m_t[::-1], hist[::-1]))
    tags = tags_rev[::-1]                             # (S, B)
    return jnp.transpose(tags, (1, 0))                # (B, S)


# ----------------------------- model glue -----------------------------

def model_forward(params, input_ids, attention_mask):
    B, S = input_ids.shape
    M = B * S

    # --- embeddings (gather kept in XLA); LayerNorm fused into the BERT stack kernel ---
    we = params["word_emb"][input_ids]                        # (B,S,H)
    pe = params["pos_emb"][jnp.arange(S)][None, :, :]
    te = params["type_emb"][0][None, None, :]
    x0 = (we + pe + te).reshape(M, H)

    # (M, M) additive attention mask: block-diagonal over batches + key padding
    batch_ids = jnp.repeat(jnp.arange(B), S)                  # (M,)
    key_ok = attention_mask.reshape(M) > 0
    valid = (batch_ids[:, None] == batch_ids[None, :]) & key_ok[None, :]
    mask2d = jnp.where(valid, 0.0, -10000.0).astype(jnp.float32)

    # --- single fused pallas_call for the whole BERT encoder stack ---
    x = bert_stack(x0, mask2d, params, B, S)                  # (M, H)

    # --- dropout: identity at inference ---
    # --- time-major reorder (tiny wrapper transpose) + fused BiLSTM + classifier ---
    x_tm = x.reshape(B, S, H).transpose(1, 0, 2).reshape(S * B, H)
    emis_tm = bilstm_classifier(x_tm, params, B, S)           # (S*B, CLS_PAD) time-major
    emissions = emis_tm.reshape(S, B, CLS_PAD).transpose(1, 0, 2)[:, :, :NUM_LABELS]

    # --- CRF decode ---
    preds = crf_viterbi_decode(emissions, attention_mask,
                               params["crf_start"], params["crf_end"],
                               params["crf_trans"])
    return emissions, preds


# ----------------------------- parameter init -----------------------------

def init_params(key):
    keys = iter(jax.random.split(key, 256))

    def nrm(shape, s=0.02):
        return jax.random.normal(next(keys), shape, jnp.float32) * s

    p = {}
    p["word_emb"] = nrm((VOCAB, H))
    p["pos_emb"] = nrm((MAX_POS, H))
    p["type_emb"] = nrm((2, H))
    p["emb_ln_g"] = jnp.ones((1, H), jnp.float32)
    p["emb_ln_b"] = jnp.zeros((1, H), jnp.float32)

    QKVW = 3 * NUM_HEADS * HEAD_PAD          # 768
    OW = NUM_HEADS * HEAD_PAD                # 256

    wqkv_l, bqkv_l, wo_l, bo_l = [], [], [], []
    ln1g_l, ln1b_l, w1_l, b1_l = [], [], [], []
    w2_l, b2_l, ln2g_l, ln2b_l = [], [], [], []
    for _ in range(NUM_LAYERS):
        wq, wk, wv = nrm((H, H)), nrm((H, H)), nrm((H, H))
        bq = jnp.zeros((H,), jnp.float32)
        bk = jnp.zeros((H,), jnp.float32)
        bv = jnp.zeros((H,), jnp.float32)
        # per-head lane-padded QKV layout: [Qh0|Qh1|Kh0|Kh1|Vh0|Vh1], each 128 lanes (64 valid)
        wqkv = jnp.zeros((H, QKVW), jnp.float32)
        bqkv = jnp.zeros((QKVW,), jnp.float32)
        for hh in range(NUM_HEADS):
            src = slice(hh * HEAD_DIM, (hh + 1) * HEAD_DIM)
            for gi, (w_, b_) in enumerate(((wq, bq), (wk, bk), (wv, bv))):
                base = (gi * NUM_HEADS + hh) * HEAD_PAD
                wqkv = wqkv.at[:, base:base + HEAD_DIM].set(w_[:, src])
                bqkv = bqkv.at[base:base + HEAD_DIM].set(b_[src])
        wo = nrm((H, H))
        wo_exp = jnp.zeros((OW, H), jnp.float32)    # expanded rows match padded head layout
        for hh in range(NUM_HEADS):
            wo_exp = wo_exp.at[hh * HEAD_PAD:hh * HEAD_PAD + HEAD_DIM, :].set(
                wo[hh * HEAD_DIM:(hh + 1) * HEAD_DIM, :])

        wqkv_l.append(wqkv)
        bqkv_l.append(bqkv.reshape(1, QKVW))
        wo_l.append(wo_exp)
        bo_l.append(jnp.zeros((1, H), jnp.float32))
        ln1g_l.append(jnp.ones((1, H), jnp.float32))
        ln1b_l.append(jnp.zeros((1, H), jnp.float32))
        w1_l.append(nrm((H, FFN)))
        b1_l.append(jnp.zeros((1, FFN), jnp.float32))
        w2_l.append(nrm((FFN, H)))
        b2_l.append(jnp.zeros((1, H), jnp.float32))
        ln2g_l.append(jnp.ones((1, H), jnp.float32))
        ln2b_l.append(jnp.zeros((1, H), jnp.float32))

    p["wqkv"] = jnp.stack(wqkv_l).astype(jnp.bfloat16)       # (L, H, 768)
    p["bqkv"] = jnp.stack(bqkv_l)                            # (L, 1, 768)
    p["wo"] = jnp.stack(wo_l).astype(jnp.bfloat16)           # (L, 256, H)
    p["bo"] = jnp.stack(bo_l)
    p["ln1_g"] = jnp.stack(ln1g_l)
    p["ln1_b"] = jnp.stack(ln1b_l)
    p["w1"] = jnp.stack(w1_l).astype(jnp.bfloat16)
    p["b1"] = jnp.stack(b1_l)
    p["w2"] = jnp.stack(w2_l).astype(jnp.bfloat16)
    p["b2"] = jnp.stack(b2_l)
    p["ln2_g"] = jnp.stack(ln2g_l)
    p["ln2_b"] = jnp.stack(ln2b_l)

    # BiLSTM per-direction params (x @ W^T convention; biases folded b_ih + b_hh),
    # packed lane-aligned: gate order (i,f,g,o); each gate = [fwd(64) | bwd(64)] lanes.
    wih_f = nrm((H, 4 * LSTM_H), 0.1); whh_f = nrm((LSTM_H, 4 * LSTM_H), 0.1)
    b_f = nrm((4 * LSTM_H,), 0.1)
    wih_b = nrm((H, 4 * LSTM_H), 0.1); whh_b = nrm((LSTM_H, 4 * LSTM_H), 0.1)
    b_b = nrm((4 * LSTM_H,), 0.1)

    D2, G = 2 * LSTM_H, 8 * LSTM_H
    wih_comb = jnp.zeros((H, G), jnp.float32)
    whh_comb = jnp.zeros((D2, G), jnp.float32)
    b_comb = jnp.zeros((G,), jnp.float32)
    for k in range(4):
        src = slice(k * LSTM_H, (k + 1) * LSTM_H)
        dst_f = slice(k * D2, k * D2 + LSTM_H)
        dst_b = slice(k * D2 + LSTM_H, (k + 1) * D2)
        wih_comb = wih_comb.at[:, dst_f].set(wih_f[:, src])
        wih_comb = wih_comb.at[:, dst_b].set(wih_b[:, src])
        whh_comb = whh_comb.at[:LSTM_H, dst_f].set(whh_f[:, src])   # block-diagonal
        whh_comb = whh_comb.at[LSTM_H:, dst_b].set(whh_b[:, src])
        b_comb = b_comb.at[dst_f].set(b_f[src])
        b_comb = b_comb.at[dst_b].set(b_b[src])
    p["wih_comb"] = wih_comb.astype(jnp.bfloat16)
    p["whh_comb"] = whh_comb.astype(jnp.bfloat16)   # bf16: one MXU pass on the serial recurrence
    p["b_comb"] = b_comb.reshape(1, G)

    # classifier (real shape (2*LSTM_H, NUM_LABELS)), padded to CLS_PAD lanes
    w_cls = nrm((D2, NUM_LABELS), 0.1)
    b_cls = nrm((NUM_LABELS,), 0.1)
    p["w_cls_pad"] = (jnp.zeros((D2, CLS_PAD), jnp.float32)
                      .at[:, :NUM_LABELS].set(w_cls)).astype(jnp.bfloat16)
    p["b_cls_pad"] = jnp.zeros((1, CLS_PAD), jnp.float32).at[0, :NUM_LABELS].set(b_cls)

    # CRF parameters
    p["crf_start"] = nrm((NUM_LABELS,), 0.1)
    p["crf_end"] = nrm((NUM_LABELS,), 0.1)
    p["crf_trans"] = nrm((NUM_LABELS, NUM_LABELS), 0.1)
    return p


# ----------------------------- main -----------------------------

if __name__ == "__main__":
    key = jax.random.PRNGKey(0)
    pkey, ikey = jax.random.split(key)
    params = init_params(pkey)

    B, S = 2, 8
    input_ids = jax.random.randint(ikey, (B, S), 0, VOCAB, dtype=jnp.int32)
    attention_mask = jnp.array([[1, 1, 1, 1, 1, 1, 1, 1],
                                [1, 1, 1, 1, 1, 1, 0, 0]], dtype=jnp.int32)

    fwd = jax.jit(model_forward)
    emissions, preds = fwd(params, input_ids, attention_mask)
    emissions = jax.block_until_ready(emissions)
    preds = jax.block_until_ready(preds)

    assert emissions.shape == (B, S, NUM_LABELS)
    assert preds.shape == (B, S)
    print("KERNEL_OK")
</pallas_src>

<mosaic_0001>
module attributes {stable_mosaic.version = 11 : i64} {
  func.func @_bert_stack_kernel(%arg0: i32, %arg1: memref<16x128xf32, #tpu.memory_space<vmem>>, %arg2: memref<16x16xf32, #tpu.memory_space<vmem>>, %arg3: memref<1x128xf32, #tpu.memory_space<vmem>>, %arg4: memref<1x128xf32, #tpu.memory_space<vmem>>, %arg5: memref<1x128x768xbf16, #tpu.memory_space<vmem>>, %arg6: memref<1x1x768xf32, #tpu.memory_space<vmem>>, %arg7: memref<1x256x128xbf16, #tpu.memory_space<vmem>>, %arg8: memref<1x1x128xf32, #tpu.memory_space<vmem>>, %arg9: memref<1x1x128xf32, #tpu.memory_space<vmem>>, %arg10: memref<1x1x128xf32, #tpu.memory_space<vmem>>, %arg11: memref<1x128x256xbf16, #tpu.memory_space<vmem>>, %arg12: memref<1x1x256xf32, #tpu.memory_space<vmem>>, %arg13: memref<1x256x128xbf16, #tpu.memory_space<vmem>>, %arg14: memref<1x1x128xf32, #tpu.memory_space<vmem>>, %arg15: memref<1x1x128xf32, #tpu.memory_space<vmem>>, %arg16: memref<1x1x128xf32, #tpu.memory_space<vmem>>, %arg17: memref<16x128xf32, #tpu.memory_space<vmem>>) attributes {dimension_semantics = [#tpu.dimension_semantics<arbitrary>], iteration_bounds = array<i64: 2>, scalar_prefetch = 0 : i64, scratch_operands = 0 : i64, tpu.core_type = #tpu.core_type<tc>, window_params = [{pipeline_mode = #tpu.pipeline_mode<synchronous>, transform_indices = @transform_0, window_bounds = array<i64: 16, 128>}, {pipeline_mode = #tpu.pipeline_mode<synchronous>, transform_indices = @transform_1, window_bounds = array<i64: 16, 16>}, {pipeline_mode = #tpu.pipeline_mode<synchronous>, transform_indices = @transform_2, window_bounds = array<i64: 1, 128>}, {pipeline_mode = #tpu.pipeline_mode<synchronous>, transform_indices = @transform_3, window_bounds = array<i64: 1, 128>}, {transform_indices = @transform_4, window_bounds = array<i64: 1, 128, 768>}, {transform_indices = @transform_5, window_bounds = array<i64: 1, 1, 768>}, {transform_indices = @transform_6, window_bounds = array<i64: 1, 256, 128>}, {transform_indices = @transform_7, window_bounds = array<i64: 1, 1, 128>}, {transform_indices = @transform_8, window_bounds = array<i64: 1, 1, 128>}, {transform_indices = @transform_9, window_bounds = array<i64: 1, 1, 128>}, {transform_indices = @transform_10, window_bounds = array<i64: 1, 128, 256>}, {transform_indices = @transform_11, window_bounds = array<i64: 1, 1, 256>}, {transform_indices = @transform_12, window_bounds = array<i64: 1, 256, 128>}, {transform_indices = @transform_13, window_bounds = array<i64: 1, 1, 128>}, {transform_indices = @transform_14, window_bounds = array<i64: 1, 1, 128>}, {transform_indices = @transform_15, window_bounds = array<i64: 1, 1, 128>}, {pipeline_mode = #tpu.pipeline_mode<synchronous>, transform_indices = @transform_16, window_bounds = array<i64: 16, 128>}]} {
    %c0_i32 = arith.constant 0 : i32
    %0 = arith.cmpi eq, %arg0, %c0_i32 : i32
    %1 = arith.extui %0 : i1 to i32
    %c0_i32_0 = arith.constant 0 : i32
    %2 = arith.cmpi ne, %1, %c0_i32_0 : i32
    scf.if %2 {
      %c0_69 = arith.constant 0 : index
      %c0_70 = arith.constant 0 : index
      %150 = vector.load %arg1[%c0_69, %c0_70] : memref<16x128xf32, #tpu.memory_space<vmem>>, vector<16x128xf32>
      %c0_71 = arith.constant 0 : index
      %c0_72 = arith.constant 0 : index
      %151 = vector.load %arg3[%c0_71, %c0_72] : memref<1x128xf32, #tpu.memory_space<vmem>>, vector<1x128xf32>
      %c0_73 = arith.constant 0 : index
      %c0_74 = arith.constant 0 : index
      %152 = vector.load %arg4[%c0_73, %c0_74] : memref<1x128xf32, #tpu.memory_space<vmem>>, vector<1x128xf32>
      %cst_75 = arith.constant dense<0.000000e+00> : vector<16xf32>
      %153 = vector.multi_reduction <add>, %150, %cst_75 [1] : vector<16x128xf32> to vector<16xf32>
      %154 = vector.shape_cast %153 : vector<16xf32> to vector<16x1xf32>
      %cst_76 = arith.constant 1.280000e+02 : f32
      %155 = vector.broadcast %cst_76 : f32 to vector<16x1xf32>
      %156 = arith.divf %154, %155 : vector<16x1xf32>
      %157 = vector.broadcast %156 : vector<16x1xf32> to vector<16x128xf32>
      %158 = arith.subf %150, %157 : vector<16x128xf32>
      %159 = arith.mulf %158, %158 : vector<16x128xf32>
      %cst_77 = arith.constant dense<0.000000e+00> : vector<16xf32>
      %160 = vector.multi_reduction <add>, %159, %cst_77 [1] : vector<16x128xf32> to vector<16xf32>
      %161 = vector.shape_cast %160 : vector<16xf32> to vector<16x1xf32>
      %cst_78 = arith.constant 1.280000e+02 : f32
      %162 = vector.broadcast %cst_78 : f32 to vector<16x1xf32>
      %163 = arith.divf %161, %162 : vector<16x1xf32>
      %164 = vector.broadcast %156 : vector<16x1xf32> to vector<16x128xf32>
      %165 = arith.subf %150, %164 : vector<16x128xf32>
      %cst_79 = arith.constant 9.99999996E-13 : f32
      %166 = vector.broadcast %cst_79 : f32 to vector<16x1xf32>
      %167 = arith.addf %163, %166 : vector<16x1xf32>
      %168 = math.rsqrt %167 : vector<16x1xf32>
      %169 = vector.broadcast %168 : vector<16x1xf32> to vector<16x128xf32>
      %170 = arith.mulf %165, %169 : vector<16x128xf32>
      %171 = vector.broadcast %151 : vector<1x128xf32> to vector<16x128xf32>
      %172 = arith.mulf %170, %171 : vector<16x128xf32>
      %173 = vector.broadcast %152 : vector<1x128xf32> to vector<16x128xf32>
      %174 = arith.addf %172, %173 : vector<16x128xf32>
      %c0_80 = arith.constant 0 : index
      %c0_81 = arith.constant 0 : index
      %175 = vector.load %arg17[%c0_80, %c0_81] : memref<16x128xf32, #tpu.memory_space<vmem>>, vector<16x128xf32>
      tpu.vector_store %arg17[%c0_80, %c0_81], %174 {strides = array<i32>} : memref<16x128xf32, #tpu.memory_space<vmem>>, vector<16x128xf32>,
    } else {
    }
    %c0 = arith.constant 0 : index
    %c0_1 = arith.constant 0 : index
    %3 = vector.load %arg17[%c0, %c0_1] : memref<16x128xf32, #tpu.memory_space<vmem>>, vector<16x128xf32>
    %c0_2 = arith.constant 0 : index
    %c0_3 = arith.constant 0 : index
    %4 = vector.load %arg2[%c0_2, %c0_3] : memref<16x16xf32, #tpu.memory_space<vmem>>, vector<16x16xf32>
    %c0_4 = arith.constant 0 : index
    %c0_5 = arith.constant 0 : index
    %c0_6 = arith.constant 0 : index
    %5 = vector.load %arg5[%c0_4, %c0_5, %c0_6] : memref<1x128x768xbf16, #tpu.memory_space<vmem>>, vector<1x128x768xbf16>
    %6 = vector.shape_cast %5 : vector<1x128x768xbf16> to vector<128x768xbf16>
    %c0_7 = arith.constant 0 : index
    %c0_8 = arith.constant 0 : index
    %c0_9 = arith.constant 0 : index
    %7 = vector.load %arg6[%c0_7, %c0_8, %c0_9] : memref<1x1x768xf32, #tpu.memory_space<vmem>>, vector<1x1x768xf32>
    %8 = vector.shape_cast %7 : vector<1x1x768xf32> to vector<1x768xf32>
    %9 = arith.truncf %3 : vector<16x128xf32> to vector<16x128xbf16>
    %cst = arith.constant dense<0.000000e+00> : vector<16x768xf32>
    %10 = tpu.matmul %9, %6, %cst {dimension_numbers = #tpu.dot_dimension_numbers<[1], [0], [0], [1], [0, 0, 1, 1], [], []>} : vector<16x128xbf16>, vector<128x768xbf16>, vector<16x768xf32> -> vector<16x768xf32>
    %11 = vector.broadcast %8 : vector<1x768xf32> to vector<16x768xf32>
    %12 = arith.addf %10, %11 : vector<16x768xf32>
    %13 = vector.extract_strided_slice %12 {offsets = [0, 0], sizes = [16, 128], strides = [1, 1]} : vector<16x768xf32> to vector<16x128xf32>
    %14 = arith.truncf %13 : vector<16x128xf32> to vector<16x128xbf16>
    %15 = vector.extract_strided_slice %12 {offsets = [0, 256], sizes = [16, 128], strides = [1, 1]} : vector<16x768xf32> to vector<16x128xf32>
    %16 = arith.truncf %15 : vector<16x128xf32> to vector<16x128xbf16>
    %17 = vector.extract_strided_slice %12 {offsets = [0, 512], sizes = [16, 128], strides = [1, 1]} : vector<16x768xf32> to vector<16x128xf32>
    %18 = arith.truncf %17 : vector<16x128xf32> to vector<16x128xbf16>
    %cst_10 = arith.constant dense<0.000000e+00> : vector<16x16xf32>
    %19 = tpu.matmul %14, %16, %cst_10 {dimension_numbers = #tpu.dot_dimension_numbers<[1], [1], [0], [0], [0, 0, 1, 0], [], []>} : vector<16x128xbf16>, vector<16x128xbf16>, vector<16x16xf32> -> vector<16x16xf32>
    %cst_11 = arith.constant 1.250000e-01 : f32
    %20 = vector.broadcast %cst_11 : f32 to vector<16x16xf32>
    %21 = arith.mulf %19, %20 : vector<16x16xf32>
    %22 = arith.addf %21, %4 : vector<16x16xf32>
    %cst_12 = arith.constant dense<0xFF800000> : vector<16xf32>
    %23 = vector.multi_reduction <maximumf>, %22, %cst_12 [1] : vector<16x16xf32> to vector<16xf32>
    %24 = vector.shape_cast %23 : vector<16xf32> to vector<16x1xf32>
    %25 = vector.broadcast %24 : vector<16x1xf32> to vector<16x16xf32>
    %26 = arith.subf %22, %25 : vector<16x16xf32>
    %27 = math.exp %26 : vector<16x16xf32>
    %cst_13 = arith.constant dense<0.000000e+00> : vector<16xf32>
    %28 = vector.multi_reduction <add>, %27, %cst_13 [1] : vector<16x16xf32> to vector<16xf32>
    %29 = vector.shape_cast %28 : vector<16xf32> to vector<16x1xf32>
    %30 = arith.truncf %27 : vector<16x16xf32> to vector<16x16xbf16>
    %cst_14 = arith.constant dense<0.000000e+00> : vector<16x128xf32>
    %31 = tpu.matmul %30, %18, %cst_14 {dimension_numbers = #tpu.dot_dimension_numbers<[1], [0], [0], [1], [0, 0, 1, 1], [], []>} : vector<16x16xbf16>, vector<16x128xbf16>, vector<16x128xf32> -> vector<16x128xf32>
    %32 = tpu.reciprocal %29 {approx = true} : vector<16x1xf32> -> vector<16x1xf32>
    %33 = vector.broadcast %32 : vector<16x1xf32> to vector<16x128xf32>
    %34 = arith.mulf %31, %33 : vector<16x128xf32>
    %35 = vector.extract_strided_slice %12 {offsets = [0, 128], sizes = [16, 128], strides = [1, 1]} : vector<16x768xf32> to vector<16x128xf32>
    %36 = arith.truncf %35 : vector<16x128xf32> to vector<16x128xbf16>
    %37 = vector.extract_strided_slice %12 {offsets = [0, 384], sizes = [16, 128], strides = [1, 1]} : vector<16x768xf32> to vector<16x128xf32>
    %38 = arith.truncf %37 : vector<16x128xf32> to vector<16x128xbf16>
    %39 = vector.extract_strided_slice %12 {offsets = [0, 640], sizes = [16, 128], strides = [1, 1]} : vector<16x768xf32> to vector<16x128xf32>
    %40 = arith.truncf %39 : vector<16x128xf32> to vector<16x128xbf16>
    %cst_15 = arith.constant dense<0.000000e+00> : vector<16x16xf32>
    %41 = tpu.matmul %36, %38, %cst_15 {dimension_numbers = #tpu.dot_dimension_numbers<[1], [1], [0], [0], [0, 0, 1, 0], [], []>} : vector<16x128xbf16>, vector<16x128xbf16>, vector<16x16xf32> -> vector<16x16xf32>
    %cst_16 = arith.constant 1.250000e-01 : f32
    %42 = vector.broadcast %cst_16 : f32 to vector<16x16xf32>
    %43 = arith.mulf %41, %42 : vector<16x16xf32>
    %44 = arith.addf %43, %4 : vector<16x16xf32>
    %cst_17 = arith.constant dense<0xFF800000> : vector<16xf32>
    %45 = vector.multi_reduction <maximumf>, %44, %cst_17 [1] : vector<16x16xf32> to vector<16xf32>
    %46 = vector.shape_cast %45 : vector<16xf32> to vector<16x1xf32>
    %47 = vector.broadcast %46 : vector<16x1xf32> to vector<16x16xf32>
    %48 = arith.subf %44, %47 : vector<16x16xf32>
    %49 = math.exp %48 : vector<16x16xf32>
    %cst_18 = arith.constant dense<0.000000e+00> : vector<16xf32>
    %50 = vector.multi_reduction <add>, %49, %cst_18 [1] : vector<16x16xf32> to vector<16xf32>
    %51 = vector.shape_cast %50 : vector<16xf32> to vector<16x1xf32>
    %52 = arith.truncf %49 : vector<16x16xf32> to vector<16x16xbf16>
    %cst_19 = arith.constant dense<0.000000e+00> : vector<16x128xf32>
    %53 = tpu.matmul %52, %40, %cst_19 {dimension_numbers = #tpu.dot_dimension_numbers<[1], [0], [0], [1], [0, 0, 1, 1], [], []>} : vector<16x16xbf16>, vector<16x128xbf16>, vector<16x128xf32> -> vector<16x128xf32>
    %54 = tpu.reciprocal %51 {approx = true} : vector<16x1xf32> -> vector<16x1xf32>
    %55 = vector.broadcast %54 : vector<16x1xf32> to vector<16x128xf32>
    %56 = arith.mulf %53, %55 : vector<16x128xf32>
    %57 = tpu.concatenate %34, %56 in 1 : vector<16x128xf32>, vector<16x128xf32> -> vector<16x256xf32>
    %c0_20 = arith.constant 0 : index
    %c0_21 = arith.constant 0 : index
    %c0_22 = arith.constant 0 : index
    %58 = vector.load %arg7[%c0_20, %c0_21, %c0_22] : memref<1x256x128xbf16, #tpu.memory_space<vmem>>, vector<1x256x128xbf16>
    %59 = vector.shape_cast %58 : vector<1x256x128xbf16> to vector<256x128xbf16>
    %c0_23 = arith.constant 0 : index
    %c0_24 = arith.constant 0 : index
    %c0_25 = arith.constant 0 : index
    %60 = vector.load %arg8[%c0_23, %c0_24, %c0_25] : memref<1x1x128xf32, #tpu.memory_space<vmem>>, vector<1x1x128xf32>
    %61 = vector.shape_cast %60 : vector<1x1x128xf32> to vector<1x128xf32>
    %62 = arith.truncf %57 : vector<16x256xf32> to vector<16x256xbf16>
    %cst_26 = arith.constant dense<0.000000e+00> : vector<16x128xf32>
    %63 = tpu.matmul %62, %59, %cst_26 {dimension_numbers = #tpu.dot_dimension_numbers<[1], [0], [0], [1], [0, 0, 1, 1], [], []>} : vector<16x256xbf16>, vector<256x128xbf16>, vector<16x128xf32> -> vector<16x128xf32>
    %64 = vector.broadcast %61 : vector<1x128xf32> to vector<16x128xf32>
    %65 = arith.addf %63, %64 : vector<16x128xf32>
    %66 = arith.addf %3, %65 : vector<16x128xf32>
    %c0_27 = arith.constant 0 : index
    %c0_28 = arith.constant 0 : index
    %c0_29 = arith.constant 0 : index
    %67 = vector.load %arg9[%c0_27, %c0_28, %c0_29] : memref<1x1x128xf32, #tpu.memory_space<vmem>>, vector<1x1x128xf32>
    %68 = vector.shape_cast %67 : vector<1x1x128xf32> to vector<1x128xf32>
    %c0_30 = arith.constant 0 : index
    %c0_31 = arith.constant 0 : index
    %c0_32 = arith.constant 0 : index
    %69 = vector.load %arg10[%c0_30, %c0_31, %c0_32] : memref<1x1x128xf32, #tpu.memory_space<vmem>>, vector<1x1x128xf32>
    %70 = vector.shape_cast %69 : vector<1x1x128xf32> to vector<1x128xf32>
    %cst_33 = arith.constant dense<0.000000e+00> : vector<16xf32>
    %71 = vector.multi_reduction <add>, %66, %cst_33 [1] : vector<16x128xf32> to vector<16xf32>
    %72 = vector.shape_cast %71 : vector<16xf32> to vector<16x1xf32>
    %cst_34 = arith.constant 1.280000e+02 : f32
    %73 = vector.broadcast %cst_34 : f32 to vector<16x1xf32>
    %74 = arith.divf %72, %73 : vector<16x1xf32>
    %75 = vector.broadcast %74 : vector<16x1xf32> to vector<16x128xf32>
    %76 = arith.subf %66, %75 : vector<16x128xf32>
    %77 = arith.mulf %76, %76 : vector<16x128xf32>
    %cst_35 = arith.constant dense<0.000000e+00> : vector<16xf32>
    %78 = vector.multi_reduction <add>, %77, %cst_35 [1] : vector<16x128xf32> to vector<16xf32>
    %79 = vector.shape_cast %78 : vector<16xf32> to vector<16x1xf32>
    %cst_36 = arith.constant 1.280000e+02 : f32
    %80 = vector.broadcast %cst_36 : f32 to vector<16x1xf32>
    %81 = arith.divf %79, %80 : vector<16x1xf32>
    %82 = vector.broadcast %74 : vector<16x1xf32> to vector<16x128xf32>
    %83 = arith.subf %66, %82 : vector<16x128xf32>
    %cst_37 = arith.constant 9.99999996E-13 : f32
    %84 = vector.broadcast %cst_37 : f32 to vector<16x1xf32>
    %85 = arith.addf %81, %84 : vector<16x1xf32>
    %86 = math.rsqrt %85 : vector<16x1xf32>
    %87 = vector.broadcast %86 : vector<16x1xf32> to vector<16x128xf32>
    %88 = arith.mulf %83, %87 : vector<16x128xf32>
    %89 = vector.broadcast %68 : vector<1x128xf32> to vector<16x128xf32>
    %90 = arith.mulf %88, %89 : vector<16x128xf32>
    %91 = vector.broadcast %70 : vector<1x128xf32> to vector<16x128xf32>
    %92 = arith.addf %90, %91 : vector<16x128xf32>
    %c0_38 = arith.constant 0 : index
    %c0_39 = arith.constant 0 : index
    %c0_40 = arith.constant 0 : index
    %93 = vector.load %arg11[%c0_38, %c0_39, %c0_40] : memref<1x128x256xbf16, #tpu.memory_space<vmem>>, vector<1x128x256xbf16>
    %94 = vector.shape_cast %93 : vector<1x128x256xbf16> to vector<128x256xbf16>
    %c0_41 = arith.constant 0 : index
    %c0_42 = arith.constant 0 : index
    %c0_43 = arith.constant 0 : index
    %95 = vector.load %arg12[%c0_41, %c0_42, %c0_43] : memref<1x1x256xf32, #tpu.memory_space<vmem>>, vector<1x1x256xf32>
    %96 = vector.shape_cast %95 : vector<1x1x256xf32> to vector<1x256xf32>
    %97 = arith.truncf %92 : vector<16x128xf32> to vector<16x128xbf16>
    %cst_44 = arith.constant dense<0.000000e+00> : vector<16x256xf32>
    %98 = tpu.matmul %97, %94, %cst_44 {dimension_numbers = #tpu.dot_dimension_numbers<[1], [0], [0], [1], [0, 0, 1, 1], [], []>} : vector<16x128xbf16>, vector<128x256xbf16>, vector<16x256xf32> -> vector<16x256xf32>
    %99 = vector.broadcast %96 : vector<1x256xf32> to vector<16x256xf32>
    %100 = arith.addf %98, %99 : vector<16x256xf32>
    %101 = arith.mulf %100, %100 : vector<16x256xf32>
    %102 = arith.mulf %100, %101 : vector<16x256xf32>
    %cst_45 = arith.constant 4.471500e-02 : f32
    %103 = vector.broadcast %cst_45 : f32 to vector<16x256xf32>
    %104 = arith.mulf %103, %102 : vector<16x256xf32>
    %105 = arith.addf %100, %104 : vector<16x256xf32>
    %cst_46 = arith.constant 0.797884583 : f32
    %106 = vector.broadcast %cst_46 : f32 to vector<16x256xf32>
    %107 = arith.mulf %106, %105 : vector<16x256xf32>
    %108 = math.tanh %107 : vector<16x256xf32>
    %cst_47 = arith.constant 1.000000e+00 : f32
    %109 = vector.broadcast %cst_47 : f32 to vector<16x256xf32>
    %110 = arith.addf %109, %108 : vector<16x256xf32>
    %cst_48 = arith.constant 5.000000e-01 : f32
    %111 = vector.broadcast %cst_48 : f32 to vector<16x256xf32>
    %112 = arith.mulf %111, %110 : vector<16x256xf32>
    %113 = arith.mulf %100, %112 : vector<16x256xf32>
    %c0_49 = arith.constant 0 : index
    %c0_50 = arith.constant 0 : index
    %c0_51 = arith.constant 0 : index
    %114 = vector.load %arg13[%c0_49, %c0_50, %c0_51] : memref<1x256x128xbf16, #tpu.memory_space<vmem>>, vector<1x256x128xbf16>
    %115 = vector.shape_cast %114 : vector<1x256x128xbf16> to vector<256x128xbf16>
    %c0_52 = arith.constant 0 : index
    %c0_53 = arith.constant 0 : index
    %c0_54 = arith.constant 0 : index
    %116 = vector.load %arg14[%c0_52, %c0_53, %c0_54] : memref<1x1x128xf32, #tpu.memory_space<vmem>>, vector<1x1x128xf32>
    %117 = vector.shape_cast %116 : vector<1x1x128xf32> to vector<1x128xf32>
    %118 = arith.truncf %113 : vector<16x256xf32> to vector<16x256xbf16>
    %cst_55 = arith.constant dense<0.000000e+00> : vector<16x128xf32>
    %119 = tpu.matmul %118, %115, %cst_55 {dimension_numbers = #tpu.dot_dimension_numbers<[1], [0], [0], [1], [0, 0, 1, 1], [], []>} : vector<16x256xbf16>, vector<256x128xbf16>, vector<16x128xf32> -> vector<16x128xf32>
    %120 = vector.broadcast %117 : vector<1x128xf32> to vector<16x128xf32>
    %121 = arith.addf %119, %120 : vector<16x128xf32>
    %122 = arith.addf %92, %121 : vector<16x128xf32>
    %c0_56 = arith.constant 0 : index
    %c0_57 = arith.constant 0 : index
    %c0_58 = arith.constant 0 : index
    %123 = vector.load %arg15[%c0_56, %c0_57, %c0_58] : memref<1x1x128xf32, #tpu.memory_space<vmem>>, vector<1x1x128xf32>
    %124 = vector.shape_cast %123 : vector<1x1x128xf32> to vector<1x128xf32>
    %c0_59 = arith.constant 0 : index
    %c0_60 = arith.constant 0 : index
    %c0_61 = arith.constant 0 : index
    %125 = vector.load %arg16[%c0_59, %c0_60, %c0_61] : memref<1x1x128xf32, #tpu.memory_space<vmem>>, vector<1x1x128xf32>
    %126 = vector.shape_cast %125 : vector<1x1x128xf32> to vector<1x128xf32>
    %cst_62 = arith.constant dense<0.000000e+00> : vector<16xf32>
    %127 = vector.multi_reduction <add>, %122, %cst_62 [1] : vector<16x128xf32> to vector<16xf32>
    %128 = vector.shape_cast %127 : vector<16xf32> to vector<16x1xf32>
    %cst_63 = arith.constant 1.280000e+02 : f32
    %129 = vector.broadcast %cst_63 : f32 to vector<16x1xf32>
    %130 = arith.divf %128, %129 : vector<16x1xf32>
    %131 = vector.broadcast %130 : vector<16x1xf32> to vector<16x128xf32>
    %132 = arith.subf %122, %131 : vector<16x128xf32>
    %133 = arith.mulf %132, %132 : vector<16x128xf32>
    %cst_64 = arith.constant dense<0.000000e+00> : vector<16xf32>
    %134 = vector.multi_reduction <add>, %133, %cst_64 [1] : vector<16x128xf32> to vector<16xf32>
    %135 = vector.shape_cast %134 : vector<16xf32> to vector<16x1xf32>
    %cst_65 = arith.constant 1.280000e+02 : f32
    %136 = vector.broadcast %cst_65 : f32 to vector<16x1xf32>
    %137 = arith.divf %135, %136 : vector<16x1xf32>
    %138 = vector.broadcast %130 : vector<16x1xf32> to vector<16x128xf32>
    %139 = arith.subf %122, %138 : vector<16x128xf32>
    %cst_66 = arith.constant 9.99999996E-13 : f32
    %140 = vector.broadcast %cst_66 : f32 to vector<16x1xf32>
    %141 = arith.addf %137, %140 : vector<16x1xf32>
    %142 = math.rsqrt %141 : vector<16x1xf32>
    %143 = vector.broadcast %142 : vector<16x1xf32> to vector<16x128xf32>
    %144 = arith.mulf %139, %143 : vector<16x128xf32>
    %145 = vector.broadcast %124 : vector<1x128xf32> to vector<16x128xf32>
    %146 = arith.mulf %144, %145 : vector<16x128xf32>
    %147 = vector.broadcast %126 : vector<1x128xf32> to vector<16x128xf32>
    %148 = arith.addf %146, %147 : vector<16x128xf32>
    %c0_67 = arith.constant 0 : index
    %c0_68 = arith.constant 0 : index
    %149 = vector.load %arg17[%c0_67, %c0_68] : memref<16x128xf32, #tpu.memory_space<vmem>>, vector<16x128xf32>
    tpu.vector_store %arg17[%c0_67, %c0_68], %148 {strides = array<i32>} : memref<16x128xf32, #tpu.memory_space<vmem>>, vector<16x128xf32>,
    return
  }
  func.func @transform_0(%arg0: i32) -> (i32, i32) {
    %c0_i32 = arith.constant 0 : i32
    %c0_i32_0 = arith.constant 0 : i32
    %c0_i32_1 = arith.constant 0 : i32
    return %c0_i32, %c0_i32_0 : i32, i32
  }
  func.func @transform_1(%arg0: i32) -> (i32, i32) {
    %c0_i32 = arith.constant 0 : i32
    %c0_i32_0 = arith.constant 0 : i32
    %c0_i32_1 = arith.constant 0 : i32
    return %c0_i32, %c0_i32_0 : i32, i32
  }
  func.func @transform_2(%arg0: i32) -> (i32, i32) {
    %c0_i32 = arith.constant 0 : i32
    %c0_i32_0 = arith.constant 0 : i32
    %c0_i32_1 = arith.constant 0 : i32
    return %c0_i32, %c0_i32_0 : i32, i32
  }
  func.func @transform_3(%arg0: i32) -> (i32, i32) {
    %c0_i32 = arith.constant 0 : i32
    %c0_i32_0 = arith.constant 0 : i32
    %c0_i32_1 = arith.constant 0 : i32
    return %c0_i32, %c0_i32_0 : i32, i32
  }
  func.func @transform_4(%arg0: i32) -> (i32, i32, i32) {
    %c0_i32 = arith.constant 0 : i32
    %c0_i32_0 = arith.constant 0 : i32
    %c0_i32_1 = arith.constant 0 : i32
    return %arg0, %c0_i32, %c0_i32_0 : i32, i32, i32
  }
  func.func @transform_5(%arg0: i32) -> (i32, i32, i32) {
    %c0_i32 = arith.constant 0 : i32
    %c0_i32_0 = arith.constant 0 : i32
    %c0_i32_1 = arith.constant 0 : i32
    return %arg0, %c0_i32, %c0_i32_0 : i32, i32, i32
  }
  func.func @transform_6(%arg0: i32) -> (i32, i32, i32) {
    %c0_i32 = arith.constant 0 : i32
    %c0_i32_0 = arith.constant 0 : i32
    %c0_i32_1 = arith.constant 0 : i32
    return %arg0, %c0_i32, %c0_i32_0 : i32, i32, i32
  }
  func.func @transform_7(%arg0: i32) -> (i32, i32, i32) {
    %c0_i32 = arith.constant 0 : i32
    %c0_i32_0 = arith.constant 0 : i32
    %c0_i32_1 = arith.constant 0 : i32
    return %arg0, %c0_i32, %c0_i32_0 : i32, i32, i32
  }
  func.func @transform_8(%arg0: i32) -> (i32, i32, i32) {
    %c0_i32 = arith.constant 0 : i32
    %c0_i32_0 = arith.constant 0 : i32
    %c0_i32_1 = arith.constant 0 : i32
    return %arg0, %c0_i32, %c0_i32_0 : i32, i32, i32
  }
  func.func @transform_9(%arg0: i32) -> (i32, i32, i32) {
    %c0_i32 = arith.constant 0 : i32
    %c0_i32_0 = arith.constant 0 : i32
    %c0_i32_1 = arith.constant 0 : i32
    return %arg0, %c0_i32, %c0_i32_0 : i32, i32, i32
  }
  func.func @transform_10(%arg0: i32) -> (i32, i32, i32) {
    %c0_i32 = arith.constant 0 : i32
    %c0_i32_0 = arith.constant 0 : i32
    %c0_i32_1 = arith.constant 0 : i32
    return %arg0, %c0_i32, %c0_i32_0 : i32, i32, i32
  }
  func.func @transform_11(%arg0: i32) -> (i32, i32, i32) {
    %c0_i32 = arith.constant 0 : i32
    %c0_i32_0 = arith.constant 0 : i32
    %c0_i32_1 = arith.constant 0 : i32
    return %arg0, %c0_i32, %c0_i32_0 : i32, i32, i32
  }
  func.func @transform_12(%arg0: i32) -> (i32, i32, i32) {
    %c0_i32 = arith.constant 0 : i32
    %c0_i32_0 = arith.constant 0 : i32
    %c0_i32_1 = arith.constant 0 : i32
    return %arg0, %c0_i32, %c0_i32_0 : i32, i32, i32
  }
  func.func @transform_13(%arg0: i32) -> (i32, i32, i32) {
    %c0_i32 = arith.constant 0 : i32
    %c0_i32_0 = arith.constant 0 : i32
    %c0_i32_1 = arith.constant 0 : i32
    return %arg0, %c0_i32, %c0_i32_0 : i32, i32, i32
  }
  func.func @transform_14(%arg0: i32) -> (i32, i32, i32) {
    %c0_i32 = arith.constant 0 : i32
    %c0_i32_0 = arith.constant 0 : i32
    %c0_i32_1 = arith.constant 0 : i32
    return %arg0, %c0_i32, %c0_i32_0 : i32, i32, i32
  }
  func.func @transform_15(%arg0: i32) -> (i32, i32, i32) {
    %c0_i32 = arith.constant 0 : i32
    %c0_i32_0 = arith.constant 0 : i32
    %c0_i32_1 = arith.constant 0 : i32
    return %arg0, %c0_i32, %c0_i32_0 : i32, i32, i32
  }
  func.func @transform_16(%arg0: i32) -> (i32, i32) {
    %c0_i32 = arith.constant 0 : i32
    %c0_i32_0 = arith.constant 0 : i32
    %c0_i32_1 = arith.constant 0 : i32
    return %c0_i32, %c0_i32_0 : i32, i32
  }
}

module attributes {stable_mosaic.version = 11 : i64} {
  func.func @_bilstm_cls_kernel(%arg0: i32, %arg1: memref<16x128xf32, #tpu.memory_space<vmem>>, %arg2: memref<128x512xbf16, #tpu.memory_space<vmem>>, %arg3: memref<1x512xf32, #tpu.memory_space<vmem>>, %arg4: memref<128x512xbf16, #tpu.memory_space<vmem>>, %arg5: memref<128x128xbf16, #tpu.memory_space<vmem>>, %arg6: memref<1x128xf32, #tpu.memory_space<vmem>>, %arg7: memref<16x128xf32, #tpu.memory_space<vmem>>) attributes {dimension_semantics = [#tpu.dimension_semantics<arbitrary>], iteration_bounds = array<i64: 1>, scalar_prefetch = 0 : i64, scratch_operands = 0 : i64, tpu.core_type = #tpu.core_type<tc>, window_params = [{pipeline_mode = #tpu.pipeline_mode<synchronous>, transform_indices = @transform_0, window_bounds = array<i64: 16, 128>}, {pipeline_mode = #tpu.pipeline_mode<synchronous>, transform_indices = @transform_1, window_bounds = array<i64: 128, 512>}, {pipeline_mode = #tpu.pipeline_mode<synchronous>, transform_indices = @transform_2, window_bounds = array<i64: 1, 512>}, {pipeline_mode = #tpu.pipeline_mode<synchronous>, transform_indices = @transform_3, window_bounds = array<i64: 128, 512>}, {pipeline_mode = #tpu.pipeline_mode<synchronous>, transform_indices = @transform_4, window_bounds = array<i64: 128, 128>}, {pipeline_mode = #tpu.pipeline_mode<synchronous>, transform_indices = @transform_5, window_bounds = array<i64: 1, 128>}, {pipeline_mode = #tpu.pipeline_mode<synchronous>, transform_indices = @transform_6, window_bounds = array<i64: 16, 128>}]} {
    %c0 = arith.constant 0 : index
    %c0_0 = arith.constant 0 : index
    %0 = vector.load %arg1[%c0, %c0_0] : memref<16x128xf32, #tpu.memory_space<vmem>>, vector<16x128xf32>
    %c0_1 = arith.constant 0 : index
    %c0_2 = arith.constant 0 : index
    %1 = vector.load %arg2[%c0_1, %c0_2] : memref<128x512xbf16, #tpu.memory_space<vmem>>, vector<128x512xbf16>
    %c0_3 = arith.constant 0 : index
    %c0_4 = arith.constant 0 : index
    %2 = vector.load %arg3[%c0_3, %c0_4] : memref<1x512xf32, #tpu.memory_space<vmem>>, vector<1x512xf32>
    %3 = arith.truncf %0 : vector<16x128xf32> to vector<16x128xbf16>
    %cst = arith.constant dense<0.000000e+00> : vector<16x512xf32>
    %4 = tpu.matmul %3, %1, %cst {dimension_numbers = #tpu.dot_dimension_numbers<[1], [0], [0], [1], [0, 0, 1, 1], [], []>} : vector<16x128xbf16>, vector<128x512xbf16>, vector<16x512xf32> -> vector<16x512xf32>
    %5 = vector.broadcast %2 : vector<1x512xf32> to vector<16x512xf32>
    %6 = arith.addf %4, %5 : vector<16x512xf32>
    %7 = tpu.iota {dimensions = array<i32: 1>} : vector<2x512xi32>
    %c64_i32 = arith.constant 64 : i32
    %8 = vector.broadcast %c64_i32 : i32 to vector<2x512xi32>
    %9 = arith.andi %7, %8 : vector<2x512xi32>
    %c0_i32 = arith.constant 0 : i32
    %10 = vector.broadcast %c0_i32 : i32 to vector<2x512xi32>
    %11 = arith.cmpi eq, %9, %10 : vector<2x512xi32>
    %12 = tpu.iota {dimensions = array<i32: 1>} : vector<2x128xi32>
    %c64_i32_5 = arith.constant 64 : i32
    %13 = vector.broadcast %c64_i32_5 : i32 to vector<2x128xi32>
    %14 = arith.cmpi slt, %12, %13 : vector<2x128xi32>
    %15 = vector.extract_strided_slice %6 {offsets = [0, 0], sizes = [2, 512], strides = [1, 1]} : vector<16x512xf32> to vector<2x512xf32>
    %16 = vector.extract_strided_slice %6 {offsets = [14, 0], sizes = [2, 512], strides = [1, 1]} : vector<16x512xf32> to vector<2x512xf32>
    %17 = arith.select %11, %15, %16 : vector<2x512xi1>, vector<2x512xf32>
    %18 = vector.extract_strided_slice %6 {offsets = [2, 0], sizes = [2, 512], strides = [1, 1]} : vector<16x512xf32> to vector<2x512xf32>
    %19 = vector.extract_strided_slice %6 {offsets = [12, 0], sizes = [2, 512], strides = [1, 1]} : vector<16x512xf32> to vector<2x512xf32>
    %20 = arith.select %11, %18, %19 : vector<2x512xi1>, vector<2x512xf32>
    %21 = vector.extract_strided_slice %6 {offsets = [4, 0], sizes = [2, 512], strides = [1, 1]} : vector<16x512xf32> to vector<2x512xf32>
    %22 = vector.extract_strided_slice %6 {offsets = [10, 0], sizes = [2, 512], strides = [1, 1]} : vector<16x512xf32> to vector<2x512xf32>
    %23 = arith.select %11, %21, %22 : vector<2x512xi1>, vector<2x512xf32>
    %24 = vector.extract_strided_slice %6 {offsets = [6, 0], sizes = [2, 512], strides = [1, 1]} : vector<16x512xf32> to vector<2x512xf32>
    %25 = vector.extract_strided_slice %6 {offsets = [8, 0], sizes = [2, 512], strides = [1, 1]} : vector<16x512xf32> to vector<2x512xf32>
    %26 = arith.select %11, %24, %25 : vector<2x512xi1>, vector<2x512xf32>
    %27 = vector.extract_strided_slice %6 {offsets = [8, 0], sizes = [2, 512], strides = [1, 1]} : vector<16x512xf32> to vector<2x512xf32>
    %28 = vector.extract_strided_slice %6 {offsets = [6, 0], sizes = [2, 512], strides = [1, 1]} : vector<16x512xf32> to vector<2x512xf32>
    %29 = arith.select %11, %27, %28 : vector<2x512xi1>, vector<2x512xf32>
    %30 = vector.extract_strided_slice %6 {offsets = [10, 0], sizes = [2, 512], strides = [1, 1]} : vector<16x512xf32> to vector<2x512xf32>
    %31 = vector.extract_strided_slice %6 {offsets = [4, 0], sizes = [2, 512], strides = [1, 1]} : vector<16x512xf32> to vector<2x512xf32>
    %32 = arith.select %11, %30, %31 : vector<2x512xi1>, vector<2x512xf32>
    %33 = vector.extract_strided_slice %6 {offsets = [12, 0], sizes = [2, 512], strides = [1, 1]} : vector<16x512xf32> to vector<2x512xf32>
    %34 = vector.extract_strided_slice %6 {offsets = [2, 0], sizes = [2, 512], strides = [1, 1]} : vector<16x512xf32> to vector<2x512xf32>
    %35 = arith.select %11, %33, %34 : vector<2x512xi1>, vector<2x512xf32>
    %36 = vector.extract_strided_slice %6 {offsets = [14, 0], sizes = [2, 512], strides = [1, 1]} : vector<16x512xf32> to vector<2x512xf32>
    %37 = vector.extract_strided_slice %6 {offsets = [0, 0], sizes = [2, 512], strides = [1, 1]} : vector<16x512xf32> to vector<2x512xf32>
    %38 = arith.select %11, %36, %37 : vector<2x512xi1>, vector<2x512xf32>
    %c0_6 = arith.constant 0 : index
    %c0_7 = arith.constant 0 : index
    %39 = vector.load %arg4[%c0_6, %c0_7] : memref<128x512xbf16, #tpu.memory_space<vmem>>, vector<128x512xbf16>
    %cst_8 = arith.constant 0.000000e+00 : f32
    %40 = vector.broadcast %cst_8 : f32 to vector<2x128xf32>
    %cst_9 = arith.constant 0.000000e+00 : f32
    %41 = vector.broadcast %cst_9 : f32 to vector<2x128xf32>
    %42 = arith.truncf %40 : vector<2x128xf32> to vector<2x128xbf16>
    %cst_10 = arith.constant dense<0.000000e+00> : vector<2x512xf32>
    %43 = tpu.matmul %42, %39, %cst_10 {dimension_numbers = #tpu.dot_dimension_numbers<[1], [0], [0], [1], [0, 0, 1, 1], [], []>} : vector<2x128xbf16>, vector<128x512xbf16>, vector<2x512xf32> -> vector<2x512xf32>
    %44 = arith.addf %17, %43 : vector<2x512xf32>
    %45 = vector.extract_strided_slice %44 {offsets = [0, 0], sizes = [2, 128], strides = [1, 1]} : vector<2x512xf32> to vector<2x128xf32>
    %46 = arith.negf %45 : vector<2x128xf32>
    %47 = math.exp %46 : vector<2x128xf32>
    %cst_11 = arith.constant 1.000000e+00 : f32
    %48 = vector.broadcast %cst_11 : f32 to vector<2x128xf32>
    %49 = arith.addf %48, %47 : vector<2x128xf32>
    %50 = arith.divf %48, %49 : vector<2x128xf32>
    %51 = vector.extract_strided_slice %44 {offsets = [0, 128], sizes = [2, 128], strides = [1, 1]} : vector<2x512xf32> to vector<2x128xf32>
    %52 = arith.negf %51 : vector<2x128xf32>
    %53 = math.exp %52 : vector<2x128xf32>
    %cst_12 = arith.constant 1.000000e+00 : f32
    %54 = vector.broadcast %cst_12 : f32 to vector<2x128xf32>
    %55 = arith.addf %54, %53 : vector<2x128xf32>
    %56 = arith.divf %54, %55 : vector<2x128xf32>
    %57 = vector.extract_strided_slice %44 {offsets = [0, 256], sizes = [2, 128], strides = [1, 1]} : vector<2x512xf32> to vector<2x128xf32>
    %58 = math.tanh %57 : vector<2x128xf32>
    %59 = vector.extract_strided_slice %44 {offsets = [0, 384], sizes = [2, 128], strides = [1, 1]} : vector<2x512xf32> to vector<2x128xf32>
    %60 = arith.negf %59 : vector<2x128xf32>
    %61 = math.exp %60 : vector<2x128xf32>
    %cst_13 = arith.constant 1.000000e+00 : f32
    %62 = vector.broadcast %cst_13 : f32 to vector<2x128xf32>
    %63 = arith.addf %62, %61 : vector<2x128xf32>
    %64 = arith.divf %62, %63 : vector<2x128xf32>
    %65 = arith.mulf %56, %41 : vector<2x128xf32>
    %66 = arith.mulf %50, %58 : vector<2x128xf32>
    %67 = arith.addf %65, %66 : vector<2x128xf32>
    %68 = math.tanh %67 : vector<2x128xf32>
    %69 = arith.mulf %64, %68 : vector<2x128xf32>
    %70 = arith.truncf %69 : vector<2x128xf32> to vector<2x128xbf16>
    %cst_14 = arith.constant dense<0.000000e+00> : vector<2x512xf32>
    %71 = tpu.matmul %70, %39, %cst_14 {dimension_numbers = #tpu.dot_dimension_numbers<[1], [0], [0], [1], [0, 0, 1, 1], [], []>} : vector<2x128xbf16>, vector<128x512xbf16>, vector<2x512xf32> -> vector<2x512xf32>
    %72 = arith.addf %20, %71 : vector<2x512xf32>
    %73 = vector.extract_strided_slice %72 {offsets = [0, 0], sizes = [2, 128], strides = [1, 1]} : vector<2x512xf32> to vector<2x128xf32>
    %74 = arith.negf %73 : vector<2x128xf32>
    %75 = math.exp %74 : vector<2x128xf32>
    %cst_15 = arith.constant 1.000000e+00 : f32
    %76 = vector.broadcast %cst_15 : f32 to vector<2x128xf32>
    %77 = arith.addf %76, %75 : vector<2x128xf32>
    %78 = arith.divf %76, %77 : vector<2x128xf32>
    %79 = vector.extract_strided_slice %72 {offsets = [0, 128], sizes = [2, 128], strides = [1, 1]} : vector<2x512xf32> to vector<2x128xf32>
    %80 = arith.negf %79 : vector<2x128xf32>
    %81 = math.exp %80 : vector<2x128xf32>
    %cst_16 = arith.constant 1.000000e+00 : f32
    %82 = vector.broadcast %cst_16 : f32 to vector<2x128xf32>
    %83 = arith.addf %82, %81 : vector<2x128xf32>
    %84 = arith.divf %82, %83 : vector<2x128xf32>
    %85 = vector.extract_strided_slice %72 {offsets = [0, 256], sizes = [2, 128], strides = [1, 1]} : vector<2x512xf32> to vector<2x128xf32>
    %86 = math.tanh %85 : vector<2x128xf32>
    %87 = vector.extract_strided_slice %72 {offsets = [0, 384], sizes = [2, 128], strides = [1, 1]} : vector<2x512xf32> to vector<2x128xf32>
    %88 = arith.negf %87 : vector<2x128xf32>
    %89 = math.exp %88 : vector<2x128xf32>
    %cst_17 = arith.constant 1.000000e+00 : f32
    %90 = vector.broadcast %cst_17 : f32 to vector<2x128xf32>
    %91 = arith.addf %90, %89 : vector<2x128xf32>
    %92 = arith.divf %90, %91 : vector<2x128xf32>
    %93 = arith.mulf %84, %67 : vector<2x128xf32>
    %94 = arith.mulf %78, %86 : vector<2x128xf32>
    %95 = arith.addf %93, %94 : vector<2x128xf32>
    %96 = math.tanh %95 : vector<2x128xf32>
    %97 = arith.mulf %92, %96 : vector<2x128xf32>
    %98 = arith.truncf %97 : vector<2x128xf32> to vector<2x128xbf16>
    %cst_18 = arith.constant dense<0.000000e+00> : vector<2x512xf32>
    %99 = tpu.matmul %98, %39, %cst_18 {dimension_numbers = #tpu.dot_dimension_numbers<[1], [0], [0], [1], [0, 0, 1, 1], [], []>} : vector<2x128xbf16>, vector<128x512xbf16>, vector<2x512xf32> -> vector<2x512xf32>
    %100 = arith.addf %23, %99 : vector<2x512xf32>
    %101 = vector.extract_strided_slice %100 {offsets = [0, 0], sizes = [2, 128], strides = [1, 1]} : vector<2x512xf32> to vector<2x128xf32>
    %102 = arith.negf %101 : vector<2x128xf32>
    %103 = math.exp %102 : vector<2x128xf32>
    %cst_19 = arith.constant 1.000000e+00 : f32
    %104 = vector.broadcast %cst_19 : f32 to vector<2x128xf32>
    %105 = arith.addf %104, %103 : vector<2x128xf32>
    %106 = arith.divf %104, %105 : vector<2x128xf32>
    %107 = vector.extract_strided_slice %100 {offsets = [0, 128], sizes = [2, 128], strides = [1, 1]} : vector<2x512xf32> to vector<2x128xf32>
    %108 = arith.negf %107 : vector<2x128xf32>
    %109 = math.exp %108 : vector<2x128xf32>
    %cst_20 = arith.constant 1.000000e+00 : f32
    %110 = vector.broadcast %cst_20 : f32 to vector<2x128xf32>
    %111 = arith.addf %110, %109 : vector<2x128xf32>
    %112 = arith.divf %110, %111 : vector<2x128xf32>
    %113 = vector.extract_strided_slice %100 {offsets = [0, 256], sizes = [2, 128], strides = [1, 1]} : vector<2x512xf32> to vector<2x128xf32>
    %114 = math.tanh %113 : vector<2x128xf32>
    %115 = vector.extract_strided_slice %100 {offsets = [0, 384], sizes = [2, 128], strides = [1, 1]} : vector<2x512xf32> to vector<2x128xf32>
    %116 = arith.negf %115 : vector<2x128xf32>
    %117 = math.exp %116 : vector<2x128xf32>
    %cst_21 = arith.constant 1.000000e+00 : f32
    %118 = vector.broadcast %cst_21 : f32 to vector<2x128xf32>
    %119 = arith.addf %118, %117 : vector<2x128xf32>
    %120 = arith.divf %118, %119 : vector<2x128xf32>
    %121 = arith.mulf %112, %95 : vector<2x128xf32>
    %122 = arith.mulf %106, %114 : vector<2x128xf32>
    %123 = arith.addf %121, %122 : vector<2x128xf32>
    %124 = math.tanh %123 : vector<2x128xf32>
    %125 = arith.mulf %120, %124 : vector<2x128xf32>
    %126 = arith.truncf %125 : vector<2x128xf32> to vector<2x128xbf16>
    %cst_22 = arith.constant dense<0.000000e+00> : vector<2x512xf32>
    %127 = tpu.matmul %126, %39, %cst_22 {dimension_numbers = #tpu.dot_dimension_numbers<[1], [0], [0], [1], [0, 0, 1, 1], [], []>} : vector<2x128xbf16>, vector<128x512xbf16>, vector<2x512xf32> -> vector<2x512xf32>
    %128 = arith.addf %26, %127 : vector<2x512xf32>
    %129 = vector.extract_strided_slice %128 {offsets = [0, 0], sizes = [2, 128], strides = [1, 1]} : vector<2x512xf32> to vector<2x128xf32>
    %130 = arith.negf %129 : vector<2x128xf32>
    %131 = math.exp %130 : vector<2x128xf32>
    %cst_23 = arith.constant 1.000000e+00 : f32
    %132 = vector.broadcast %cst_23 : f32 to vector<2x128xf32>
    %133 = arith.addf %132, %131 : vector<2x128xf32>
    %134 = arith.divf %132, %133 : vector<2x128xf32>
    %135 = vector.extract_strided_slice %128 {offsets = [0, 128], sizes = [2, 128], strides = [1, 1]} : vector<2x512xf32> to vector<2x128xf32>
    %136 = arith.negf %135 : vector<2x128xf32>
    %137 = math.exp %136 : vector<2x128xf32>
    %cst_24 = arith.constant 1.000000e+00 : f32
    %138 = vector.broadcast %cst_24 : f32 to vector<2x128xf32>
    %139 = arith.addf %138, %137 : vector<2x128xf32>
    %140 = arith.divf %138, %139 : vector<2x128xf32>
    %141 = vector.extract_strided_slice %128 {offsets = [0, 256], sizes = [2, 128], strides = [1, 1]} : vector<2x512xf32> to vector<2x128xf32>
    %142 = math.tanh %141 : vector<2x128xf32>
    %143 = vector.extract_strided_slice %128 {offsets = [0, 384], sizes = [2, 128], strides = [1, 1]} : vector<2x512xf32> to vector<2x128xf32>
    %144 = arith.negf %143 : vector<2x128xf32>
    %145 = math.exp %144 : vector<2x128xf32>
    %cst_25 = arith.constant 1.000000e+00 : f32
    %146 = vector.broadcast %cst_25 : f32 to vector<2x128xf32>
    %147 = arith.addf %146, %145 : vector<2x128xf32>
    %148 = arith.divf %146, %147 : vector<2x128xf32>
    %149 = arith.mulf %140, %123 : vector<2x128xf32>
    %150 = arith.mulf %134, %142 : vector<2x128xf32>
    %151 = arith.addf %149, %150 : vector<2x128xf32>
    %152 = math.tanh %151 : vector<2x128xf32>
    %153 = arith.mulf %148, %152 : vector<2x128xf32>
    %154 = arith.truncf %153 : vector<2x128xf32> to vector<2x128xbf16>
    %cst_26 = arith.constant dense<0.000000e+00> : vector<2x512xf32>
    %155 = tpu.matmul %154, %39, %cst_26 {dimension_numbers = #tpu.dot_dimension_numbers<[1], [0], [0], [1], [0, 0, 1, 1], [], []>} : vector<2x128xbf16>, vector<128x512xbf16>, vector<2x512xf32> -> vector<2x512xf32>
    %156 = arith.addf %29, %155 : vector<2x512xf32>
    %157 = vector.extract_strided_slice %156 {offsets = [0, 0], sizes = [2, 128], strides = [1, 1]} : vector<2x512xf32> to vector<2x128xf32>
    %158 = arith.negf %157 : vector<2x128xf32>
    %159 = math.exp %158 : vector<2x128xf32>
    %cst_27 = arith.constant 1.000000e+00 : f32
    %160 = vector.broadcast %cst_27 : f32 to vector<2x128xf32>
    %161 = arith.addf %160, %159 : vector<2x128xf32>
    %162 = arith.divf %160, %161 : vector<2x128xf32>
    %163 = vector.extract_strided_slice %156 {offsets = [0, 128], sizes = [2, 128], strides = [1, 1]} : vector<2x512xf32> to vector<2x128xf32>
    %164 = arith.negf %163 : vector<2x128xf32>
    %165 = math.exp %164 : vector<2x128xf32>
    %cst_28 = arith.constant 1.000000e+00 : f32
    %166 = vector.broadcast %cst_28 : f32 to vector<2x128xf32>
    %167 = arith.addf %166, %165 : vector<2x128xf32>
    %168 = arith.divf %166, %167 : vector<2x128xf32>
    %169 = vector.extract_strided_slice %156 {offsets = [0, 256], sizes = [2, 128], strides = [1, 1]} : vector<2x512xf32> to vector<2x128xf32>
    %170 = math.tanh %169 : vector<2x128xf32>
    %171 = vector.extract_strided_slice %156 {offsets = [0, 384], sizes = [2, 128], strides = [1, 1]} : vector<2x512xf32> to vector<2x128xf32>
    %172 = arith.negf %171 : vector<2x128xf32>
    %173 = math.exp %172 : vector<2x128xf32>
    %cst_29 = arith.constant 1.000000e+00 : f32
    %174 = vector.broadcast %cst_29 : f32 to vector<2x128xf32>
    %175 = arith.addf %174, %173 : vector<2x128xf32>
    %176 = arith.divf %174, %175 : vector<2x128xf32>
    %177 = arith.mulf %168, %151 : vector<2x128xf32>
    %178 = arith.mulf %162, %170 : vector<2x128xf32>
    %179 = arith.addf %177, %178 : vector<2x128xf32>
    %180 = math.tanh %179 : vector<2x128xf32>
    %181 = arith.mulf %176, %180 : vector<2x128xf32>
    %182 = arith.truncf %181 : vector<2x128xf32> to vector<2x128xbf16>
    %cst_30 = arith.constant dense<0.000000e+00> : vector<2x512xf32>
    %183 = tpu.matmul %182, %39, %cst_30 {dimension_numbers = #tpu.dot_dimension_numbers<[1], [0], [0], [1], [0, 0, 1, 1], [], []>} : vector<2x128xbf16>, vector<128x512xbf16>, vector<2x512xf32> -> vector<2x512xf32>
    %184 = arith.addf %32, %183 : vector<2x512xf32>
    %185 = vector.extract_strided_slice %184 {offsets = [0, 0], sizes = [2, 128], strides = [1, 1]} : vector<2x512xf32> to vector<2x128xf32>
    %186 = arith.negf %185 : vector<2x128xf32>
    %187 = math.exp %186 : vector<2x128xf32>
    %cst_31 = arith.constant 1.000000e+00 : f32
    %188 = vector.broadcast %cst_31 : f32 to vector<2x128xf32>
    %189 = arith.addf %188, %187 : vector<2x128xf32>
    %190 = arith.divf %188, %189 : vector<2x128xf32>
    %191 = vector.extract_strided_slice %184 {offsets = [0, 128], sizes = [2, 128], strides = [1, 1]} : vector<2x512xf32> to vector<2x128xf32>
    %192 = arith.negf %191 : vector<2x128xf32>
    %193 = math.exp %192 : vector<2x128xf32>
    %cst_32 = arith.constant 1.000000e+00 : f32
    %194 = vector.broadcast %cst_32 : f32 to vector<2x128xf32>
    %195 = arith.addf %194, %193 : vector<2x128xf32>
    %196 = arith.divf %194, %195 : vector<2x128xf32>
    %197 = vector.extract_strided_slice %184 {offsets = [0, 256], sizes = [2, 128], strides = [1, 1]} : vector<2x512xf32> to vector<2x128xf32>
    %198 = math.tanh %197 : vector<2x128xf32>
    %199 = vector.extract_strided_slice %184 {offsets = [0, 384], sizes = [2, 128], strides = [1, 1]} : vector<2x512xf32> to vector<2x128xf32>
    %200 = arith.negf %199 : vector<2x128xf32>
    %201 = math.exp %200 : vector<2x128xf32>
    %cst_33 = arith.constant 1.000000e+00 : f32
    %202 = vector.broadcast %cst_33 : f32 to vector<2x128xf32>
    %203 = arith.addf %202, %201 : vector<2x128xf32>
    %204 = arith.divf %202, %203 : vector<2x128xf32>
    %205 = arith.mulf %196, %179 : vector<2x128xf32>
    %206 = arith.mulf %190, %198 : vector<2x128xf32>
    %207 = arith.addf %205, %206 : vector<2x128xf32>
    %208 = math.tanh %207 : vector<2x128xf32>
    %209 = arith.mulf %204, %208 : vector<2x128xf32>
    %210 = arith.truncf %209 : vector<2x128xf32> to vector<2x128xbf16>
    %cst_34 = arith.constant dense<0.000000e+00> : vector<2x512xf32>
    %211 = tpu.matmul %210, %39, %cst_34 {dimension_numbers = #tpu.dot_dimension_numbers<[1], [0], [0], [1], [0, 0, 1, 1], [], []>} : vector<2x128xbf16>, vector<128x512xbf16>, vector<2x512xf32> -> vector<2x512xf32>
    %212 = arith.addf %35, %211 : vector<2x512xf32>
    %213 = vector.extract_strided_slice %212 {offsets = [0, 0], sizes = [2, 128], strides = [1, 1]} : vector<2x512xf32> to vector<2x128xf32>
    %214 = arith.negf %213 : vector<2x128xf32>
    %215 = math.exp %214 : vector<2x128xf32>
    %cst_35 = arith.constant 1.000000e+00 : f32
    %216 = vector.broadcast %cst_35 : f32 to vector<2x128xf32>
    %217 = arith.addf %216, %215 : vector<2x128xf32>
    %218 = arith.divf %216, %217 : vector<2x128xf32>
    %219 = vector.extract_strided_slice %212 {offsets = [0, 128], sizes = [2, 128], strides = [1, 1]} : vector<2x512xf32> to vector<2x128xf32>
    %220 = arith.negf %219 : vector<2x128xf32>
    %221 = math.exp %220 : vector<2x128xf32>
    %cst_36 = arith.constant 1.000000e+00 : f32
    %222 = vector.broadcast %cst_36 : f32 to vector<2x128xf32>
    %223 = arith.addf %222, %221 : vector<2x128xf32>
    %224 = arith.divf %222, %223 : vector<2x128xf32>
    %225 = vector.extract_strided_slice %212 {offsets = [0, 256], sizes = [2, 128], strides = [1, 1]} : vector<2x512xf32> to vector<2x128xf32>
    %226 = math.tanh %225 : vector<2x128xf32>
    %227 = vector.extract_strided_slice %212 {offsets = [0, 384], sizes = [2, 128], strides = [1, 1]} : vector<2x512xf32> to vector<2x128xf32>
    %228 = arith.negf %227 : vector<2x128xf32>
    %229 = math.exp %228 : vector<2x128xf32>
    %cst_37 = arith.constant 1.000000e+00 : f32
    %230 = vector.broadcast %cst_37 : f32 to vector<2x128xf32>
    %231 = arith.addf %230, %229 : vector<2x128xf32>
    %232 = arith.divf %230, %231 : vector<2x128xf32>
    %233 = arith.mulf %224, %207 : vector<2x128xf32>
    %234 = arith.mulf %218, %226 : vector<2x128xf32>
    %235 = arith.addf %233, %234 : vector<2x128xf32>
    %236 = math.tanh %235 : vector<2x128xf32>
    %237 = arith.mulf %232, %236 : vector<2x128xf32>
    %238 = arith.truncf %237 : vector<2x128xf32> to vector<2x128xbf16>
    %cst_38 = arith.constant dense<0.000000e+00> : vector<2x512xf32>
    %239 = tpu.matmul %238, %39, %cst_38 {dimension_numbers = #tpu.dot_dimension_numbers<[1], [0], [0], [1], [0, 0, 1, 1], [], []>} : vector<2x128xbf16>, vector<128x512xbf16>, vector<2x512xf32> -> vector<2x512xf32>
    %240 = arith.addf %38, %239 : vector<2x512xf32>
    %241 = vector.extract_strided_slice %240 {offsets = [0, 0], sizes = [2, 128], strides = [1, 1]} : vector<2x512xf32> to vector<2x128xf32>
    %242 = arith.negf %241 : vector<2x128xf32>
    %243 = math.exp %242 : vector<2x128xf32>
    %cst_39 = arith.constant 1.000000e+00 : f32
    %244 = vector.broadcast %cst_39 : f32 to vector<2x128xf32>
    %245 = arith.addf %244, %243 : vector<2x128xf32>
    %246 = arith.divf %244, %245 : vector<2x128xf32>
    %247 = vector.extract_strided_slice %240 {offsets = [0, 128], sizes = [2, 128], strides = [1, 1]} : vector<2x512xf32> to vector<2x128xf32>
    %248 = arith.negf %247 : vector<2x128xf32>
    %249 = math.exp %248 : vector<2x128xf32>
    %cst_40 = arith.constant 1.000000e+00 : f32
    %250 = vector.broadcast %cst_40 : f32 to vector<2x128xf32>
    %251 = arith.addf %250, %249 : vector<2x128xf32>
    %252 = arith.divf %250, %251 : vector<2x128xf32>
    %253 = vector.extract_strided_slice %240 {offsets = [0, 256], sizes = [2, 128], strides = [1, 1]} : vector<2x512xf32> to vector<2x128xf32>
    %254 = math.tanh %253 : vector<2x128xf32>
    %255 = vector.extract_strided_slice %240 {offsets = [0, 384], sizes = [2, 128], strides = [1, 1]} : vector<2x512xf32> to vector<2x128xf32>
    %256 = arith.negf %255 : vector<2x128xf32>
    %257 = math.exp %256 : vector<2x128xf32>
    %cst_41 = arith.constant 1.000000e+00 : f32
    %258 = vector.broadcast %cst_41 : f32 to vector<2x128xf32>
    %259 = arith.addf %258, %257 : vector<2x128xf32>
    %260 = arith.divf %258, %259 : vector<2x128xf32>
    %261 = arith.mulf %252, %235 : vector<2x128xf32>
    %262 = arith.mulf %246, %254 : vector<2x128xf32>
    %263 = arith.addf %261, %262 : vector<2x128xf32>
    %264 = math.tanh %263 : vector<2x128xf32>
    %265 = arith.mulf %260, %264 : vector<2x128xf32>
    %266 = arith.select %14, %69, %265 : vector<2x128xi1>, vector<2x128xf32>
    %267 = arith.select %14, %97, %237 : vector<2x128xi1>, vector<2x128xf32>
    %268 = arith.select %14, %125, %209 : vector<2x128xi1>, vector<2x128xf32>
    %269 = arith.select %14, %153, %181 : vector<2x128xi1>, vector<2x128xf32>
    %270 = arith.select %14, %181, %153 : vector<2x128xi1>, vector<2x128xf32>
    %271 = arith.select %14, %209, %125 : vector<2x128xi1>, vector<2x128xf32>
    %272 = arith.select %14, %237, %97 : vector<2x128xi1>, vector<2x128xf32>
    %273 = arith.select %14, %265, %69 : vector<2x128xi1>, vector<2x128xf32>
    %274 = tpu.concatenate %266, %267, %268, %269, %270, %271, %272, %273 in 0 : vector<2x128xf32>, vector<2x128xf32>, vector<2x128xf32>, vector<2x128xf32>, vector<2x128xf32>, vector<2x128xf32>, vector<2x128xf32>, vector<2x128xf32> -> vector<16x128xf32>
    %c0_42 = arith.constant 0 : index
    %c0_43 = arith.constant 0 : index
    %275 = vector.load %arg5[%c0_42, %c0_43] : memref<128x128xbf16, #tpu.memory_space<vmem>>, vector<128x128xbf16>
    %c0_44 = arith.constant 0 : index
    %c0_45 = arith.constant 0 : index
    %276 = vector.load %arg6[%c0_44, %c0_45] : memref<1x128xf32, #tpu.memory_space<vmem>>, vector<1x128xf32>
    %277 = arith.truncf %274 : vector<16x128xf32> to vector<16x128xbf16>
    %cst_46 = arith.constant dense<0.000000e+00> : vector<16x128xf32>
    %278 = tpu.matmul %277, %275, %cst_46 {dimension_numbers = #tpu.dot_dimension_numbers<[1], [0], [0], [1], [0, 0, 1, 1], [], []>} : vector<16x128xbf16>, vector<128x128xbf16>, vector<16x128xf32> -> vector<16x128xf32>
    %279 = vector.broadcast %276 : vector<1x128xf32> to vector<16x128xf32>
    %280 = arith.addf %278, %279 : vector<16x128xf32>
    %c0_47 = arith.constant 0 : index
    %c0_48 = arith.constant 0 : index
    %281 = vector.load %arg7[%c0_47, %c0_48] : memref<16x128xf32, #tpu.memory_space<vmem>>, vector<16x128xf32>
    tpu.vector_store %arg7[%c0_47, %c0_48], %280 {strides = array<i32>} : memref<16x128xf32, #tpu.memory_space<vmem>>, vector<16x128xf32>,
    return
  }
  func.func @transform_0(%arg0: i32) -> (i32, i32) {
    %c0_i32 = arith.constant 0 : i32
    %c0_i32_0 = arith.constant 0 : i32
    %c0_i32_1 = arith.constant 0 : i32
    return %c0_i32, %c0_i32_0 : i32, i32
  }
  func.func @transform_1(%arg0: i32) -> (i32, i32) {
    %c0_i32 = arith.constant 0 : i32
    %c0_i32_0 = arith.constant 0 : i32
    %c0_i32_1 = arith.constant 0 : i32
    return %c0_i32, %c0_i32_0 : i32, i32
  }
  func.func @transform_2(%arg0: i32) -> (i32, i32) {
    %c0_i32 = arith.constant 0 : i32
    %c0_i32_0 = arith.constant 0 : i32
    %c0_i32_1 = arith.constant 0 : i32
    return %c0_i32, %c0_i32_0 : i32, i32
  }
  func.func @transform_3(%arg0: i32) -> (i32, i32) {
    %c0_i32 = arith.constant 0 : i32
    %c0_i32_0 = arith.constant 0 : i32
    %c0_i32_1 = arith.constant 0 : i32
    return %c0_i32, %c0_i32_0 : i32, i32
  }
  func.func @transform_4(%arg0: i32) -> (i32, i32) {
    %c0_i32 = arith.constant 0 : i32
    %c0_i32_0 = arith.constant 0 : i32
    %c0_i32_1 = arith.constant 0 : i32
    return %c0_i32, %c0_i32_0 : i32, i32
  }
  func.func @transform_5(%arg0: i32) -> (i32, i32) {
    %c0_i32 = arith.constant 0 : i32
    %c0_i32_0 = arith.constant 0 : i32
    %c0_i32_1 = arith.constant 0 : i32
    return %c0_i32, %c0_i32_0 : i32, i32
  }
  func.func @transform_6(%arg0: i32) -> (i32, i32) {
    %c0_i32 = arith.constant 0 : i32
    %c0_i32_0 = arith.constant 0 : i32
    %c0_i32_1 = arith.constant 0 : i32
    return %c0_i32, %c0_i32_0 : i32, i32
  }
}

</mosaic_0001>

<bundles_post_ra>
// kernel: custom-call.6
= control target key start
LH: loop header
LB: loop body
LE: loop exit
PB: predicated region body
PF: predicated region fallthrough
CT: control target
= control target key end

     0   :  { %s6_s0 = inlined_call_operand.vmem [shape: s32[7,2,7], index: 0, kind: output, shape index: {}]  }

// kernel: custom-call.7
= control target key start
LH: loop header
LB: loop body
LE: loop exit
PB: predicated region body
PF: predicated region fallthrough
CT: control target
= control target key end

     0   :  { %s6_s0 = inlined_call_operand.vmem [shape: s32[8,2], index: 0, kind: output, shape index: {}]  }

// kernel: model_forward.3
= control target key start
LH: loop header
LB: loop body
LE: loop exit
PB: predicated region body
PF: predicated region fallthrough
CT: control target
= control target key end

     0   :  { %11 = vsyncpa [#allocation3], 0  ;;  %s2971_s0 = inlined_call_operand.vmem [shape: f32[16,128], index: 0, kind: input, shape index: {}]   ;;  %s2972_s1 = inlined_call_operand.hbm [shape: bf16[128,512], index: 1, kind: input, shape index: {}]   ;;  %s2973_s2 = inlined_call_operand.vmem [shape: f32[1,512], index: 2, kind: input, shape index: {}]   ;;  %s2974_s3 = inlined_call_operand.hbm [shape: bf16[128,512], index: 3, kind: input, shape index: {}]   ;;  %s2975_s4 = inlined_call_operand.vmem [shape: bf16[128,128], index: 4, kind: input, shape index: {}]   ;;  %s2976_s5 = inlined_call_operand.vmem [shape: f32[1,128], index: 5, kind: input, shape index: {}]   ;;  %s2977_s6 = inlined_call_operand.vmem [shape: f32[16,128], index: 6, kind: output, shape index: {}]  }
   0x1   :  { %s19_s23 = sshll.u32 %s2972_s1, 4  ;;  %s20_s23 = int_to_ptr.hbm [resolvable:$true] %s19_s23 }
   0x2   :  { %12 = vsyncpa [#allocation5], 0  ;;  %s2348_s24 = smov [#allocation2]   ;;  %s34_s28 = sshll.u32 %s2974_s3, 4  ;;  %s35_s28 = int_to_ptr.hbm [resolvable:$true] %s34_s28 }
   0x3   :  { %s21_s25 = sshll.u32 %s2348_s24, 4  ;;  %s2349_s29 = smov 256   ;;  %s22_s25 = int_to_ptr.vmem [resolvable:$true] %s21_s25 }
   0x4   :  { %s2350_s30 = smov 16   ;;  %s2351_s7 = smov [#allocation4]  }
   0x5   :  { %27 = dma.hbm_to_vmem [thread:$0]  %s20_s23, 4096, %s22_s25, [#allocation3], %s2349_s29, %s2349_s29, %s2350_s30  }
   0x6   :  { %s36_s8 = sshll.u32 %s2351_s7, 4  ;;  %s37_s8 = int_to_ptr.vmem [resolvable:$true] %s36_s8 }
   0x7   :  { %42 = dma.hbm_to_vmem [thread:$0]  %s35_s28, 4096, %s37_s8, [#allocation5], %s2349_s29, %s2349_s29, %s2350_s30  }
   0x8   :  { %2344 = dma.done.wait [#allocation3], 4096  }
   0x9   :  { %2345 = vsyncadd [#allocation3], 4294963200 }
   0xa   :  { %2346 = dma.done.wait [#allocation5], 4096  }
   0xb   :  { %2347 = vsyncadd [#allocation5], 4294963200  ;;  %v1892_v0 = vld [vmem:[#allocation2 + $0xe0] sm:$0xf]  ;;  %v2120_v1 = vld [vmem:[#allocation2 + $0xec] sm:$0xf0] }
   0xc   :  { %v2118_v2 = vld [vmem:[#allocation2 + $0xe4] sm:$0xf]  ;;  %v1893_v3 = vor.u32 %v2120_v1, %v1892_v0  ;;  %v1894_v4 = vld [vmem:[#allocation2 + $0xf0] sm:$0xf0]  ;;  %v2119_v5 = vld [vmem:[#allocation2 + $0xec] sm:$0xf] }
   0xd   :  { %v1902_v6 = vld [vmem:[#allocation2 + $0xf8] sm:$0xf0]  ;;  %v1897_v7 = vor.u32 %v2118_v2, %v1894_v4  ;;  %v1900_v9 = vld [vmem:[#allocation2 + $0xe8] sm:$0xf]  ;;  %v2121_v10 = vld [vmem:[#allocation2 + $0xf4] sm:$0xf0] }
   0xe   :  { %v1905_v8 = vor.u32 %v2119_v5, %v1902_v6  ;;  %v1876_v11 = vld [vmem:[#allocation2 + $0xc0] sm:$0xf]  ;;  %261 = vmatpush.bf16.msra.mxu0 %v1893_v3  ;;  %v1901_v12 = vor.u32 %v2121_v10, %v1900_v9  ;;  %v2116_v13 = vld [vmem:[#allocation2 + $0xcc] sm:$0xf0]  ;;  %v2114_v14 = vld [vmem:[#allocation2 + $0xc4] sm:$0xf] }
   0xf   :  { %v1878_v15 = vld [vmem:[#allocation2 + $0xd0] sm:$0xf0]  ;;  %275 = vmatpush.bf16.msra.mxu1 %v1897_v7  ;;  %v1877_v16 = vor.u32 %v2116_v13, %v1876_v11  ;;  %v2115_v18 = vld [vmem:[#allocation2 + $0xcc] sm:$0xf]  ;;  %v1886_v19 = vld [vmem:[#allocation2 + $0xd8] sm:$0xf0] }
  0x10   :  { %303 = vmatpush.bf16.msra.mxu3 %v1905_v8  ;;  %v1881_v17 = vor.u32 %v2114_v14, %v1878_v15  ;;  %v1884_v20 = vld [vmem:[#allocation2 + $0xc8] sm:$0xf]  ;;  %289 = vmatpush.bf16.msra.mxu2 %v1901_v12  ;;  %v1889_v21 = vor.u32 %v2115_v18, %v1886_v19  ;;  %v2117_v22 = vld [vmem:[#allocation2 + $0xd4] sm:$0xf0]  ;;  %v1860_v23 = vld [vmem:[#allocation2 + $0xa0] sm:$0xf] }
  0x11   :  { %v2112_v24 = vld [vmem:[#allocation2 + $0xac] sm:$0xf0]  ;;  %v1885_v25 = vor.u32 %v2117_v22, %v1884_v20  ;;  %v2110_v26 = vld [vmem:[#allocation2 + $0xa4] sm:$0xf]  ;;  %v1862_v27 = vld [vmem:[#allocation2 + $0xb0] sm:$0xf0] }
  0x12   :  { %v2111_v28 = vld [vmem:[#allocation2 + $0xac] sm:$0xf]  ;;  %262 = vmatpush.bf16.msra.mxu0 %v1877_v16  ;;  %v1861_v29 = vor.u32 %v2112_v24, %v1860_v23  ;;  %v1870_v30 = vld [vmem:[#allocation2 + $0xb8] sm:$0xf0]  ;;  %v1868_v31 = vld [vmem:[#allocation2 + $0xa8] sm:$0xf]  ;;  %v1865_v33 = vor.u32 %v2110_v26, %v1862_v27 }
  0x13   :  { %v2113_v32 = vld [vmem:[#allocation2 + $0xb4] sm:$0xf0]  ;;  %276 = vmatpush.bf16.msra.mxu1 %v1881_v17  ;;  %v1873_v34 = vor.u32 %v2111_v28, %v1870_v30  ;;  %v1844_v35 = vld [vmem:[#allocation2 + $0x80] sm:$0xf]  ;;  %v2108_v36 = vld [vmem:[#allocation2 + $0x8c] sm:$0xf0] }
  0x14   :  { %304 = vmatpush.bf16.msra.mxu3 %v1889_v21  ;;  %v2106_v37 = vld [vmem:[#allocation2 + $0x84] sm:$0xf]  ;;  %290 = vmatpush.bf16.msra.mxu2 %v1885_v25  ;;  %v1869_v38 = vor.u32 %v2113_v32, %v1868_v31  ;;  %v1846_v39 = vld [vmem:[#allocation2 + $0x90] sm:$0xf0]  ;;  %v2107_v40 = vld [vmem:[#allocation2 + $0x8c] sm:$0xf]  ;;  %v1845_v44 = vor.u32 %v2108_v36, %v1844_v35 }
  0x15   :  { %v1854_v41 = vld [vmem:[#allocation2 + $0x98] sm:$0xf0]  ;;  %v1852_v42 = vld [vmem:[#allocation2 + $0x88] sm:$0xf]  ;;  %v2109_v43 = vld [vmem:[#allocation2 + $0x94] sm:$0xf0]  ;;  %v1849_v45 = vor.u32 %v2106_v37, %v1846_v39 }
  0x16   :  { %263 = vmatpush.bf16.msra.mxu0 %v1861_v29  ;;  %v1857_v46 = vor.u32 %v2107_v40, %v1854_v41  ;;  %v1828_v47 = vld [vmem:[#allocation2 + $0x60] sm:$0xf]  ;;  %v2104_v48 = vld [vmem:[#allocation2 + $0x6c] sm:$0xf0]  ;;  %v2102_v49 = vld [vmem:[#allocation2 + $0x64] sm:$0xf]  ;;  %v1853_v50 = vor.u32 %v2109_v43, %v1852_v42 }
  0x17   :  { %277 = vmatpush.bf16.msra.mxu1 %v1865_v33  ;;  %v1830_v51 = vld [vmem:[#allocation2 + $0x70] sm:$0xf0]  ;;  %v2103_v52 = vld [vmem:[#allocation2 + $0x6c] sm:$0xf]  ;;  %v1838_v53 = vld [vmem:[#allocation2 + $0x78] sm:$0xf0]  ;;  %v1829_v56 = vor.u32 %v2104_v48, %v1828_v47 }
  0x18   :  { %305 = vmatpush.bf16.msra.mxu3 %v1873_v34  ;;  %291 = vmatpush.bf16.msra.mxu2 %v1869_v38  ;;  %v1836_v54 = vld [vmem:[#allocation2 + $0x68] sm:$0xf]  ;;  %v2105_v55 = vld [vmem:[#allocation2 + $0x74] sm:$0xf0]  ;;  %v1833_v57 = vor.u32 %v2102_v49, %v1830_v51  ;;  %v1841_v58 = vor.u32 %v2103_v52, %v1838_v53  ;;  %v1812_v59 = vld [vmem:[#allocation2 + $0x40] sm:$0xf] }
  0x19   :  { %v2100_v60 = vld [vmem:[#allocation2 + $0x4c] sm:$0xf0]  ;;  %v2098_v61 = vld [vmem:[#allocation2 + $0x44] sm:$0xf]  ;;  %v1837_v62 = vor.u32 %v2105_v55, %v1836_v54  ;;  %v1814_v63 = vld [vmem:[#allocation2 + $0x50] sm:$0xf0] }
  0x1a   :  { %264 = vmatpush.bf16.msra.mxu0 %v1845_v44  ;;  %v2099_v0 = vld [vmem:[#allocation2 + $0x4c] sm:$0xf]  ;;  %v1822_v1 = vld [vmem:[#allocation2 + $0x58] sm:$0xf0]  ;;  %v1820_v2 = vld [vmem:[#allocation2 + $0x48] sm:$0xf]  ;;  %v1813_v4 = vor.u32 %v2100_v60, %v1812_v59  ;;  %v1817_v5 = vor.u32 %v2098_v61, %v1814_v63 }
  0x1b   :  { %278 = vmatpush.bf16.msra.mxu1 %v1849_v45  ;;  %v2101_v3 = vld [vmem:[#allocation2 + $0x54] sm:$0xf0]  ;;  %v1825_v6 = vor.u32 %v2099_v0, %v1822_v1  ;;  %v1796_v7 = vld [vmem:[#allocation2 + $0x20] sm:$0xf]  ;;  %v2096_v8 = vld [vmem:[#allocation2 + $0x2c] sm:$0xf0] }
  0x1c   :  { %306 = vmatpush.bf16.msra.mxu3 %v1857_v46  ;;  %292 = vmatpush.bf16.msra.mxu2 %v1853_v50  ;;  %v2094_v9 = vld [vmem:[#allocation2 + $0x24] sm:$0xf]  ;;  %v1821_v10 = vor.u32 %v2101_v3, %v1820_v2  ;;  %v1798_v11 = vld [vmem:[#allocation2 + $0x30] sm:$0xf0]  ;;  %v2095_v12 = vld [vmem:[#allocation2 + $0x2c] sm:$0xf]  ;;  %v1797_v16 = vor.u32 %v2096_v8, %v1796_v7 }
  0x1d   :  { %v1806_v13 = vld [vmem:[#allocation2 + $0x38] sm:$0xf0]  ;;  %v1804_v14 = vld [vmem:[#allocation2 + $0x28] sm:$0xf]  ;;  %v2097_v15 = vld [vmem:[#allocation2 + $0x34] sm:$0xf0]  ;;  %v1801_v20 = vor.u32 %v2094_v9, %v1798_v11 }
  0x1e   :  { %265 = vmatpush.bf16.msra.mxu0 %v1829_v56  ;;  %v1780_v17 = vld [vmem:[#allocation2] sm:$0xf]  ;;  %v2092_v18 = vld [vmem:[#allocation2 + $0xc] sm:$0xf0]  ;;  %v2090_v19 = vld [vmem:[#allocation2 + $0x4] sm:$0xf]  ;;  %v1809_v21 = vor.u32 %v2095_v12, %v1806_v13  ;;  %v1805_v25 = vor.u32 %v2097_v15, %v1804_v14 }
  0x1f   :  { %279 = vmatpush.bf16.msra.mxu1 %v1833_v57  ;;  %v1782_v22 = vld [vmem:[#allocation2 + $0x10] sm:$0xf0]  ;;  %v2091_v23 = vld [vmem:[#allocation2 + $0xc] sm:$0xf]  ;;  %v1790_v24 = vld [vmem:[#allocation2 + $0x18] sm:$0xf0]  ;;  %v1781_v32 = vor.u32 %v2092_v18, %v1780_v17 }
  0x20   :  { %307 = vmatpush.bf16.msra.mxu3 %v1841_v58  ;;  %293 = vmatpush.bf16.msra.mxu2 %v1837_v62  ;;  %v2020_v26 = vld [vmem:[#allocation4 + $0xe0] sm:$0xf]  ;;  %v2152_v27 = vld [vmem:[#allocation4 + $0xec] sm:$0xf0]  ;;  %v2150_v28 = vld [vmem:[#allocation4 + $0xe4] sm:$0xf]  ;;  %v1785_v36 = vor.u32 %v2090_v19, %v1782_v22  ;;  %v1793_v37 = vor.u32 %v2091_v23, %v1790_v24 }
  0x21   :  { %v2022_v29 = vld [vmem:[#allocation4 + $0xf0] sm:$0xf0]  ;;  %v2151_v30 = vld [vmem:[#allocation4 + $0xec] sm:$0xf]  ;;  %v2030_v31 = vld [vmem:[#allocation4 + $0xf8] sm:$0xf0]  ;;  %v2400_v41 = vor.u32 %v2152_v27, %v2020_v26 }
  0x22   :  { %266 = vmatpush.bf16.msra.mxu0 %v1813_v4  ;;  %v1788_v33 = vld [vmem:[#allocation2 + $0x8] sm:$0xf]  ;;  %v2093_v34 = vld [vmem:[#allocation2 + $0x14] sm:$0xf0]  ;;  %v56_v39 = vld [vmem:[%s2971_s0] sm:$0xff]  ;;  %v2402_v42 = vor.u32 %v2150_v28, %v2022_v29  ;;  %v2404_v44 = vor.u32 %v2151_v30, %v2030_v31 }
  0x23   :  { %280 = vmatpush.bf16.msra.mxu1 %v1817_v5  ;;  %v2028_v35 = vld [vmem:[#allocation4 + $0xe8] sm:$0xf]  ;;  %v2153_v38 = vld [vmem:[#allocation4 + $0xf4] sm:$0xf0]  ;;  %v2004_v43 = vld [vmem:[#allocation4 + $0xc0] sm:$0xf]  ;;  %v1789_v45 = vor.u32 %v2093_v34, %v1788_v33 }
  0x24   :  { %308 = vmatpush.bf16.msra.mxu3 %v1825_v6  ;;  %294 = vmatpush.bf16.msra.mxu2 %v1821_v10  ;;  %v57_v40 = vld [vmem:[%s2971_s0 + $0x8] sm:$0xff]  ;;  %v2148_v46 = vld [vmem:[#allocation4 + $0xcc] sm:$0xf0]  ;;  %v2146_v47 = vld [vmem:[#allocation4 + $0xc4] sm:$0xf]  ;;  %v2406_v49 = vor.u32 %v2153_v38, %v2028_v35 }
  0x25   :  { %v2006_v48 = vld [vmem:[#allocation4 + $0xd0] sm:$0xf0]  ;;  %v2147_v50 = vld [vmem:[#allocation4 + $0xcc] sm:$0xf]  ;;  %v2014_v51 = vld [vmem:[#allocation4 + $0xd8] sm:$0xf0]  ;;  %v91_v52 = vpack.c.bf16 %v57_v40, %v56_v39  ;;  %v2410_v55 = vor.u32 %v2148_v46, %v2004_v43 }
  0x26   :  { %267 = vmatpush.bf16.msra.mxu0 %v1797_v16  ;;  %v2012_v53 = vld [vmem:[#allocation4 + $0xc8] sm:$0xf]  ;;  %v2149_v54 = vld [vmem:[#allocation4 + $0xd4] sm:$0xf0]  ;;  %v2412_v56 = vor.u32 %v2146_v47, %v2006_v48  ;;  %v1988_v57 = vld [vmem:[#allocation4 + $0xa0] sm:$0xf]  ;;  %v2415_v58 = vor.u32 %v2147_v50, %v2014_v51 }
  0x27   :  { %281 = vmatpush.bf16.msra.mxu1 %v1801_v20  ;;  %v2144_v59 = vld [vmem:[#allocation4 + $0xac] sm:$0xf0]  ;;  %v2142_v60 = vld [vmem:[#allocation4 + $0xa4] sm:$0xf]  ;;  %v1990_v61 = vld [vmem:[#allocation4 + $0xb0] sm:$0xf0]  ;;  %v2418_v62 = vor.u32 %v2149_v54, %v2012_v53 }
  0x28   :  { %309 = vmatpush.bf16.msra.mxu3 %v1809_v21  ;;  %295 = vmatpush.bf16.msra.mxu2 %v1805_v25  ;;  %v2143_v63 = vld [vmem:[#allocation4 + $0xac] sm:$0xf]  ;;  %v1998_v0 = vld [vmem:[#allocation4 + $0xb8] sm:$0xf0]  ;;  %v1996_v1 = vld [vmem:[#allocation4 + $0xa8] sm:$0xf]  ;;  %v2422_v3 = vor.u32 %v2144_v59, %v1988_v57  ;;  %v2424_v4 = vor.u32 %v2142_v60, %v1990_v61 }
  0x29   :  { %v2145_v2 = vld [vmem:[#allocation4 + $0xb4] sm:$0xf0]  ;;  %v1972_v5 = vld [vmem:[#allocation4 + $0x80] sm:$0xf]  ;;  %v2427_v6 = vor.u32 %v2143_v63, %v1998_v0  ;;  %v2140_v7 = vld [vmem:[#allocation4 + $0x8c] sm:$0xf0] }
  0x2a   :  { %268 = vmatpush.bf16.msra.mxu0 %v1781_v32  ;;  %v2138_v8 = vld [vmem:[#allocation4 + $0x84] sm:$0xf]  ;;  %v1974_v9 = vld [vmem:[#allocation4 + $0x90] sm:$0xf0]  ;;  %v2430_v10 = vor.u32 %v2145_v2, %v1996_v1  ;;  %v2139_v11 = vld [vmem:[#allocation4 + $0x8c] sm:$0xf]  ;;  %v2434_v15 = vor.u32 %v2140_v7, %v1972_v5 }
  0x2b   :  { %282 = vmatpush.bf16.msra.mxu1 %v1785_v36  ;;  %v1982_v12 = vld [vmem:[#allocation4 + $0x98] sm:$0xf0]  ;;  %v1980_v13 = vld [vmem:[#allocation4 + $0x88] sm:$0xf]  ;;  %v2141_v14 = vld [vmem:[#allocation4 + $0x94] sm:$0xf0]  ;;  %v2436_v16 = vor.u32 %v2138_v8, %v1974_v9 }
  0x2c   :  { %310 = vmatpush.bf16.msra.mxu3 %v1793_v37  ;;  %296 = vmatpush.bf16.msra.mxu2 %v1789_v45  ;;  %v1956_v17 = vld [vmem:[#allocation4 + $0x60] sm:$0xf]  ;;  %v2439_v18 = vor.u32 %v2139_v11, %v1982_v12  ;;  %v2136_v19 = vld [vmem:[#allocation4 + $0x6c] sm:$0xf0]  ;;  %v2134_v20 = vld [vmem:[#allocation4 + $0x64] sm:$0xf]  ;;  %v2442_v22 = vor.u32 %v2141_v14, %v1980_v13 }
  0x2d   :  { %269 = vmatmul.bf16.vlgmr.msra.gmra.mxu0 %v91_v52  ;;  %v1958_v21 = vld [vmem:[#allocation4 + $0x70] sm:$0xf0]  ;;  %v2135_v23 = vld [vmem:[#allocation4 + $0x6c] sm:$0xf]  ;;  %v1966_v24 = vld [vmem:[#allocation4 + $0x78] sm:$0xf0]  ;;  %v2446_v27 = vor.u32 %v2136_v19, %v1956_v17  ;;  %v317_v19 = vlaneseq }
  0x2e   :  { %579 = vmatpush.bf16.msrb.mxu0 %v2400_v41  ;;  %283 = vmatmul.bf16.vlgmr.msra.gmra.mxu1 %v91_v52  ;;  %v1964_v25 = vld [vmem:[#allocation4 + $0x68] sm:$0xf]  ;;  %v2137_v26 = vld [vmem:[#allocation4 + $0x74] sm:$0xf0]  ;;  %v2448_v28 = vor.u32 %v2134_v20, %v1958_v21  ;;  %v1940_v29 = vld [vmem:[#allocation4 + $0x40] sm:$0xf]  ;;  %v2451_v30 = vor.u32 %v2135_v23, %v1966_v24 }
  0x2f   :  { %592 = vmatpush.bf16.msrb.mxu1 %v2402_v42  ;;  %311 = vmatmul.bf16.vlgmr.msra.gmra.mxu3 %v91_v52  ;;  %v2132_v31 = vld [vmem:[#allocation4 + $0x4c] sm:$0xf0]  ;;  %v2130_v32 = vld [vmem:[#allocation4 + $0x44] sm:$0xf]  ;;  %v1942_v33 = vld [vmem:[#allocation4 + $0x50] sm:$0xf0]  ;;  %v2454_v34 = vor.u32 %v2137_v26, %v1964_v25 }
  0x30   :  { %618 = vmatpush.bf16.msrb.mxu3 %v2404_v44  ;;  %605 = vmatpush.bf16.msrb.mxu2 %v2406_v49  ;;  %v2131_v35 = vld [vmem:[#allocation4 + $0x4c] sm:$0xf]  ;;  %v1950_v36 = vld [vmem:[#allocation4 + $0x58] sm:$0xf0]  ;;  %v1948_v37 = vld [vmem:[#allocation4 + $0x48] sm:$0xf]  ;;  %v2458_v39 = vor.u32 %v2132_v31, %v1940_v29  ;;  %v2460_v40 = vor.u32 %v2130_v32, %v1942_v33 }
  0x31   :  { %297 = vmatmul.bf16.vlgmr.msra.gmra.mxu2 %v91_v52  ;;  %v2133_v38 = vld [vmem:[#allocation4 + $0x54] sm:$0xf0]  ;;  %v1924_v43 = vld [vmem:[#allocation4 + $0x20] sm:$0xf]  ;;  %v2463_v45 = vor.u32 %v2131_v35, %v1950_v36  ;;  %v2128_v46 = vld [vmem:[#allocation4 + $0x2c] sm:$0xf0] }
  0x32   :  { %580 = vmatpush.bf16.msrb.mxu0 %v2410_v55  ;;  %v2126_v47 = vld [vmem:[#allocation4 + $0x24] sm:$0xf]  ;;  %v1926_v48 = vld [vmem:[#allocation4 + $0x30] sm:$0xf0]  ;;  %v2466_v50 = vor.u32 %v2133_v38, %v1948_v37  ;;  %v2127_v51 = vld [vmem:[#allocation4 + $0x2c] sm:$0xf]  ;;  %v2470_v57 = vor.u32 %v2128_v46, %v1924_v43 }
  0x33   :  { %593 = vmatpush.bf16.msrb.mxu1 %v2412_v56  ;;  %v1934_v52 = vld [vmem:[#allocation4 + $0x38] sm:$0xf0]  ;;  %v1932_v53 = vld [vmem:[#allocation4 + $0x28] sm:$0xf]  ;;  %v2129_v54 = vld [vmem:[#allocation4 + $0x34] sm:$0xf0]  ;;  %v2472_v59 = vor.u32 %v2126_v47, %v1926_v48 }
  0x34   :  { %619 = vmatpush.bf16.msrb.mxu3 %v2415_v58  ;;  %606 = vmatpush.bf16.msrb.mxu2 %v2418_v62  ;;  %v1908_v60 = vld [vmem:[#allocation4] sm:$0xf]  ;;  %v2475_v61 = vor.u32 %v2127_v51, %v1934_v52  ;;  %v2124_v63 = vld [vmem:[#allocation4 + $0xc] sm:$0xf0]  ;;  %v2122_v0 = vld [vmem:[#allocation4 + $0x4] sm:$0xf]  ;;  %v2478_v2 = vor.u32 %v2129_v54, %v1932_v53 }
  0x35   :  { %v1910_v1 = vld [vmem:[#allocation4 + $0x10] sm:$0xf0]  ;;  %v2123_v5 = vld [vmem:[#allocation4 + $0xc] sm:$0xf]  ;;  %v1918_v7 = vld [vmem:[#allocation4 + $0x18] sm:$0xf0]  ;;  %v2482_v11 = vor.u32 %v2124_v63, %v1908_v60 }
  0x36   :  { %581 = vmatpush.bf16.msrb.mxu0 %v2422_v3  ;;  %v1916_v8 = vld [vmem:[#allocation4 + $0x8] sm:$0xf]  ;;  %v2125_v9 = vld [vmem:[#allocation4 + $0x14] sm:$0xf0]  ;;  %v2484_v12 = vor.u32 %v2122_v0, %v1910_v1  ;;  %v2487_v13 = vor.u32 %v2123_v5, %v1918_v7  ;;  %v2352_v17 = vmov 0   ;;  %v2563_v21 = vand.u32 127, %v317_v19 }
  0x37   :  { %594 = vmatpush.bf16.msrb.mxu1 %v2424_v4  ;;  %v2490_v14 = vor.u32 %v2125_v9, %v1916_v8  ;;  %v90_v20 = vld [vmem:[%s2973_s2] sm:$0xf] }
  0x38   :  { %620 = vmatpush.bf16.msrb.mxu3 %v2427_v6  ;;  %607 = vmatpush.bf16.msrb.mxu2 %v2430_v10  ;;  %2994 = vst [vmem:[#allocation8_spill] sm:$0xff] %v2563_v21  ;;  %v93_v23 = vperm.slane %v90_v20, 0  ;;  %v94_v25 = vperm.slane %v90_v20, 1  ;;  %v319_v29 = vadd.s32 128, %v2563_v21  ;;  %v322_v33 = vand.u32 64, %v2563_v21 }
  0x39   :  { %v96_v36 = vperm.slane %v90_v20, 3  ;;  %v321_v38 = vadd.s32 384, %v2563_v21  ;;  %v95_v54 = vperm.slane %v90_v20, 2  ;;  %v320_v7 = vadd.s32 256, %v2563_v21 }
  0x3a   :  { %582 = vmatpush.bf16.msrb.mxu0 %v2434_v15  ;;  %v323_v35 = vand.u32 64, %v319_v29  ;;  %vm2568_vm0 = vcmp.eq.s32.totalorder %v322_v33, 0 }
  0x3b   :  { %595 = vmatpush.bf16.msrb.mxu1 %v2436_v16  ;;  %v325_v8 = vand.u32 64, %v321_v38  ;;  %v324_v29 = vand.u32 64, %v320_v7 }
  0x3c   :  { %621 = vmatpush.bf16.msrb.mxu3 %v2439_v18  ;;  %608 = vmatpush.bf16.msrb.mxu2 %v2442_v22  ;;  %vm2572_vm1 = vcmp.eq.s32.totalorder %v323_v35, 0 }
  0x3d   :  { %vm2601_vm2 = vcmp.eq.s32.totalorder %v325_v8, 0  ;;  %vm2605_vm3 = vcmp.eq.s32.totalorder %v324_v29, 0 }
  0x3e   :  { %583 = vmatpush.bf16.msrb.mxu0 %v2446_v27 }
  0x3f   :  { %596 = vmatpush.bf16.msrb.mxu1 %v2448_v28 }
  0x40   :  { %622 = vmatpush.bf16.msrb.mxu3 %v2451_v30  ;;  %609 = vmatpush.bf16.msrb.mxu2 %v2454_v34 }
  0x42   :  { %584 = vmatpush.bf16.msrb.mxu0 %v2458_v39 }
  0x43   :  { %597 = vmatpush.bf16.msrb.mxu1 %v2460_v40 }
  0x44   :  { %623 = vmatpush.bf16.msrb.mxu3 %v2463_v45  ;;  %610 = vmatpush.bf16.msrb.mxu2 %v2466_v50 }
  0x46   :  { %585 = vmatpush.bf16.msrb.mxu0 %v2470_v57 }
  0x47   :  { %598 = vmatpush.bf16.msrb.mxu1 %v2472_v59 }
  0x48   :  { %624 = vmatpush.bf16.msrb.mxu3 %v2475_v61  ;;  %611 = vmatpush.bf16.msrb.mxu2 %v2478_v2 }
  0x4a   :  { %586 = vmatpush.bf16.msrb.mxu0 %v2482_v11 }
  0x4b   :  { %599 = vmatpush.bf16.msrb.mxu1 %v2484_v12 }
  0x4c   :  { %625 = vmatpush.bf16.msrb.mxu3 %v2487_v13  ;;  %612 = vmatpush.bf16.msrb.mxu2 %v2490_v14 }
  0x4d   :  { %587 = vmatmul.bf16.vlgmr.msrb.gmra.mxu0 %v2352_v17 }
  0x4e   :  { %699 = vmatpush.bf16.msra.mxu0 %v2400_v41  ;;  %600 = vmatmul.bf16.vlgmr.msrb.gmra.mxu1 %v2352_v17 }
  0x4f   :  { %712 = vmatpush.bf16.msra.mxu1 %v2402_v42  ;;  %626 = vmatmul.bf16.vlgmr.msrb.gmra.mxu3 %v2352_v17 }
  0x50   :  { %725 = vmatpush.bf16.msra.mxu2 %v2406_v49  ;;  %738 = vmatpush.bf16.msra.mxu3 %v2404_v44 }
  0x51   :  { %613 = vmatmul.bf16.vlgmr.msrb.gmra.mxu2 %v2352_v17 }
  0x52   :  { %700 = vmatpush.bf16.msra.mxu0 %v2410_v55 }
  0x53   :  { %713 = vmatpush.bf16.msra.mxu1 %v2412_v56 }
  0x54   :  { %726 = vmatpush.bf16.msra.mxu2 %v2418_v62  ;;  %739 = vmatpush.bf16.msra.mxu3 %v2415_v58 }
  0x56   :  { %701 = vmatpush.bf16.msra.mxu0 %v2422_v3 }
  0x57   :  { %714 = vmatpush.bf16.msra.mxu1 %v2424_v4 }
  0x58   :  { %727 = vmatpush.bf16.msra.mxu2 %v2430_v10  ;;  %740 = vmatpush.bf16.msra.mxu3 %v2427_v6 }
  0x5a   :  { %702 = vmatpush.bf16.msra.mxu0 %v2434_v15 }
  0x5b   :  { %715 = vmatpush.bf16.msra.mxu1 %v2436_v16 }
  0x5c   :  { %728 = vmatpush.bf16.msra.mxu2 %v2442_v22  ;;  %741 = vmatpush.bf16.msra.mxu3 %v2439_v18 }
  0x5e   :  { %703 = vmatpush.bf16.msra.mxu0 %v2446_v27 }
  0x5f   :  { %716 = vmatpush.bf16.msra.mxu1 %v2448_v28 }
  0x60   :  { %729 = vmatpush.bf16.msra.mxu2 %v2454_v34  ;;  %742 = vmatpush.bf16.msra.mxu3 %v2451_v30 }
  0x62   :  { %704 = vmatpush.bf16.msra.mxu0 %v2458_v39 }
  0x63   :  { %717 = vmatpush.bf16.msra.mxu1 %v2460_v40 }
  0x64   :  { %730 = vmatpush.bf16.msra.mxu2 %v2466_v50  ;;  %743 = vmatpush.bf16.msra.mxu3 %v2463_v45 }
  0x66   :  { %705 = vmatpush.bf16.msra.mxu0 %v2470_v57 }
  0x67   :  { %718 = vmatpush.bf16.msra.mxu1 %v2472_v59 }
  0x68   :  { %731 = vmatpush.bf16.msra.mxu2 %v2478_v2  ;;  %744 = vmatpush.bf16.msra.mxu3 %v2475_v61 }
  0x6a   :  { %706 = vmatpush.bf16.msra.mxu0 %v2482_v11 }
  0x6b   :  { %719 = vmatpush.bf16.msra.mxu1 %v2484_v12 }
  0x6c   :  { %732 = vmatpush.bf16.msra.mxu2 %v2490_v14  ;;  %745 = vmatpush.bf16.msra.mxu3 %v2487_v13 }
  0x6e   :  { %837 = vmatpush.bf16.msrb.mxu0 %v2400_v41 }
  0x6f   :  { %850 = vmatpush.bf16.msrb.mxu1 %v2402_v42 }
  0x70   :  { %863 = vmatpush.bf16.msrb.mxu2 %v2406_v49  ;;  %876 = vmatpush.bf16.msrb.mxu3 %v2404_v44 }
  0x72   :  { %838 = vmatpush.bf16.msrb.mxu0 %v2410_v55 }
  0x73   :  { %851 = vmatpush.bf16.msrb.mxu1 %v2412_v56 }
  0x74   :  { %864 = vmatpush.bf16.msrb.mxu2 %v2418_v62  ;;  %877 = vmatpush.bf16.msrb.mxu3 %v2415_v58 }
  0x76   :  { %839 = vmatpush.bf16.msrb.mxu0 %v2422_v3 }
  0x77   :  { %852 = vmatpush.bf16.msrb.mxu1 %v2424_v4 }
  0x78   :  { %865 = vmatpush.bf16.msrb.mxu2 %v2430_v10  ;;  %878 = vmatpush.bf16.msrb.mxu3 %v2427_v6 }
  0x7a   :  { %840 = vmatpush.bf16.msrb.mxu0 %v2434_v15 }
  0x7b   :  { %853 = vmatpush.bf16.msrb.mxu1 %v2436_v16 }
  0x7c   :  { %866 = vmatpush.bf16.msrb.mxu2 %v2442_v22  ;;  %879 = vmatpush.bf16.msrb.mxu3 %v2439_v18 }
  0x7e   :  { %841 = vmatpush.bf16.msrb.mxu0 %v2446_v27 }
  0x7f   :  { %854 = vmatpush.bf16.msrb.mxu1 %v2448_v28 }
  0x80   :  { %867 = vmatpush.bf16.msrb.mxu2 %v2454_v34  ;;  %880 = vmatpush.bf16.msrb.mxu3 %v2451_v30 }
  0x82   :  { %842 = vmatpush.bf16.msrb.mxu0 %v2458_v39 }
  0x83   :  { %855 = vmatpush.bf16.msrb.mxu1 %v2460_v40 }
  0x84   :  { %868 = vmatpush.bf16.msrb.mxu2 %v2466_v50  ;;  %881 = vmatpush.bf16.msrb.mxu3 %v2463_v45 }
  0x86   :  { %843 = vmatpush.bf16.msrb.mxu0 %v2470_v57 }
  0x87   :  { %856 = vmatpush.bf16.msrb.mxu1 %v2472_v59 }
  0x88   :  { %869 = vmatpush.bf16.msrb.mxu2 %v2478_v2  ;;  %882 = vmatpush.bf16.msrb.mxu3 %v2475_v61 }
  0x8a   :  { %844 = vmatpush.bf16.msrb.mxu0 %v2482_v11 }
  0x8b   :  { %857 = vmatpush.bf16.msrb.mxu1 %v2484_v12 }
  0x8c   :  { %870 = vmatpush.bf16.msrb.mxu2 %v2490_v14  ;;  %883 = vmatpush.bf16.msrb.mxu3 %v2487_v13 }
  0xaa   :  { %v270_v24 = vpop.f32.mrf.mxu0 }
  0xab   :  { %v284_v26 = vpop.f32.mrf.mxu1  ;;  %v271_v31 = vadd.f32 %v270_v24, %v93_v23 }
  0xac   :  { %v285_v32 = vadd.f32 %v284_v26, %v94_v25 }
  0xad   :  { %v363_v43 = vrot.slane %v271_v31, 6  ;;  %v375_v46 = vrot.slane %v271_v31, 2 }
  0xae   :  { %v364_v51 = vrot.slane %v285_v32, 6  ;;  %v376_v0 = vrot.slane %v285_v32, 2 }
  0xb2   :  { %v312_v37 = vpop.f32.mrf.mxu3  ;;  %v272_v47 = vpop.f32.mrf.mxu0 }
  0xb3   :  { %v273_v52 = vadd.f32 %v272_v47, %v93_v23  ;;  %v286_v53 = vpop.f32.mrf.mxu1  ;;  %v313_v5 = vadd.f32 %v312_v37, %v96_v36 }
  0xb4   :  { %v298_v60 = vpop.f32.mrf.mxu2  ;;  %v287_v1 = vadd.f32 %v286_v53, %v94_v25 }
  0xb5   :  { %v347_v9 = vrot.slane %v273_v52, 2  ;;  %v2579_v17 = vsel %vm2568_vm0, %v273_v52, %v363_v43  ;;  %v2583_v19 = vsel %vm2568_vm0, %v273_v52, %v375_v46  ;;  %v299_v24 = vadd.f32 %v298_v60, %v95_v54 }
  0xb6   :  { %2999 = vst [vmem:[#allocation9_spill] sm:$0xff] %v2579_v17  ;;  %v348_v20 = vrot.slane %v287_v1, 2  ;;  %v2587_v23 = vsel %vm2572_vm1, %v287_v1, %v364_v51  ;;  %v2595_v26 = vsel %vm2572_vm1, %v287_v1, %v376_v0  ;;  %v366_v35 = vrot.slane %v313_v5, 6 }
  0xb7   :  { %3000 = vst [vmem:[#allocation10_spill] sm:$0xff] %v2583_v19  ;;  %v2591_v25 = vsel %vm2568_vm0, %v271_v31, %v347_v9  ;;  %v378_v43 = vrot.slane %v313_v5, 2  ;;  %v365_v51 = vrot.slane %v299_v24, 6  ;;  %v377_v53 = vrot.slane %v299_v24, 2 }
  0xb8   :  { %3001 = vst [vmem:[#allocation11_spill] sm:$0xff] %v2587_v23  ;;  %v2599_v33 = vsel %vm2572_vm1, %v285_v32, %v348_v20 }
  0xb9   :  { %3002 = vst [vmem:[#allocation12_spill] sm:$0xff] %v2595_v26 }
  0xba   :  { %v314_v37 = vpop.f32.mrf.mxu3 }
  0xbb   :  { %v315_v46 = vadd.f32 %v314_v37, %v96_v36  ;;  %v335_v37 = vrot.slane %v273_v52, 6 }
  0xbc   :  { %v300_v47 = vpop.f32.mrf.mxu2 }
  0xbd   :  { %v301_v60 = vadd.f32 %v300_v47, %v95_v54  ;;  %v350_v7 = vrot.slane %v315_v46, 2  ;;  %v2611_v9 = vsel %vm2601_vm2, %v315_v46, %v366_v35  ;;  %v2615_v8 = vsel %vm2601_vm2, %v315_v46, %v378_v43 }
  0xbe   :  { %3007 = vst [vmem:[#allocation13_spill] sm:$0xff] %v2611_v9  ;;  %v336_v43 = vrot.slane %v287_v1, 6  ;;  %v2635_v47 = vsel %vm2568_vm0, %v271_v31, %v335_v37 }
  0xbf   :  { %3008 = vst [vmem:[#allocation14_spill] sm:$0xff] %v2615_v8  ;;  %v349_v20 = vrot.slane %v301_v60, 2  ;;  %v2619_v36 = vsel %vm2601_vm2, %v313_v5, %v350_v7  ;;  %v2623_v54 = vsel %vm2605_vm3, %v301_v60, %v365_v51  ;;  %v2627_v29 = vsel %vm2605_vm3, %v301_v60, %v377_v53 }
  0xc0   :  { %3009 = vst [vmem:[#allocation15_spill] sm:$0xff] %v2623_v54  ;;  %v2639_v21 = vsel %vm2572_vm1, %v285_v32, %v336_v43 }
  0xc1   :  { %3010 = vst [vmem:[#allocation16_spill] sm:$0xff] %v2627_v29  ;;  %v2631_v35 = vsel %vm2605_vm3, %v299_v24, %v349_v20  ;;  %v338_v20 = vrot.slane %v315_v46, 6 }
  0xc3   :  { %v2645_v48 = vsel %vm2601_vm2, %v313_v5, %v338_v20 }
  0xc4   :  { %3011 = vst [vmem:[#allocation17_spill] sm:$0xff] %v2645_v48 }
  0xca   :  { %v588_v7 = vpop.f32.mrf.mxu0 }
  0xcb   :  { %v601_v51 = vpop.f32.mrf.mxu1  ;;  %v631_v8 = vadd.f32 %v588_v7, %v2635_v47 }
  0xcc   :  { %v632_v53 = vadd.f32 %v601_v51, %v2639_v21  ;;  %v337_v51 = vrot.slane %v301_v60, 6 }
  0xcd   :  { %v2034_v29 = vmul.f32 -1.442695, %v631_v8 }
  0xce   :  { %v2035_v26 = vmul.f32 -1.442695, %v632_v53  ;;  %v2650_v5 = vsel %vm2605_vm3, %v299_v24, %v337_v51 }
  0xcf   :  { %2168 = vpow2.f32 %v2034_v29  ;;  %3012 = vst [vmem:[#allocation18_spill] sm:$0xff] %v2650_v5 }
  0xd0   :  { %2170 = vpow2.f32 %v2035_v26 }
  0xd2   :  { %v627_v31 = vpop.f32.mrf.mxu3  ;;  %v590_v63 = vpop.f32.mrf.mxu0 }
  0xd3   :  { %v634_v52 = vadd.f32 %v627_v31, %v2645_v48  ;;  %v603_v32 = vpop.f32.mrf.mxu1 }
  0xd4   :  { %v614_v1 = vpop.f32.mrf.mxu2 }
  0xd5   :  { %v2036_v37 = vmul.f32 -1.442695, %v634_v52  ;;  %v2169_v43 = vpop.eup %2168  ;;  %v633_v20 = vadd.f32 %v614_v1, %v2650_v5 }
  0xd6   :  { %v2171_v7 = vpop.eup %2170  ;;  %v638_v19 = vadd.f32 1.0, %v2169_v43 }
  0xd7   :  { %2172 = vpow2.f32 %v2036_v37  ;;  %v657_v8 = vadd.f32 1.0, %v2171_v7 }
  0xd8   :  { %2174 = vrcp.f32 %v638_v19  ;;  %v650_v60 = vand.u32 2147483648, %v638_v19  ;;  %v648_v0 = vand.u32 2147483647, %v638_v19  ;;  %vm644_vm6 = vweird.f32 %v638_v19 }
  0xd9   :  { %2176 = vrcp.f32 %v657_v8  ;;  %v669_v43 = vand.u32 2147483648, %v657_v8  ;;  %v667_v51 = vand.u32 2147483647, %v657_v8  ;;  %vm663_vm7 = vweird.f32 %v657_v8 }
  0xda   :  { %v629_v26 = vpop.f32.mrf.mxu3  ;;  %vm649_vm9 = vcmp.eq.f32.partialorder %v648_v0, 8.507059e+37 }
  0xdb   :  { %v670_v9 = vor.u32 1.1754944e-38, %v669_v43  ;;  %vm668_vm11 = vcmp.eq.f32.partialorder %v667_v51, 8.507059e+37 }
  0xdc   :  { %v616_v38 = vpop.f32.mrf.mxu2 }
  0xdd   :  { %v2173_v46 = vpop.eup %2172 }
  0xde   :  { %v677_v29 = vadd.f32 1.0, %v2173_v46  ;;  %v2175_v53 = vpop.eup %2174  ;;  %v651_v46 = vor.u32 1.1754944e-38, %v650_v60 }
  0xdf   :  { %v2177_v31 = vpop.eup %2176  ;;  %v640_v52 = vmul.f32 %v2175_v53, %v638_v19  ;;  %vm645_vm4 = vweird.f32 %v2175_v53 }
  0xe0   :  { %2178 = vrcp.f32 %v677_v29  ;;  %v659_v63 = vmul.f32 %v2177_v31, %v657_v8  ;;  %vm664_vm5 = vweird.f32 %v2177_v31  ;;  %vm646_vm8 = vmor %vm644_vm6, %vm645_vm4  ;;  %v689_v8 = vand.u32 2147483648, %v677_v29 }
  0xe1   :  { %v641_v32 = vsub.f32 1.0, %v640_v52  ;;  %2180 = vtanh.f32 %v633_v20  ;;  %vm665_vm10 = vmor %vm663_vm7, %vm664_vm5  ;;  %vm683_vm13 = vweird.f32 %v677_v29 }
  0xe2   :  { %v660_v37 = vsub.f32 1.0, %v659_v63  ;;  %v690_v43 = vor.u32 1.1754944e-38, %v689_v8 }
  0xe3   :  { %v642_v7 = vmul.f32 %v2175_v53, %v641_v32 }
  0xe4   :  { %v661_v24 = vmul.f32 %v2177_v31, %v660_v37 }
  0xe5   :  { %v643_v38 = vadd.f32 %v2175_v53, %v642_v7 }
  0xe6   :  { %v2179_v26 = vpop.eup %2178  ;;  %v662_v54 = vadd.f32 %v2177_v31, %v661_v24 }
  0xe7   :  { %v679_v1 = vmul.f32 %v2179_v26, %v677_v29  ;;  %v647_v52 = vsel %vm646_vm8, %v2175_v53, %v643_v38  ;;  %v2181_v20 = vpop.eup %2180  ;;  %vm684_vm12 = vweird.f32 %v2179_v26  ;;  %v687_v53 = vand.u32 2147483647, %v677_v29 }
  0xe8   :  { %v652_v32 = vsel %vm649_vm9, %v651_v46, %v647_v52  ;;  %v666_v23 = vsel %vm665_vm10, %v2177_v31, %v662_v54  ;;  %vm685_vm14 = vmor %vm683_vm13, %vm684_vm12 }
  0xe9   :  { %v680_v63 = vsub.f32 1.0, %v679_v1  ;;  %v671_v37 = vsel %vm668_vm11, %v670_v9, %v666_v23  ;;  %v694_v17 = vmul.f32 %v2181_v20, %v652_v32  ;;  %vm688_vm15 = vcmp.eq.f32.partialorder %v687_v53, 8.507059e+37 }
  0xea   :  { %v693_v48 = vmul.f32 0.0, %v671_v37 }
  0xeb   :  { %v681_v5 = vmul.f32 %v2179_v26, %v680_v63 }
  0xec   :  { %v2653_v7 = vadd.f32 %v694_v17, %v693_v48 }
  0xed   :  { %v682_v19 = vadd.f32 %v2179_v26, %v681_v5 }
  0xee   :  { %2182 = vtanh.f32 %v2653_v7 }
  0xef   :  { %v686_v60 = vsel %vm685_vm14, %v2179_v26, %v682_v19 }
  0xf0   :  { %v691_v54 = vsel %vm688_vm15, %v690_v43, %v686_v60 }
  0xf4   :  { %v2183_v0 = vpop.eup %2182 }
  0xf5   :  { %v2656_v31 = vmul.f32 %v2183_v0, %v691_v54 }
  0xf7   :  { %3013 = vst [vmem:[#allocation19_spill] sm:$0xff] %v2656_v31  ;;  %v698_v23 = vpack.c.bf16 %v2656_v31, %v2656_v31 }
  0xf9   :  { %707 = vmatmul.bf16.vlgmr.msra.gmra.mxu0 %v698_v23  ;;  %720 = vmatmul.bf16.vlgmr.msra.gmra.mxu1 %v698_v23 }
  0xfa   :  { %733 = vmatmul.bf16.vlgmr.msra.gmra.mxu2 %v698_v23  ;;  %746 = vmatmul.bf16.vlgmr.msra.gmra.mxu3 %v698_v23 }
  0xfb   :  { %975 = vmatpush.bf16.msra.mxu0 %v2400_v41  ;;  %988 = vmatpush.bf16.msra.mxu1 %v2402_v42 }
  0xfc   :  { %1001 = vmatpush.bf16.msra.mxu2 %v2406_v49  ;;  %1014 = vmatpush.bf16.msra.mxu3 %v2404_v44 }
  0xff   :  { %976 = vmatpush.bf16.msra.mxu0 %v2410_v55  ;;  %989 = vmatpush.bf16.msra.mxu1 %v2412_v56 }
 0x100   :  { %1002 = vmatpush.bf16.msra.mxu2 %v2418_v62  ;;  %1015 = vmatpush.bf16.msra.mxu3 %v2415_v58 }
 0x103   :  { %977 = vmatpush.bf16.msra.mxu0 %v2422_v3  ;;  %990 = vmatpush.bf16.msra.mxu1 %v2424_v4 }
 0x104   :  { %1003 = vmatpush.bf16.msra.mxu2 %v2430_v10  ;;  %1016 = vmatpush.bf16.msra.mxu3 %v2427_v6 }
 0x107   :  { %978 = vmatpush.bf16.msra.mxu0 %v2434_v15  ;;  %991 = vmatpush.bf16.msra.mxu1 %v2436_v16 }
 0x108   :  { %1004 = vmatpush.bf16.msra.mxu2 %v2442_v22  ;;  %1017 = vmatpush.bf16.msra.mxu3 %v2439_v18 }
 0x10b   :  { %979 = vmatpush.bf16.msra.mxu0 %v2446_v27  ;;  %992 = vmatpush.bf16.msra.mxu1 %v2448_v28 }
 0x10c   :  { %1005 = vmatpush.bf16.msra.mxu2 %v2454_v34  ;;  %1018 = vmatpush.bf16.msra.mxu3 %v2451_v30 }
 0x10f   :  { %980 = vmatpush.bf16.msra.mxu0 %v2458_v39  ;;  %993 = vmatpush.bf16.msra.mxu1 %v2460_v40 }
 0x110   :  { %1006 = vmatpush.bf16.msra.mxu2 %v2466_v50  ;;  %1019 = vmatpush.bf16.msra.mxu3 %v2463_v45 }
 0x113   :  { %981 = vmatpush.bf16.msra.mxu0 %v2470_v57  ;;  %994 = vmatpush.bf16.msra.mxu1 %v2472_v59 }
 0x114   :  { %1007 = vmatpush.bf16.msra.mxu2 %v2478_v2  ;;  %1020 = vmatpush.bf16.msra.mxu3 %v2475_v61 }
 0x117   :  { %982 = vmatpush.bf16.msra.mxu0 %v2482_v11  ;;  %995 = vmatpush.bf16.msra.mxu1 %v2484_v12 }
 0x118   :  { %1008 = vmatpush.bf16.msra.mxu2 %v2490_v14  ;;  %1021 = vmatpush.bf16.msra.mxu3 %v2487_v13 }
 0x176   :  { %v708_v17 = vpop.f32.mrf.mxu0  ;;  %v721_v9 = vpop.f32.mrf.mxu1 }
 0x177   :  { %v755_v48 = vrot.slane %v708_v17, 6  ;;  %v756_v5 = vrot.slane %v721_v9, 6 }
 0x179   :  { %v763_v29 = vadd.f32 %v755_v48, %v2591_v25  ;;  %v764_v24 = vadd.f32 %v756_v5, %v2599_v33 }
 0x17b   :  { %v2037_v51 = vmul.f32 -1.442695, %v763_v29  ;;  %v2038_v26 = vmul.f32 -1.442695, %v764_v24 }
 0x17d   :  { %2184 = vpow2.f32 %v2037_v51  ;;  %v734_v38 = vpop.f32.mrf.mxu2  ;;  %v747_v1 = vpop.f32.mrf.mxu3 }
 0x17e   :  { %2186 = vpow2.f32 %v2038_v26  ;;  %v758_v46 = vrot.slane %v747_v1, 6  ;;  %v710_v52 = vpop.f32.mrf.mxu0  ;;  %v723_v20 = vpop.f32.mrf.mxu1  ;;  %v757_v0 = vrot.slane %v734_v38, 6 }
 0x180   :  { %v766_v63 = vadd.f32 %v758_v46, %v2619_v36  ;;  %v765_v9 = vadd.f32 %v757_v0, %v2631_v35 }
 0x182   :  { %v2039_v32 = vmul.f32 -1.442695, %v766_v63 }
 0x183   :  { %v2185_v37 = vpop.eup %2184 }
 0x184   :  { %v2187_v19 = vpop.eup %2186  ;;  %v770_v8 = vadd.f32 1.0, %v2185_v37  ;;  %2188 = vpow2.f32 %v2039_v32 }
 0x185   :  { %v789_v53 = vadd.f32 1.0, %v2187_v19  ;;  %v736_v60 = vpop.f32.mrf.mxu2  ;;  %v749_v43 = vpop.f32.mrf.mxu3 }
 0x186   :  { %2190 = vrcp.f32 %v770_v8  ;;  %v782_v26 = vand.u32 2147483648, %v770_v8  ;;  %v780_v52 = vand.u32 2147483647, %v770_v8  ;;  %vm776_vm2 = vweird.f32 %v770_v8 }
 0x187   :  { %2192 = vrcp.f32 %v789_v53  ;;  %v801_v1 = vand.u32 2147483648, %v789_v53  ;;  %v799_v38 = vand.u32 2147483647, %v789_v53  ;;  %vm795_vm3 = vweird.f32 %v789_v53 }
 0x188   :  { %v783_v37 = vor.u32 1.1754944e-38, %v782_v26  ;;  %v826_v43 = vrot.slane %v2653_v7, 6  ;;  %vm781_vm6 = vcmp.eq.f32.partialorder %v780_v52, 8.507059e+37 }
 0x189   :  { %v802_v0 = vor.u32 1.1754944e-38, %v801_v1  ;;  %vm800_vm7 = vcmp.eq.f32.partialorder %v799_v38, 8.507059e+37 }
 0x18a   :  { %v2189_v54 = vpop.eup %2188 }
 0x18b   :  { %v809_v23 = vadd.f32 1.0, %v2189_v54 }
 0x18c   :  { %v2191_v17 = vpop.eup %2190 }
 0x18d   :  { %v2193_v48 = vpop.eup %2192  ;;  %v772_v5 = vmul.f32 %v2191_v17, %v770_v8  ;;  %2194 = vrcp.f32 %v809_v23  ;;  %vm777_vm0 = vweird.f32 %v2191_v17  ;;  %v821_v7 = vand.u32 2147483648, %v809_v23 }
 0x18e   :  { %v791_v29 = vmul.f32 %v2193_v48, %v789_v53  ;;  %2196 = vtanh.f32 %v765_v9  ;;  %vm796_vm1 = vweird.f32 %v2193_v48  ;;  %vm778_vm4 = vmor %vm776_vm2, %vm777_vm0  ;;  %vm815_vm9 = vweird.f32 %v809_v23 }
 0x18f   :  { %v773_v24 = vsub.f32 1.0, %v772_v5  ;;  %vm797_vm5 = vmor %vm795_vm3, %vm796_vm1  ;;  %v819_v1 = vand.u32 2147483647, %v809_v23  ;;  %v822_v52 = vor.u32 1.1754944e-38, %v821_v7 }
 0x190   :  { %v792_v51 = vsub.f32 1.0, %v791_v29 }
 0x191   :  { %v774_v46 = vmul.f32 %v2191_v17, %v773_v24  ;;  %vm820_vm11 = vcmp.eq.f32.partialorder %v819_v1, 8.507059e+37 }
 0x192   :  { %v793_v20 = vmul.f32 %v2193_v48, %v792_v51 }
 0x193   :  { %v2195_v63 = vpop.eup %2194  ;;  %v775_v32 = vadd.f32 %v2191_v17, %v774_v46 }
 0x194   :  { %v794_v19 = vadd.f32 %v2193_v48, %v793_v20  ;;  %v811_v60 = vmul.f32 %v2195_v63, %v809_v23  ;;  %v2197_v9 = vpop.eup %2196  ;;  %vm816_vm8 = vweird.f32 %v2195_v63 }
 0x195   :  { %v779_v54 = vsel %vm778_vm4, %v2191_v17, %v775_v32  ;;  %vm817_vm10 = vmor %vm815_vm9, %vm816_vm8 }
 0x196   :  { %v784_v5 = vsel %vm781_vm6, %v783_v37, %v779_v54  ;;  %v798_v29 = vsel %vm797_vm5, %v2193_v48, %v794_v19  ;;  %v812_v24 = vsub.f32 1.0, %v811_v60 }
 0x197   :  { %v803_v51 = vsel %vm800_vm7, %v802_v0, %v798_v29  ;;  %v829_v31 = vmul.f32 %v2197_v9, %v784_v5 }
 0x198   :  { %v828_v46 = vmul.f32 %v826_v43, %v803_v51  ;;  %v813_v8 = vmul.f32 %v2195_v63, %v812_v24 }
 0x19a   :  { %v2697_v53 = vadd.f32 %v829_v31, %v828_v46  ;;  %v814_v26 = vadd.f32 %v2195_v63, %v813_v8  ;;  %v3015_v46 = vld [vmem:[#allocation17_spill] sm:$0xff] }
 0x19c   :  { %2198 = vtanh.f32 %v2697_v53  ;;  %v818_v17 = vsel %vm817_vm10, %v2195_v63, %v814_v26 }
 0x19d   :  { %v823_v20 = vsel %vm820_vm11, %v822_v52, %v818_v17 }
 0x1a2   :  { %v2199_v48 = vpop.eup %2198 }
 0x1a3   :  { %v2700_v38 = vmul.f32 %v2199_v48, %v823_v20 }
 0x1a5   :  { %3014 = vst [vmem:[#allocation20_spill] sm:$0xff] %v2700_v38  ;;  %v833_v32 = vpack.c.bf16 %v2700_v38, %v2700_v38 }
 0x1a7   :  { %v835_v31 = vrot.slane %v833_v32, 1 }
 0x1a9   :  { %845 = vmatmul.bf16.vlgmr.msrb.gmra.mxu0 %v835_v31  ;;  %858 = vmatmul.bf16.vlgmr.msrb.gmra.mxu1 %v835_v31 }
 0x1aa   :  { %871 = vmatmul.bf16.vlgmr.msrb.gmra.mxu2 %v835_v31  ;;  %884 = vmatmul.bf16.vlgmr.msrb.gmra.mxu3 %v835_v31 }
 0x1ab   :  { %1113 = vmatpush.bf16.msrb.mxu0 %v2400_v41  ;;  %1126 = vmatpush.bf16.msrb.mxu1 %v2402_v42 }
 0x1ac   :  { %1139 = vmatpush.bf16.msrb.mxu2 %v2406_v49  ;;  %1152 = vmatpush.bf16.msrb.mxu3 %v2404_v44 }
 0x1af   :  { %1114 = vmatpush.bf16.msrb.mxu0 %v2410_v55  ;;  %1127 = vmatpush.bf16.msrb.mxu1 %v2412_v56 }
 0x1b0   :  { %1140 = vmatpush.bf16.msrb.mxu2 %v2418_v62  ;;  %1153 = vmatpush.bf16.msrb.mxu3 %v2415_v58 }
 0x1b3   :  { %1115 = vmatpush.bf16.msrb.mxu0 %v2422_v3  ;;  %1128 = vmatpush.bf16.msrb.mxu1 %v2424_v4 }
 0x1b4   :  { %1141 = vmatpush.bf16.msrb.mxu2 %v2430_v10  ;;  %1154 = vmatpush.bf16.msrb.mxu3 %v2427_v6 }
 0x1b7   :  { %1116 = vmatpush.bf16.msrb.mxu0 %v2434_v15  ;;  %1129 = vmatpush.bf16.msrb.mxu1 %v2436_v16 }
 0x1b8   :  { %1142 = vmatpush.bf16.msrb.mxu2 %v2442_v22  ;;  %1155 = vmatpush.bf16.msrb.mxu3 %v2439_v18 }
 0x1bb   :  { %1117 = vmatpush.bf16.msrb.mxu0 %v2446_v27  ;;  %1130 = vmatpush.bf16.msrb.mxu1 %v2448_v28 }
 0x1bc   :  { %1143 = vmatpush.bf16.msrb.mxu2 %v2454_v34  ;;  %1156 = vmatpush.bf16.msrb.mxu3 %v2451_v30 }
 0x1bf   :  { %1118 = vmatpush.bf16.msrb.mxu0 %v2458_v39  ;;  %1131 = vmatpush.bf16.msrb.mxu1 %v2460_v40 }
 0x1c0   :  { %1144 = vmatpush.bf16.msrb.mxu2 %v2466_v50  ;;  %1157 = vmatpush.bf16.msrb.mxu3 %v2463_v45 }
 0x1c3   :  { %1119 = vmatpush.bf16.msrb.mxu0 %v2470_v57  ;;  %1132 = vmatpush.bf16.msrb.mxu1 %v2472_v59 }
 0x1c4   :  { %1145 = vmatpush.bf16.msrb.mxu2 %v2478_v2  ;;  %1158 = vmatpush.bf16.msrb.mxu3 %v2475_v61 }
 0x1c7   :  { %1120 = vmatpush.bf16.msrb.mxu0 %v2482_v11  ;;  %1133 = vmatpush.bf16.msrb.mxu1 %v2484_v12 }
 0x1c8   :  { %1146 = vmatpush.bf16.msrb.mxu2 %v2490_v14  ;;  %1159 = vmatpush.bf16.msrb.mxu3 %v2487_v13 }
 0x226   :  { %v846_v23 = vpop.f32.mrf.mxu0  ;;  %v859_v63 = vpop.f32.mrf.mxu1 }
 0x227   :  { %v893_v37 = vrot.slane %v846_v23, 4  ;;  %v894_v19 = vrot.slane %v859_v63, 4  ;;  %v3016_v23 = vld [vmem:[#allocation18_spill] sm:$0xff] }
 0x229   :  { %v901_v60 = vadd.f32 %v893_v37, %v2635_v47  ;;  %v902_v43 = vadd.f32 %v894_v19, %v2639_v21 }
 0x22b   :  { %v2040_v0 = vmul.f32 -1.442695, %v901_v60  ;;  %v2041_v54 = vmul.f32 -1.442695, %v902_v43 }
 0x22d   :  { %2200 = vpow2.f32 %v2040_v0  ;;  %v872_v9 = vpop.f32.mrf.mxu2  ;;  %v885_v5 = vpop.f32.mrf.mxu3 }
 0x22e   :  { %2202 = vpow2.f32 %v2041_v54  ;;  %v896_v29 = vrot.slane %v885_v5, 4  ;;  %v848_v24 = vpop.f32.mrf.mxu0  ;;  %v861_v51 = vpop.f32.mrf.mxu1  ;;  %v895_v21 = vrot.slane %v872_v9, 4 }
 0x230   :  { %v904_v8 = vadd.f32 %v896_v29, %v3015_v46  ;;  %v903_v63 = vadd.f32 %v895_v21, %v3016_v23 }
 0x232   :  { %v2042_v26 = vmul.f32 -1.442695, %v904_v8 }
 0x233   :  { %v2201_v7 = vpop.eup %2200 }
 0x234   :  { %v2203_v1 = vpop.eup %2202  ;;  %v908_v17 = vadd.f32 1.0, %v2201_v7  ;;  %2204 = vpow2.f32 %v2042_v26 }
 0x235   :  { %v927_v52 = vadd.f32 1.0, %v2203_v1  ;;  %v874_v47 = vpop.f32.mrf.mxu2  ;;  %v887_v48 = vpop.f32.mrf.mxu3 }
 0x236   :  { %2206 = vrcp.f32 %v908_v17  ;;  %v920_v54 = vand.u32 2147483648, %v908_v17  ;;  %v918_v24 = vand.u32 2147483647, %v908_v17  ;;  %vm914_vm14 = vweird.f32 %v908_v17 }
 0x237   :  { %2208 = vrcp.f32 %v927_v52  ;;  %v939_v5 = vand.u32 2147483648, %v927_v52  ;;  %v937_v9 = vand.u32 2147483647, %v927_v52  ;;  %vm933_vm15 = vweird.f32 %v927_v52 }
 0x238   :  { %v921_v26 = vor.u32 1.1754944e-38, %v920_v54  ;;  %v964_v47 = vrot.slane %v2697_v53, 6  ;;  %vm919_vm2 = vcmp.eq.f32.partialorder %v918_v24, 8.507059e+37 }
 0x239   :  { %v940_v48 = vor.u32 1.1754944e-38, %v939_v5  ;;  %vm938_vm3 = vcmp.eq.f32.partialorder %v937_v9, 8.507059e+37 }
 0x23a   :  { %v2205_v20 = vpop.eup %2204 }
 0x23b   :  { %v947_v32 = vadd.f32 1.0, %v2205_v20 }
 0x23c   :  { %v2207_v31 = vpop.eup %2206 }
 0x23d   :  { %v2209_v37 = vpop.eup %2208  ;;  %v910_v19 = vmul.f32 %v2207_v31, %v908_v17  ;;  %2210 = vrcp.f32 %v947_v32  ;;  %vm915_vm12 = vweird.f32 %v2207_v31  ;;  %v959_v53 = vand.u32 2147483648, %v947_v32 }
 0x23e   :  { %v929_v60 = vmul.f32 %v2209_v37, %v927_v52  ;;  %2212 = vtanh.f32 %v903_v63  ;;  %vm934_vm13 = vweird.f32 %v2209_v37  ;;  %vm916_vm0 = vmor %vm914_vm14, %vm915_vm12  ;;  %vm953_vm5 = vweird.f32 %v947_v32 }
 0x23f   :  { %v911_v43 = vsub.f32 1.0, %v910_v19  ;;  %vm935_vm1 = vmor %vm933_vm15, %vm934_vm13  ;;  %v957_v5 = vand.u32 2147483647, %v947_v32 }
 0x240   :  { %v930_v0 = vsub.f32 1.0, %v929_v60 }
 0x241   :  { %v912_v29 = vmul.f32 %v2207_v31, %v911_v43  ;;  %vm958_vm7 = vcmp.eq.f32.partialorder %v957_v5, 8.507059e+37 }
 0x242   :  { %v931_v51 = vmul.f32 %v2209_v37, %v930_v0 }
 0x243   :  { %v2211_v46 = vpop.eup %2210  ;;  %v913_v8 = vadd.f32 %v2207_v31, %v912_v29  ;;  %v960_v29 = vor.u32 1.1754944e-38, %v959_v53 }
 0x244   :  { %v932_v7 = vadd.f32 %v2209_v37, %v931_v51  ;;  %v949_v1 = vmul.f32 %v2211_v46, %v947_v32  ;;  %v2213_v20 = vpop.eup %2212  ;;  %vm954_vm4 = vweird.f32 %v2211_v46 }
 0x245   :  { %v917_v21 = vsel %vm916_vm0, %v2207_v31, %v913_v8  ;;  %vm955_vm6 = vmor %vm953_vm5, %vm954_vm4 }
 0x246   :  { %v922_v23 = vsel %vm919_vm2, %v921_v26, %v917_v21  ;;  %v936_v63 = vsel %vm935_vm1, %v2209_v37, %v932_v7  ;;  %v950_v19 = vsub.f32 1.0, %v949_v1 }
 0x247   :  { %v941_v60 = vsel %vm938_vm3, %v940_v48, %v936_v63  ;;  %v967_v43 = vmul.f32 %v2213_v20, %v922_v23 }
 0x248   :  { %v966_v0 = vmul.f32 %v964_v47, %v941_v60  ;;  %v951_v17 = vmul.f32 %v2211_v46, %v950_v19 }
 0x24a   :  { %v2741_v52 = vadd.f32 %v967_v43, %v966_v0  ;;  %v952_v54 = vadd.f32 %v2211_v46, %v951_v17 }
 0x24c   :  { %2214 = vtanh.f32 %v2741_v52  ;;  %v956_v31 = vsel %vm955_vm6, %v2211_v46, %v952_v54 }
 0x24d   :  { %v961_v24 = vsel %vm958_vm7, %v960_v29, %v956_v31 }
 0x252   :  { %v2215_v37 = vpop.eup %2214 }
 0x253   :  { %v2744_v51 = vmul.f32 %v2215_v37, %v961_v24 }
 0x255   :  { %v971_v9 = vpack.c.bf16 %v2744_v51, %v2744_v51 }
 0x257   :  { %v973_v8 = vrot.slane %v971_v9, 2 }
 0x259   :  { %983 = vmatmul.bf16.vlgmr.msra.gmra.mxu0 %v973_v8  ;;  %996 = vmatmul.bf16.vlgmr.msra.gmra.mxu1 %v973_v8 }
 0x25a   :  { %1009 = vmatmul.bf16.vlgmr.msra.gmra.mxu2 %v973_v8  ;;  %1022 = vmatmul.bf16.vlgmr.msra.gmra.mxu3 %v973_v8 }
 0x25b   :  { %1236 = vmatpush.bf16.msra.mxu0 %v2400_v41  ;;  %1249 = vmatpush.bf16.msra.mxu1 %v2402_v42 }
 0x25c   :  { %1262 = vmatpush.bf16.msra.mxu2 %v2406_v49  ;;  %1275 = vmatpush.bf16.msra.mxu3 %v2404_v44 }
 0x25f   :  { %1237 = vmatpush.bf16.msra.mxu0 %v2410_v55  ;;  %1250 = vmatpush.bf16.msra.mxu1 %v2412_v56 }
 0x260   :  { %1263 = vmatpush.bf16.msra.mxu2 %v2418_v62  ;;  %1276 = vmatpush.bf16.msra.mxu3 %v2415_v58 }
 0x263   :  { %1238 = vmatpush.bf16.msra.mxu0 %v2422_v3  ;;  %1251 = vmatpush.bf16.msra.mxu1 %v2424_v4 }
 0x264   :  { %1264 = vmatpush.bf16.msra.mxu2 %v2430_v10  ;;  %1277 = vmatpush.bf16.msra.mxu3 %v2427_v6 }
 0x267   :  { %1239 = vmatpush.bf16.msra.mxu0 %v2434_v15  ;;  %1252 = vmatpush.bf16.msra.mxu1 %v2436_v16 }
 0x268   :  { %1265 = vmatpush.bf16.msra.mxu2 %v2442_v22  ;;  %1278 = vmatpush.bf16.msra.mxu3 %v2439_v18 }
 0x26b   :  { %1240 = vmatpush.bf16.msra.mxu0 %v2446_v27  ;;  %1253 = vmatpush.bf16.msra.mxu1 %v2448_v28 }
 0x26c   :  { %1266 = vmatpush.bf16.msra.mxu2 %v2454_v34  ;;  %1279 = vmatpush.bf16.msra.mxu3 %v2451_v30 }
 0x26f   :  { %1241 = vmatpush.bf16.msra.mxu0 %v2458_v39  ;;  %1254 = vmatpush.bf16.msra.mxu1 %v2460_v40 }
 0x270   :  { %1267 = vmatpush.bf16.msra.mxu2 %v2466_v50  ;;  %1280 = vmatpush.bf16.msra.mxu3 %v2463_v45 }
 0x273   :  { %1242 = vmatpush.bf16.msra.mxu0 %v2470_v57  ;;  %1255 = vmatpush.bf16.msra.mxu1 %v2472_v59 }
 0x274   :  { %1268 = vmatpush.bf16.msra.mxu2 %v2478_v2  ;;  %1281 = vmatpush.bf16.msra.mxu3 %v2475_v61 }
 0x277   :  { %1243 = vmatpush.bf16.msra.mxu0 %v2482_v11  ;;  %1256 = vmatpush.bf16.msra.mxu1 %v2484_v12 }
 0x278   :  { %1269 = vmatpush.bf16.msra.mxu2 %v2490_v14  ;;  %1282 = vmatpush.bf16.msra.mxu3 %v2487_v13 }
 0x2d6   :  { %v984_v32 = vpop.f32.mrf.mxu0  ;;  %v997_v46 = vpop.f32.mrf.mxu1 }
 0x2d7   :  { %v1031_v26 = vrot.slane %v984_v32, 2  ;;  %v1032_v7 = vrot.slane %v997_v46, 2 }
 0x2d9   :  { %v1039_v1 = vadd.f32 %v1031_v26, %v2591_v25  ;;  %v1040_v47 = vadd.f32 %v1032_v7, %v2599_v33 }
 0x2db   :  { %v2043_v48 = vmul.f32 -1.442695, %v1039_v1  ;;  %v2044_v21 = vmul.f32 -1.442695, %v1040_v47 }
 0x2dd   :  { %2216 = vpow2.f32 %v2043_v48  ;;  %v1010_v20 = vpop.f32.mrf.mxu2  ;;  %v1023_v23 = vpop.f32.mrf.mxu3 }
 0x2de   :  { %2218 = vpow2.f32 %v2044_v21  ;;  %v1034_v63 = vrot.slane %v1023_v23, 2  ;;  %v986_v19 = vpop.f32.mrf.mxu0  ;;  %v999_v60 = vpop.f32.mrf.mxu1  ;;  %v1033_v33 = vrot.slane %v1010_v20, 2 }
 0x2e0   :  { %v1042_v43 = vadd.f32 %v1034_v63, %v2619_v36  ;;  %v1041_v9 = vadd.f32 %v1033_v33, %v2631_v35 }
 0x2e2   :  { %v2045_v0 = vmul.f32 -1.442695, %v1042_v43  ;;  %v1102_v43 = vrot.slane %v2741_v52, 6 }
 0x2e3   :  { %v2217_v17 = vpop.eup %2216 }
 0x2e4   :  { %v2219_v54 = vpop.eup %2218  ;;  %v1046_v53 = vadd.f32 1.0, %v2217_v17  ;;  %2220 = vpow2.f32 %v2045_v0 }
 0x2e5   :  { %v1065_v5 = vadd.f32 1.0, %v2219_v54  ;;  %v1012_v25 = vpop.f32.mrf.mxu2  ;;  %v1025_v31 = vpop.f32.mrf.mxu3 }
 0x2e6   :  { %2222 = vrcp.f32 %v1046_v53  ;;  %v1058_v7 = vand.u32 2147483648, %v1046_v53  ;;  %v1056_v48 = vand.u32 2147483647, %v1046_v53  ;;  %vm1052_vm10 = vweird.f32 %v1046_v53 }
 0x2e7   :  { %2224 = vrcp.f32 %v1065_v5  ;;  %v1077_v1 = vand.u32 2147483648, %v1065_v5  ;;  %v1075_v20 = vand.u32 2147483647, %v1065_v5  ;;  %vm1071_vm11 = vweird.f32 %v1065_v5 }
 0x2e8   :  { %v1059_v35 = vor.u32 1.1754944e-38, %v1058_v7  ;;  %vm1057_vm14 = vcmp.eq.f32.partialorder %v1056_v48, 8.507059e+37 }
 0x2e9   :  { %v1078_v0 = vor.u32 1.1754944e-38, %v1077_v1  ;;  %vm1076_vm15 = vcmp.eq.f32.partialorder %v1075_v20, 8.507059e+37  ;;  %v3017_v20 = vld [vmem:[#allocation9_spill] sm:$0xff] }
 0x2ea   :  { %v2221_v29 = vpop.eup %2220 }
 0x2eb   :  { %v1085_v37 = vadd.f32 1.0, %v2221_v29 }
 0x2ec   :  { %v2223_v24 = vpop.eup %2222 }
 0x2ed   :  { %v2225_v8 = vpop.eup %2224  ;;  %v1048_v32 = vmul.f32 %v2223_v24, %v1046_v53  ;;  %2226 = vrcp.f32 %v1085_v37  ;;  %vm1053_vm8 = vweird.f32 %v2223_v24  ;;  %v1097_v52 = vand.u32 2147483648, %v1085_v37 }
 0x2ee   :  { %v1067_v36 = vmul.f32 %v2225_v8, %v1065_v5  ;;  %2228 = vtanh.f32 %v1041_v9  ;;  %vm1072_vm9 = vweird.f32 %v2225_v8  ;;  %vm1054_vm12 = vmor %vm1052_vm10, %vm1053_vm8  ;;  %vm1091_vm1 = vweird.f32 %v1085_v37 }
 0x2ef   :  { %v1049_v46 = vsub.f32 1.0, %v1048_v32  ;;  %vm1073_vm13 = vmor %vm1071_vm11, %vm1072_vm9 }
 0x2f0   :  { %v1068_v26 = vsub.f32 1.0, %v1067_v36 }
 0x2f1   :  { %v1050_v47 = vmul.f32 %v2223_v24, %v1049_v46  ;;  %v1095_v46 = vand.u32 2147483647, %v1085_v37 }
 0x2f2   :  { %v1069_v21 = vmul.f32 %v2225_v8, %v1068_v26  ;;  %v1098_v26 = vor.u32 1.1754944e-38, %v1097_v52 }
 0x2f3   :  { %v2227_v23 = vpop.eup %2226  ;;  %v1051_v63 = vadd.f32 %v2223_v24, %v1050_v47  ;;  %vm1096_vm3 = vcmp.eq.f32.partialorder %v1095_v46, 8.507059e+37 }
 0x2f4   :  { %v1070_v19 = vadd.f32 %v2225_v8, %v1069_v21  ;;  %v1087_v60 = vmul.f32 %v2227_v23, %v1085_v37  ;;  %v2229_v54 = vpop.eup %2228  ;;  %vm1092_vm0 = vweird.f32 %v2227_v23 }
 0x2f5   :  { %v1055_v17 = vsel %vm1054_vm12, %v2223_v24, %v1051_v63  ;;  %vm1093_vm2 = vmor %vm1091_vm1, %vm1092_vm0  ;;  %v3018_v63 = vld [vmem:[#allocation11_spill] sm:$0xff] }
 0x2f6   :  { %v1060_v25 = vsel %vm1057_vm14, %v1059_v35, %v1055_v17  ;;  %v1074_v31 = vsel %vm1073_vm13, %v2225_v8, %v1070_v19  ;;  %v1088_v33 = vsub.f32 1.0, %v1087_v60  ;;  %v3019_v17 = vld [vmem:[#allocation13_spill] sm:$0xff] }
 0x2f7   :  { %v1079_v29 = vsel %vm1076_vm15, %v1078_v0, %v1074_v31  ;;  %v1105_v9 = vmul.f32 %v2229_v54, %v1060_v25 }
 0x2f8   :  { %v1104_v32 = vmul.f32 %v1102_v43, %v1079_v29  ;;  %v1089_v53 = vmul.f32 %v2227_v23, %v1088_v33 }
 0x2fa   :  { %v2785_v5 = vadd.f32 %v1105_v9, %v1104_v32  ;;  %v1090_v36 = vadd.f32 %v2227_v23, %v1089_v53 }
 0x2fc   :  { %2230 = vtanh.f32 %v2785_v5  ;;  %v1094_v24 = vsel %vm1093_vm2, %v2227_v23, %v1090_v36 }
 0x2fd   :  { %v1099_v7 = vsel %vm1096_vm3, %v1098_v26, %v1094_v24 }
 0x302   :  { %v2231_v8 = vpop.eup %2230 }
 0x303   :  { %v2788_v1 = vmul.f32 %v2231_v8, %v1099_v7  ;;  %v3020_v8 = vld [vmem:[#allocation15_spill] sm:$0xff] }
 0x305   :  { %v1109_v47 = vpack.c.bf16 %v2788_v1, %v2788_v1 }
 0x307   :  { %v1111_v48 = vrot.slane %v1109_v47, 3 }
 0x309   :  { %1121 = vmatmul.bf16.vlgmr.msrb.gmra.mxu0 %v1111_v48  ;;  %1134 = vmatmul.bf16.vlgmr.msrb.gmra.mxu1 %v1111_v48 }
 0x30a   :  { %1147 = vmatmul.bf16.vlgmr.msrb.gmra.mxu2 %v1111_v48  ;;  %1160 = vmatmul.bf16.vlgmr.msrb.gmra.mxu3 %v1111_v48 }
 0x30b   :  { %1374 = vmatpush.bf16.msrb.mxu0 %v2400_v41  ;;  %1387 = vmatpush.bf16.msrb.mxu1 %v2402_v42 }
 0x30c   :  { %1400 = vmatpush.bf16.msrb.mxu2 %v2406_v49  ;;  %1413 = vmatpush.bf16.msrb.mxu3 %v2404_v44 }
 0x30f   :  { %1375 = vmatpush.bf16.msrb.mxu0 %v2410_v55  ;;  %1388 = vmatpush.bf16.msrb.mxu1 %v2412_v56 }
 0x310   :  { %1401 = vmatpush.bf16.msrb.mxu2 %v2418_v62  ;;  %1414 = vmatpush.bf16.msrb.mxu3 %v2415_v58 }
 0x313   :  { %1376 = vmatpush.bf16.msrb.mxu0 %v2422_v3  ;;  %1389 = vmatpush.bf16.msrb.mxu1 %v2424_v4 }
 0x314   :  { %1402 = vmatpush.bf16.msrb.mxu2 %v2430_v10  ;;  %1415 = vmatpush.bf16.msrb.mxu3 %v2427_v6 }
 0x317   :  { %1377 = vmatpush.bf16.msrb.mxu0 %v2434_v15  ;;  %1390 = vmatpush.bf16.msrb.mxu1 %v2436_v16 }
 0x318   :  { %1403 = vmatpush.bf16.msrb.mxu2 %v2442_v22  ;;  %1416 = vmatpush.bf16.msrb.mxu3 %v2439_v18 }
 0x31b   :  { %1378 = vmatpush.bf16.msrb.mxu0 %v2446_v27  ;;  %1391 = vmatpush.bf16.msrb.mxu1 %v2448_v28 }
 0x31c   :  { %1404 = vmatpush.bf16.msrb.mxu2 %v2454_v34  ;;  %1417 = vmatpush.bf16.msrb.mxu3 %v2451_v30 }
 0x31f   :  { %1379 = vmatpush.bf16.msrb.mxu0 %v2458_v39  ;;  %1392 = vmatpush.bf16.msrb.mxu1 %v2460_v40 }
 0x320   :  { %1405 = vmatpush.bf16.msrb.mxu2 %v2466_v50  ;;  %1418 = vmatpush.bf16.msrb.mxu3 %v2463_v45 }
 0x323   :  { %1380 = vmatpush.bf16.msrb.mxu0 %v2470_v57  ;;  %1393 = vmatpush.bf16.msrb.mxu1 %v2472_v59 }
 0x324   :  { %1406 = vmatpush.bf16.msrb.mxu2 %v2478_v2  ;;  %1419 = vmatpush.bf16.msrb.mxu3 %v2475_v61 }
 0x327   :  { %1381 = vmatpush.bf16.msrb.mxu0 %v2482_v11  ;;  %1394 = vmatpush.bf16.msrb.mxu1 %v2484_v12 }
 0x328   :  { %1407 = vmatpush.bf16.msrb.mxu2 %v2490_v14  ;;  %1420 = vmatpush.bf16.msrb.mxu3 %v2487_v13 }
 0x386   :  { %v1122_v37 = vpop.f32.mrf.mxu0  ;;  %v1135_v21 = vpop.f32.mrf.mxu1 }
 0x387   :  { %v1165_v23 = vadd.f32 %v1122_v37, %v3017_v20  ;;  %v1166_v35 = vadd.f32 %v1135_v21, %v3018_v63 }
 0x389   :  { %v2046_v19 = vmul.f32 -1.442695, %v1165_v23  ;;  %v2047_v60 = vmul.f32 -1.442695, %v1166_v35 }
 0x38b   :  { %2232 = vpow2.f32 %v2046_v19 }
 0x38c   :  { %2234 = vpow2.f32 %v2047_v60 }
 0x38d   :  { %v1148_v43 = vpop.f32.mrf.mxu2  ;;  %v1161_v0 = vpop.f32.mrf.mxu3 }
 0x38e   :  { %v1168_v54 = vadd.f32 %v1161_v0, %v3019_v17  ;;  %v1124_v25 = vpop.f32.mrf.mxu0  ;;  %v1137_v31 = vpop.f32.mrf.mxu1  ;;  %v1167_v7 = vadd.f32 %v1148_v43, %v3020_v8 }
 0x390   :  { %v2048_v33 = vmul.f32 -1.442695, %v1168_v54 }
 0x391   :  { %v2233_v29 = vpop.eup %2232 }
 0x392   :  { %v2235_v9 = vpop.eup %2234  ;;  %v1172_v32 = vadd.f32 1.0, %v2233_v29  ;;  %2236 = vpow2.f32 %v2048_v33 }
 0x393   :  { %v1191_v53 = vadd.f32 1.0, %v2235_v9 }
 0x394   :  { %2238 = vrcp.f32 %v1172_v32  ;;  %v1184_v35 = vand.u32 2147483648, %v1172_v32  ;;  %v1182_v0 = vand.u32 2147483647, %v1172_v32  ;;  %vm1178_vm6 = vweird.f32 %v1172_v32 }
 0x395   :  { %2240 = vrcp.f32 %v1191_v53  ;;  %v1150_v36 = vpop.f32.mrf.mxu2  ;;  %v1163_v52 = vpop.f32.mrf.mxu3  ;;  %v1203_v19 = vand.u32 2147483648, %v1191_v53  ;;  %v1201_v25 = vand.u32 2147483647, %v1191_v53  ;;  %vm1197_vm7 = vweird.f32 %v1191_v53 }
 0x396   :  { %v1185_v43 = vor.u32 1.1754944e-38, %v1184_v35  ;;  %vm1183_vm10 = vcmp.eq.f32.partialorder %v1182_v0, 8.507059e+37 }
 0x397   :  { %v1204_v36 = vor.u32 1.1754944e-38, %v1203_v19  ;;  %vm1202_vm11 = vcmp.eq.f32.partialorder %v1201_v25, 8.507059e+37 }
 0x398   :  { %v2237_v46 = vpop.eup %2236 }
 0x399   :  { %v1211_v24 = vadd.f32 1.0, %v2237_v46  ;;  %v1228_v46 = vrot.slane %v2785_v5, 6 }
 0x39a   :  { %v2239_v26 = vpop.eup %2238 }
 0x39b   :  { %v2241_v47 = vpop.eup %2240  ;;  %v1174_v48 = vmul.f32 %v2239_v26, %v1172_v32  ;;  %2242 = vrcp.f32 %v1211_v24  ;;  %vm1179_vm4 = vweird.f32 %v2239_v26  ;;  %v1223_v19 = vand.u32 2147483648, %v1211_v24 }
 0x39c   :  { %v1193_v37 = vmul.f32 %v2241_v47, %v1191_v53  ;;  %2244 = vtanh.f32 %v1167_v7  ;;  %vm1198_vm5 = vweird.f32 %v2241_v47  ;;  %vm1180_vm8 = vmor %vm1178_vm6, %vm1179_vm4  ;;  %vm1217_vm13 = vweird.f32 %v1211_v24 }
 0x39d   :  { %v1175_v21 = vsub.f32 1.0, %v1174_v48  ;;  %vm1199_vm9 = vmor %vm1197_vm7, %vm1198_vm5  ;;  %v1224_v0 = vor.u32 1.1754944e-38, %v1223_v19 }
 0x39e   :  { %v1194_v23 = vsub.f32 1.0, %v1193_v37 }
 0x39f   :  { %v1176_v60 = vmul.f32 %v2239_v26, %v1175_v21 }
 0x3a0   :  { %v1195_v54 = vmul.f32 %v2241_v47, %v1194_v23 }
 0x3a1   :  { %v2243_v31 = vpop.eup %2242  ;;  %v1177_v33 = vadd.f32 %v2239_v26, %v1176_v60 }
 0x3a2   :  { %v1196_v29 = vadd.f32 %v2241_v47, %v1195_v54  ;;  %v1213_v9 = vmul.f32 %v2243_v31, %v1211_v24  ;;  %v2245_v7 = vpop.eup %2244  ;;  %vm1218_vm12 = vweird.f32 %v2243_v31 }
 0x3a3   :  { %v1181_v52 = vsel %vm1180_vm8, %v2239_v26, %v1177_v33  ;;  %v1221_v26 = vand.u32 2147483647, %v1211_v24  ;;  %vm1219_vm14 = vmor %vm1217_vm13, %vm1218_vm12  ;;  %vm1678_vm13 = vcmask 1041408  }
 0x3a4   :  { %v1186_v48 = vsel %vm1183_vm10, %v1185_v43, %v1181_v52  ;;  %v1200_v37 = vsel %vm1199_vm9, %v2241_v47, %v1196_v29  ;;  %v1214_v21 = vsub.f32 1.0, %v1213_v9 }
 0x3a5   :  { %v1205_v23 = vsel %vm1202_vm11, %v1204_v36, %v1200_v37  ;;  %v1231_v38 = vmul.f32 %v2245_v7, %v1186_v48  ;;  %vm1222_vm15 = vcmp.eq.f32.partialorder %v1221_v26, 8.507059e+37 }
 0x3a6   :  { %v1230_v60 = vmul.f32 %v1228_v46, %v1205_v23  ;;  %v1215_v32 = vmul.f32 %v2243_v31, %v1214_v21 }
 0x3a8   :  { %v2829_v53 = vadd.f32 %v1231_v38, %v1230_v60  ;;  %v1216_v35 = vadd.f32 %v2243_v31, %v1215_v32 }
 0x3aa   :  { %2246 = vtanh.f32 %v2829_v53  ;;  %v1220_v5 = vsel %vm1219_vm14, %v2243_v31, %v1216_v35  ;;  %v1363_v60 = vrot.slane %v2829_v53, 6 }
 0x3ab   :  { %v1225_v54 = vsel %vm1222_vm15, %v1224_v0, %v1220_v5 }
 0x3b0   :  { %v2247_v47 = vpop.eup %2246 }
 0x3b1   :  { %v2832_v25 = vmul.f32 %v2247_v47, %v1225_v54 }
 0x3b3   :  { %v1235_v33 = vpack.c.bf16 %v2832_v25, %v2832_v25 }
 0x3b5   :  { %1244 = vmatmul.bf16.vlgmr.msra.gmra.mxu0 %v1235_v33  ;;  %1257 = vmatmul.bf16.vlgmr.msra.gmra.mxu1 %v1235_v33 }
 0x3b6   :  { %1270 = vmatmul.bf16.vlgmr.msra.gmra.mxu2 %v1235_v33  ;;  %1283 = vmatmul.bf16.vlgmr.msra.gmra.mxu3 %v1235_v33 }
 0x3b7   :  { %1512 = vmatpush.bf16.msra.mxu0 %v2400_v41  ;;  %1525 = vmatpush.bf16.msra.mxu1 %v2402_v42 }
 0x3b8   :  { %1538 = vmatpush.bf16.msra.mxu2 %v2406_v49  ;;  %1551 = vmatpush.bf16.msra.mxu3 %v2404_v44 }
 0x3bb   :  { %1513 = vmatpush.bf16.msra.mxu0 %v2410_v55  ;;  %1526 = vmatpush.bf16.msra.mxu1 %v2412_v56  ;;  %v3021_v55 = vld [vmem:[#allocation10_spill] sm:$0xff] }
 0x3bc   :  { %1539 = vmatpush.bf16.msra.mxu2 %v2418_v62  ;;  %1552 = vmatpush.bf16.msra.mxu3 %v2415_v58  ;;  %v3022_v58 = vld [vmem:[#allocation12_spill] sm:$0xff] }
 0x3bf   :  { %1514 = vmatpush.bf16.msra.mxu0 %v2422_v3  ;;  %1527 = vmatpush.bf16.msra.mxu1 %v2424_v4 }
 0x3c0   :  { %1540 = vmatpush.bf16.msra.mxu2 %v2430_v10  ;;  %1553 = vmatpush.bf16.msra.mxu3 %v2427_v6 }
 0x3c3   :  { %1515 = vmatpush.bf16.msra.mxu0 %v2434_v15  ;;  %1528 = vmatpush.bf16.msra.mxu1 %v2436_v16 }
 0x3c4   :  { %1541 = vmatpush.bf16.msra.mxu2 %v2442_v22  ;;  %1554 = vmatpush.bf16.msra.mxu3 %v2439_v18  ;;  %v3023_v22 = vld [vmem:[#allocation14_spill] sm:$0xff] }
 0x3c7   :  { %1516 = vmatpush.bf16.msra.mxu0 %v2446_v27  ;;  %1529 = vmatpush.bf16.msra.mxu1 %v2448_v28 }
 0x3c8   :  { %1542 = vmatpush.bf16.msra.mxu2 %v2454_v34  ;;  %1555 = vmatpush.bf16.msra.mxu3 %v2451_v30 }
 0x3cb   :  { %1517 = vmatpush.bf16.msra.mxu0 %v2458_v39  ;;  %1530 = vmatpush.bf16.msra.mxu1 %v2460_v40 }
 0x3cc   :  { %1543 = vmatpush.bf16.msra.mxu2 %v2466_v50  ;;  %1556 = vmatpush.bf16.msra.mxu3 %v2463_v45 }
 0x3cf   :  { %1518 = vmatpush.bf16.msra.mxu0 %v2470_v57  ;;  %1531 = vmatpush.bf16.msra.mxu1 %v2472_v59 }
 0x3d0   :  { %1544 = vmatpush.bf16.msra.mxu2 %v2478_v2  ;;  %1557 = vmatpush.bf16.msra.mxu3 %v2475_v61 }
 0x3d3   :  { %1519 = vmatpush.bf16.msra.mxu0 %v2482_v11  ;;  %1532 = vmatpush.bf16.msra.mxu1 %v2484_v12  ;;  %v3024_v11 = vld [vmem:[#allocation16_spill] sm:$0xff] }
 0x3d4   :  { %1545 = vmatpush.bf16.msra.mxu2 %v2490_v14  ;;  %1558 = vmatpush.bf16.msra.mxu3 %v2487_v13 }
 0x432   :  { %v1245_v41 = vpop.f32.mrf.mxu0  ;;  %v1258_v42 = vpop.f32.mrf.mxu1 }
 0x433   :  { %v1292_v44 = vrot.slane %v1245_v41, 6  ;;  %v1293_v49 = vrot.slane %v1258_v42, 6 }
 0x435   :  { %v1300_v56 = vadd.f32 %v1292_v44, %v3021_v55  ;;  %v1301_v62 = vadd.f32 %v1293_v49, %v3022_v58 }
 0x437   :  { %v2049_v3 = vmul.f32 -1.442695, %v1300_v56  ;;  %v2050_v4 = vmul.f32 -1.442695, %v1301_v62 }
 0x439   :  { %2248 = vpow2.f32 %v2049_v3  ;;  %v1271_v6 = vpop.f32.mrf.mxu2  ;;  %v1284_v10 = vpop.f32.mrf.mxu3 }
 0x43a   :  { %2250 = vpow2.f32 %v2050_v4  ;;  %v1295_v15 = vrot.slane %v1284_v10, 6  ;;  %v1247_v16 = vpop.f32.mrf.mxu0  ;;  %v1260_v18 = vpop.f32.mrf.mxu1  ;;  %v1294_v57 = vrot.slane %v1271_v6, 6  ;;  %v3025_v6 = vld [vmem:[#allocation8_spill] sm:$0xff]  ;;  %v1667_v10 = vrot.slane %v2744_v51, 2 }
 0x43b   :  { %vm330_vm12 = vcmp.lt.s32.totalorder %v3025_v6, 64 }
 0x43c   :  { %v1303_v27 = vadd.f32 %v1295_v15, %v3023_v22  ;;  %v1302_v12 = vadd.f32 %v1294_v57, %v3024_v11  ;;  %v1663_v15 = vrot.slane %v2788_v1, 6 }
 0x43e   :  { %v2051_v28 = vmul.f32 -1.442695, %v1303_v27  ;;  %v1665_v27 = vsel %vm330_vm12, %v2832_v25, %v1663_v15 }
 0x43f   :  { %v2249_v30 = vpop.eup %2248 }
 0x440   :  { %v2251_v34 = vpop.eup %2250  ;;  %v1307_v39 = vadd.f32 1.0, %v2249_v30  ;;  %2252 = vpow2.f32 %v2051_v28 }
 0x441   :  { %v1326_v40 = vadd.f32 1.0, %v2251_v34  ;;  %v1273_v45 = vpop.f32.mrf.mxu2  ;;  %v1286_v50 = vpop.f32.mrf.mxu3 }
 0x442   :  { %2254 = vrcp.f32 %v1307_v39  ;;  %v1319_v43 = vand.u32 2147483648, %v1307_v39  ;;  %v1317_v36 = vand.u32 2147483647, %v1307_v39  ;;  %vm1313_vm2 = vweird.f32 %v1307_v39 }
 0x443   :  { %2256 = vrcp.f32 %v1326_v40  ;;  %v1338_v29 = vand.u32 2147483648, %v1326_v40  ;;  %v1336_v46 = vand.u32 2147483647, %v1326_v40  ;;  %vm1332_vm3 = vweird.f32 %v1326_v40 }
 0x444   :  { %v1320_v37 = vor.u32 1.1754944e-38, %v1319_v43  ;;  %vm1318_vm6 = vcmp.eq.f32.partialorder %v1317_v36, 8.507059e+37 }
 0x445   :  { %v1339_v32 = vor.u32 1.1754944e-38, %v1338_v29  ;;  %vm1337_vm7 = vcmp.eq.f32.partialorder %v1336_v46, 8.507059e+37 }
 0x446   :  { %v2253_v59 = vpop.eup %2252 }
 0x447   :  { %v1346_v61 = vadd.f32 1.0, %v2253_v59 }
 0x448   :  { %v2255_v2 = vpop.eup %2254 }
 0x449   :  { %v2257_v13 = vpop.eup %2256  ;;  %v1309_v14 = vmul.f32 %v2255_v2, %v1307_v39  ;;  %2258 = vrcp.f32 %v1346_v61  ;;  %vm1314_vm0 = vweird.f32 %v2255_v2  ;;  %v1358_v53 = vand.u32 2147483648, %v1346_v61 }
 0x44a   :  { %v1328_v38 = vmul.f32 %v2257_v13, %v1326_v40  ;;  %2260 = vtanh.f32 %v1302_v12  ;;  %vm1333_vm1 = vweird.f32 %v2257_v13  ;;  %vm1315_vm4 = vmor %vm1313_vm2, %vm1314_vm0  ;;  %vm1352_vm9 = vweird.f32 %v1346_v61 }
 0x44b   :  { %v1310_v24 = vsub.f32 1.0, %v1309_v14  ;;  %vm1334_vm5 = vmor %vm1332_vm3, %vm1333_vm1  ;;  %v1356_v49 = vand.u32 2147483647, %v1346_v61  ;;  %v1359_v62 = vor.u32 1.1754944e-38, %v1358_v53 }
 0x44c   :  { %v1329_v31 = vsub.f32 1.0, %v1328_v38 }
 0x44d   :  { %v1311_v9 = vmul.f32 %v2255_v2, %v1310_v24  ;;  %vm1357_vm11 = vcmp.eq.f32.partialorder %v1356_v49, 8.507059e+37 }
 0x44e   :  { %v1330_v52 = vmul.f32 %v2257_v13, %v1329_v31 }
 0x44f   :  { %v2259_v7 = vpop.eup %2258  ;;  %v1312_v48 = vadd.f32 %v2255_v2, %v1311_v9 }
 0x450   :  { %v1331_v21 = vadd.f32 %v2257_v13, %v1330_v52  ;;  %v1348_v23 = vmul.f32 %v2259_v7, %v1346_v61  ;;  %v2261_v19 = vpop.eup %2260  ;;  %vm1353_vm8 = vweird.f32 %v2259_v7 }
 0x451   :  { %v1316_v35 = vsel %vm1315_vm4, %v2255_v2, %v1312_v48  ;;  %vm1354_vm10 = vmor %vm1352_vm9, %vm1353_vm8 }
 0x452   :  { %v1321_v26 = vsel %vm1318_vm6, %v1320_v37, %v1316_v35  ;;  %v1335_v5 = vsel %vm1334_vm5, %v2257_v13, %v1331_v21  ;;  %v1349_v0 = vsub.f32 1.0, %v1348_v23 }
 0x453   :  { %v1340_v47 = vsel %vm1337_vm7, %v1339_v32, %v1335_v5  ;;  %v1366_v54 = vmul.f32 %v2261_v19, %v1321_v26 }
 0x454   :  { %v1365_v33 = vmul.f32 %v1363_v60, %v1340_v47  ;;  %v1350_v41 = vmul.f32 %v2259_v7, %v1349_v0 }
 0x456   :  { %v2873_v42 = vadd.f32 %v1366_v54, %v1365_v33  ;;  %v1351_v44 = vadd.f32 %v2259_v7, %v1350_v41 }
 0x458   :  { %2262 = vtanh.f32 %v2873_v42  ;;  %v1355_v56 = vsel %vm1354_vm10, %v2259_v7, %v1351_v44  ;;  %v1501_v49 = vrot.slane %v2873_v42, 6  ;;  %vm1680_vm10 = vcmask 1043456  }
 0x459   :  { %v1360_v4 = vsel %vm1357_vm11, %v1359_v62, %v1355_v56 }
 0x45e   :  { %v2263_v3 = vpop.eup %2262 }
 0x45f   :  { %v2879_v16 = vmul.f32 %v2263_v3, %v1360_v4 }
 0x461   :  { %v1370_v18 = vpack.c.bf16 %v2879_v16, %v2879_v16  ;;  %v1669_v28 = vsel %vm330_vm12, %v2879_v16, %v1667_v10 }
 0x462   :  { %v2890_v30 = vsel %vm1678_vm13, %v1665_v27, %v1669_v28 }
 0x463   :  { %v1372_v34 = vrot.slane %v1370_v18, 1 }
 0x465   :  { %1382 = vmatmul.bf16.vlgmr.msrb.gmra.mxu0 %v1372_v34  ;;  %1395 = vmatmul.bf16.vlgmr.msrb.gmra.mxu1 %v1372_v34 }
 0x466   :  { %1408 = vmatmul.bf16.vlgmr.msrb.gmra.mxu2 %v1372_v34  ;;  %1421 = vmatmul.bf16.vlgmr.msrb.gmra.mxu3 %v1372_v34 }
 0x4e2   :  { %v1383_v39 = vpop.f32.mrf.mxu0  ;;  %v1396_v40 = vpop.f32.mrf.mxu1 }
 0x4e3   :  { %v1430_v45 = vrot.slane %v1383_v39, 4  ;;  %v1431_v50 = vrot.slane %v1396_v40, 4 }
 0x4e5   :  { %v1438_v57 = vadd.f32 %v1430_v45, %v3017_v20  ;;  %v1439_v59 = vadd.f32 %v1431_v50, %v3018_v63 }
 0x4e7   :  { %v2052_v61 = vmul.f32 -1.442695, %v1438_v57  ;;  %v2053_v2 = vmul.f32 -1.442695, %v1439_v59 }
 0x4e9   :  { %2264 = vpow2.f32 %v2052_v61  ;;  %v1409_v12 = vpop.f32.mrf.mxu2  ;;  %v1422_v13 = vpop.f32.mrf.mxu3 }
 0x4ea   :  { %2266 = vpow2.f32 %v2053_v2  ;;  %v1433_v14 = vrot.slane %v1422_v13, 4  ;;  %v1385_v38 = vpop.f32.mrf.mxu0  ;;  %v1398_v24 = vpop.f32.mrf.mxu1  ;;  %v1432_v63 = vrot.slane %v1409_v12, 4  ;;  %v3026_v2 = vld [vmem:[#allocation20_spill] sm:$0xff] }
 0x4eb   :  { %v1671_v12 = vrot.slane %v3026_v2, 6 }
 0x4ec   :  { %v1441_v31 = vadd.f32 %v1433_v14, %v3019_v17  ;;  %v1440_v21 = vadd.f32 %v1432_v63, %v3020_v8 }
 0x4ee   :  { %v2054_v43 = vmul.f32 -1.442695, %v1441_v31 }
 0x4ef   :  { %v2265_v29 = vpop.eup %2264 }
 0x4f0   :  { %v2267_v9 = vpop.eup %2266  ;;  %v1445_v36 = vadd.f32 1.0, %v2265_v29  ;;  %2268 = vpow2.f32 %v2054_v43  ;;  %v2161_v43 = vld [vmem:[%s2975_s4 + $0x38] sm:$0xff]  ;;  %v2160_v29 = vld [vmem:[%s2975_s4 + $0x30] sm:$0xff] }
 0x4f1   :  { %v1464_v52 = vadd.f32 1.0, %v2267_v9  ;;  %v1411_v20 = vpop.f32.mrf.mxu2  ;;  %v1424_v46 = vpop.f32.mrf.mxu3  ;;  %1756 = vmatpush.bf16.msrb.mxu0 %v2161_v43 }
 0x4f2   :  { %2270 = vrcp.f32 %v1445_v36  ;;  %v1457_v19 = vand.u32 2147483648, %v1445_v36  ;;  %v1455_v0 = vand.u32 2147483647, %v1445_v36  ;;  %vm1451_vm0 = vweird.f32 %v1445_v36 }
 0x4f3   :  { %2272 = vrcp.f32 %v1464_v52  ;;  %v1476_v26 = vand.u32 2147483648, %v1464_v52  ;;  %v1474_v54 = vand.u32 2147483647, %v1464_v52  ;;  %vm1470_vm1 = vweird.f32 %v1464_v52 }
 0x4f4   :  { %v1458_v8 = vor.u32 1.1754944e-38, %v1457_v19  ;;  %vm1456_vm4 = vcmp.eq.f32.partialorder %v1455_v0, 8.507059e+37 }
 0x4f5   :  { %v1477_v56 = vor.u32 1.1754944e-38, %v1476_v26  ;;  %vm1475_vm5 = vcmp.eq.f32.partialorder %v1474_v54, 8.507059e+37  ;;  %1757 = vmatpush.bf16.msrb.mxu0 %v2160_v29 }
 0x4f6   :  { %v2269_v7 = vpop.eup %2268 }
 0x4f7   :  { %v1484_v48 = vadd.f32 1.0, %v2269_v7  ;;  %v2158_v7 = vld [vmem:[%s2975_s4 + $0x20] sm:$0xff] }
 0x4f8   :  { %v2271_v37 = vpop.eup %2270 }
 0x4f9   :  { %v2273_v23 = vpop.eup %2272  ;;  %v1447_v60 = vmul.f32 %v2271_v37, %v1445_v36  ;;  %2274 = vrcp.f32 %v1484_v48  ;;  %vm1452_vm14 = vweird.f32 %v2271_v37  ;;  %v1496_v42 = vand.u32 2147483648, %v1484_v48 }
 0x4fa   :  { %v1466_v17 = vmul.f32 %v2273_v23, %v1464_v52  ;;  %2276 = vtanh.f32 %v1440_v21  ;;  %vm1471_vm15 = vweird.f32 %v2273_v23  ;;  %vm1453_vm2 = vmor %vm1451_vm0, %vm1452_vm14  ;;  %vm1490_vm7 = vweird.f32 %v1484_v48  ;;  %v2157_v21 = vld [vmem:[%s2975_s4 + $0x18] sm:$0xff] }
 0x4fb   :  { %v1448_v32 = vsub.f32 1.0, %v1447_v60  ;;  %vm1472_vm3 = vmor %vm1470_vm1, %vm1471_vm15  ;;  %v1494_v45 = vand.u32 2147483647, %v1484_v48  ;;  %v1497_v57 = vor.u32 1.1754944e-38, %v1496_v42 }
 0x4fc   :  { %v1467_v35 = vsub.f32 1.0, %v1466_v17 }
 0x4fd   :  { %v1449_v5 = vmul.f32 %v2271_v37, %v1448_v32  ;;  %vm1495_vm9 = vcmp.eq.f32.partialorder %v1494_v45, 8.507059e+37 }
 0x4fe   :  { %v1468_v47 = vmul.f32 %v2273_v23, %v1467_v35 }
 0x4ff   :  { %v2275_v33 = vpop.eup %2274  ;;  %v1450_v41 = vadd.f32 %v2271_v37, %v1449_v5  ;;  %v2155_v5 = vld [vmem:[%s2975_s4 + $0x8] sm:$0xff] }
 0x500   :  { %v1469_v44 = vadd.f32 %v2273_v23, %v1468_v47  ;;  %v1486_v53 = vmul.f32 %v2275_v33, %v1484_v48  ;;  %v2277_v3 = vpop.eup %2276  ;;  %vm1491_vm6 = vweird.f32 %v2275_v33 }
 0x501   :  { %v1454_v62 = vsel %vm1453_vm2, %v2271_v37, %v1450_v41  ;;  %vm1492_vm8 = vmor %vm1490_vm7, %vm1491_vm6 }
 0x502   :  { %v1459_v4 = vsel %vm1456_vm4, %v1458_v8, %v1454_v62  ;;  %v1473_v10 = vsel %vm1472_vm3, %v2273_v23, %v1469_v44  ;;  %v1487_v15 = vsub.f32 1.0, %v1486_v53 }
 0x503   :  { %v1478_v18 = vsel %vm1475_vm5, %v1477_v56, %v1473_v10  ;;  %v1504_v27 = vmul.f32 %v2277_v3, %v1459_v4 }
 0x504   :  { %v1503_v28 = vmul.f32 %v1501_v49, %v1478_v18  ;;  %v1488_v34 = vmul.f32 %v2275_v33, %v1487_v15 }
 0x506   :  { %v2897_v39 = vadd.f32 %v1504_v27, %v1503_v28  ;;  %v1489_v40 = vadd.f32 %v2275_v33, %v1488_v34 }
 0x508   :  { %2278 = vtanh.f32 %v2897_v39  ;;  %v1493_v50 = vsel %vm1492_vm8, %v2275_v33, %v1489_v40 }
 0x509   :  { %v1498_v61 = vsel %vm1495_vm9, %v1497_v57, %v1493_v50  ;;  %vm1682_vm9 = vcmask 1045504  }
 0x50e   :  { %v2279_v59 = vpop.eup %2278 }
 0x50f   :  { %v2901_v13 = vmul.f32 %v2279_v59, %v1498_v61  ;;  %v1639_v61 = vrot.slane %v2897_v39, 6 }
 0x511   :  { %v1508_v14 = vpack.c.bf16 %v2901_v13, %v2901_v13  ;;  %v1673_v38 = vsel %vm330_vm12, %v2901_v13, %v1671_v12 }
 0x512   :  { %v2910_v24 = vsel %vm1680_vm10, %v2890_v30, %v1673_v38  ;;  %v2159_v30 = vld [vmem:[%s2975_s4 + $0x28] sm:$0xff] }
 0x513   :  { %v1510_v31 = vrot.slane %v1508_v14, 2  ;;  %1758 = vmatpush.bf16.msrb.mxu0 %v2159_v30 }
 0x515   :  { %1520 = vmatmul.bf16.vlgmr.msra.gmra.mxu0 %v1510_v31  ;;  %1533 = vmatmul.bf16.vlgmr.msra.gmra.mxu1 %v1510_v31 }
 0x516   :  { %1546 = vmatmul.bf16.vlgmr.msra.gmra.mxu2 %v1510_v31  ;;  %1559 = vmatmul.bf16.vlgmr.msra.gmra.mxu3 %v1510_v31 }
 0x517   :  { %1759 = vmatpush.bf16.msrb.mxu0 %v2158_v7 }
 0x51b   :  { %1760 = vmatpush.bf16.msrb.mxu0 %v2157_v21 }
 0x592   :  { %v1521_v9 = vpop.f32.mrf.mxu0  ;;  %v1534_v36 = vpop.f32.mrf.mxu1 }
 0x593   :  { %v1568_v52 = vrot.slane %v1521_v9, 2  ;;  %v1569_v20 = vrot.slane %v1534_v36, 2 }
 0x595   :  { %v1576_v46 = vadd.f32 %v1568_v52, %v3021_v55  ;;  %v1577_v63 = vadd.f32 %v1569_v20, %v3022_v58  ;;  %v2156_v58 = vld [vmem:[%s2975_s4 + $0x10] sm:$0xff] }
 0x596   :  { %1761 = vmatpush.bf16.msrb.mxu0 %v2156_v58 }
 0x597   :  { %v2055_v48 = vmul.f32 -1.442695, %v1576_v46  ;;  %v2056_v37 = vmul.f32 -1.442695, %v1577_v63 }
 0x599   :  { %2280 = vpow2.f32 %v2055_v48  ;;  %v1547_v23 = vpop.f32.mrf.mxu2  ;;  %v1560_v60 = vpop.f32.mrf.mxu3 }
 0x59a   :  { %2282 = vpow2.f32 %v2056_v37  ;;  %v1571_v17 = vrot.slane %v1560_v60, 2  ;;  %v1523_v32 = vpop.f32.mrf.mxu0  ;;  %v1536_v55 = vpop.f32.mrf.mxu1  ;;  %1762 = vmatpush.bf16.msrb.mxu0 %v2155_v5  ;;  %v1570_v8 = vrot.slane %v1547_v23, 2  ;;  %v1651_v23 = vrot.slane %v2901_v13, 2 }
 0x59b   :  { %v1655_v55 = vrot.slane %v2879_v16, 6 }
 0x59c   :  { %v1579_v35 = vadd.f32 %v1571_v17, %v3023_v22  ;;  %v2154_v22 = vld [vmem:[%s2975_s4] sm:$0xff]  ;;  %v1578_v56 = vadd.f32 %v1570_v8, %v3024_v11  ;;  %v3027_v17 = vld [vmem:[#allocation19_spill] sm:$0xff]  ;;  %v1653_v13 = vsel %vm330_vm12, %v3026_v2, %v1651_v23 }
 0x59d   :  { %v1675_v32 = vrot.slane %v3027_v17, 2  ;;  %v1657_v16 = vsel %vm330_vm12, %v2744_v51, %v1655_v55 }
 0x59e   :  { %v2057_v19 = vmul.f32 -1.442695, %v1579_v35  ;;  %1763 = vmatpush.bf16.msrb.mxu0 %v2154_v22  ;;  %v1659_v35 = vrot.slane %v2832_v25, 2 }
 0x59f   :  { %v2281_v26 = vpop.eup %2280 }
 0x5a0   :  { %v2283_v0 = vpop.eup %2282  ;;  %v1583_v47 = vadd.f32 1.0, %v2281_v26  ;;  %2284 = vpow2.f32 %v2057_v19  ;;  %v1661_v25 = vsel %vm330_vm12, %v2788_v1, %v1659_v35 }
 0x5a1   :  { %v1602_v54 = vadd.f32 1.0, %v2283_v0  ;;  %v1549_v33 = vpop.f32.mrf.mxu2  ;;  %v1562_v41 = vpop.f32.mrf.mxu3 }
 0x5a2   :  { %2286 = vrcp.f32 %v1583_v47  ;;  %v1595_v18 = vand.u32 2147483648, %v1583_v47  ;;  %v1593_v34 = vand.u32 2147483647, %v1583_v47  ;;  %vm1589_vm15 = vweird.f32 %v1583_v47  ;;  %v2167_v33 = vld [vmem:[%s2976_s5] ss:$0 sm:$0xff] }
 0x5a3   :  { %2288 = vrcp.f32 %v1602_v54  ;;  %v1614_v27 = vand.u32 2147483648, %v1602_v54  ;;  %v1612_v42 = vand.u32 2147483647, %v1602_v54  ;;  %vm1608_vm0 = vweird.f32 %v1602_v54 }
 0x5a4   :  { %v1596_v11 = vor.u32 1.1754944e-38, %v1595_v18  ;;  %vm1594_vm3 = vcmp.eq.f32.partialorder %v1593_v34, 8.507059e+37 }
 0x5a5   :  { %v1615_v12 = vor.u32 1.1754944e-38, %v1614_v27  ;;  %vm1613_vm4 = vcmp.eq.f32.partialorder %v1612_v42, 8.507059e+37 }
 0x5a6   :  { %v2285_v44 = vpop.eup %2284 }
 0x5a7   :  { %v1622_v53 = vadd.f32 1.0, %v2285_v44 }
 0x5a8   :  { %v2287_v49 = vpop.eup %2286 }
 0x5a9   :  { %v2289_v62 = vpop.eup %2288  ;;  %v1585_v3 = vmul.f32 %v2287_v49, %v1583_v47  ;;  %2290 = vrcp.f32 %v1622_v53  ;;  %vm1590_vm11 = vweird.f32 %v2287_v49  ;;  %v1634_v63 = vand.u32 2147483648, %v1622_v53 }
 0x5aa   :  { %v1604_v4 = vmul.f32 %v2289_v62, %v1602_v54  ;;  %2292 = vtanh.f32 %v1578_v56  ;;  %vm1609_vm14 = vweird.f32 %v2289_v62  ;;  %vm1591_vm1 = vmor %vm1589_vm15, %vm1590_vm11  ;;  %vm1628_vm6 = vweird.f32 %v1622_v53 }
 0x5ab   :  { %v1586_v10 = vsub.f32 1.0, %v1585_v3  ;;  %vm1610_vm2 = vmor %vm1608_vm0, %vm1609_vm14  ;;  %v1632_v39 = vand.u32 2147483647, %v1622_v53  ;;  %v1635_v48 = vor.u32 1.1754944e-38, %v1634_v63 }
 0x5ac   :  { %v1605_v15 = vsub.f32 1.0, %v1604_v4 }
 0x5ad   :  { %v1587_v28 = vmul.f32 %v2287_v49, %v1586_v10  ;;  %vm1633_vm8 = vcmp.eq.f32.partialorder %v1632_v39, 8.507059e+37 }
 0x5ae   :  { %v1606_v40 = vmul.f32 %v2289_v62, %v1605_v15 }
 0x5af   :  { %v2291_v45 = vpop.eup %2290  ;;  %v1588_v50 = vadd.f32 %v2287_v49, %v1587_v28 }
 0x5b0   :  { %v1607_v57 = vadd.f32 %v2289_v62, %v1606_v40  ;;  %v1624_v59 = vmul.f32 %v2291_v45, %v1622_v53  ;;  %v2293_v38 = vpop.eup %2292  ;;  %vm1629_vm5 = vweird.f32 %v2291_v45 }
 0x5b1   :  { %v1592_v14 = vsel %vm1591_vm1, %v2287_v49, %v1588_v50  ;;  %vm1630_vm7 = vmor %vm1628_vm6, %vm1629_vm5 }
 0x5b2   :  { %v1597_v31 = vsel %vm1594_vm3, %v1596_v11, %v1592_v14  ;;  %v1611_v43 = vsel %vm1610_vm2, %v2289_v62, %v1607_v57  ;;  %v1625_v29 = vsub.f32 1.0, %v1624_v59 }
 0x5b3   :  { %v1616_v30 = vsel %vm1613_vm4, %v1615_v12, %v1611_v43  ;;  %v1642_v9 = vmul.f32 %v2293_v38, %v1597_v31 }
 0x5b4   :  { %v1641_v36 = vmul.f32 %v1639_v61, %v1616_v30  ;;  %v1626_v52 = vmul.f32 %v2291_v45, %v1625_v29 }
 0x5b6   :  { %v1643_v20 = vadd.f32 %v1642_v9, %v1641_v36  ;;  %v1627_v46 = vadd.f32 %v2291_v45, %v1626_v52 }
 0x5b8   :  { %2294 = vtanh.f32 %v1643_v20  ;;  %v1631_v7 = vsel %vm1630_vm7, %v2291_v45, %v1627_v46 }
 0x5b9   :  { %v1636_v21 = vsel %vm1633_vm8, %v1635_v48, %v1631_v7 }
 0x5be   :  { %v2295_v37 = vpop.eup %2294 }
 0x5bf   :  { %v1645_v60 = vmul.f32 %v2295_v37, %v1636_v21 }
 0x5c1   :  { %v1647_v58 = vrot.slane %v1645_v60, 6  ;;  %v1677_v19 = vsel %vm330_vm12, %v1645_v60, %v1675_v32 }
 0x5c2   :  { %v1686_v26 = vsel %vm1682_vm9, %v2910_v24, %v1677_v19 }
 0x5c3   :  { %v1649_v5 = vsel %vm330_vm12, %v3027_v17, %v1647_v58 }
 0x5c4   :  { %v1679_v0 = vsel %vm1678_vm13, %v1649_v5, %v1653_v13 }
 0x5c5   :  { %v1681_v24 = vsel %vm1680_vm10, %v1679_v0, %v1657_v16 }
 0x5c6   :  { %v1683_v47 = vsel %vm1682_vm9, %v1681_v24, %v1661_v25 }
 0x5c7   :  { %v1704_v54 = vpack.c.bf16 %v1686_v26, %v1683_v47 }
 0x5c9   :  { %1764 = vmatmul.bf16.vlgmr.msrb.gmra.mxu0 %v1704_v54 }
 0x646   :  { %v1765_v2 = vpop.f32.mrf.mxu0 }
 0x647   :  { %v1766_v41 = vadd.f32 %v2167_v33, %v1765_v2 }
 0x649   :  { %1770 = vst [vmem:[%s2977_s6] sm:$0xff] %v1766_v41 }
 0x64e   :  { %v1767_v51 = vpop.f32.mrf.mxu0 }
 0x64f   :  { %v1768_v22 = vadd.f32 %v2167_v33, %v1767_v51 }
 0x651   :  { %1771 = vst [vmem:[%s2977_s6 + $0x8] sm:$0xff] %v1768_v22 }
 0x652   :  { %1776 = vsyncpa [#allocation3], 1 }
 0x653   :  { %1777 = vsyncpa [#allocation5], 1 }

// kernel: model_forward.2
= control target key start
LH: loop header
LB: loop body
LE: loop exit
PB: predicated region body
PF: predicated region fallthrough
CT: control target
= control target key end

     0   :  { %s3526_s0 = inlined_call_operand.vmem [shape: f32[16,128], index: 0, kind: input, shape index: {}]   ;;  %s3527_s1 = inlined_call_operand.vmem [shape: f32[16,16], index: 1, kind: input, shape index: {}]   ;;  %s3528_s2 = inlined_call_operand.vmem [shape: f32[1,128], index: 2, kind: input, shape index: {}]   ;;  %s3529_s3 = inlined_call_operand.vmem [shape: f32[1,128], index: 3, kind: input, shape index: {}]   ;;  %s3530_s4 = inlined_call_operand.hbm [shape: bf16[2,128,768], index: 4, kind: input, shape index: {}]   ;;  %s3531_s5 = inlined_call_operand.vmem [shape: f32[2,1,768], index: 5, kind: input, shape index: {}]   ;;  %s3532_s6 = inlined_call_operand.hbm [shape: bf16[2,256,128], index: 6, kind: input, shape index: {}]   ;;  %s3533_s7 = inlined_call_operand.vmem [shape: f32[2,1,128], index: 7, kind: input, shape index: {}]   ;;  %s3534_s8 = inlined_call_operand.vmem [shape: f32[2,1,128], index: 8, kind: input, shape index: {}]   ;;  %s3535_s9 = inlined_call_operand.vmem [shape: f32[2,1,128], index: 9, kind: input, shape index: {}]   ;;  %s3536_s10 = inlined_call_operand.hbm [shape: bf16[2,128,256], index: 10, kind: input, shape index: {}]   ;;  %s3537_s11 = inlined_call_operand.vmem [shape: f32[2,1,256], index: 11, kind: input, shape index: {}]   ;;  %s3538_s12 = inlined_call_operand.hbm [shape: bf16[2,256,128], index: 12, kind: input, shape index: {}]   ;;  %s3539_s13 = inlined_call_operand.vmem [shape: f32[2,1,128], index: 13, kind: input, shape index: {}]   ;;  %s3540_s14 = inlined_call_operand.vmem [shape: f32[2,1,128], index: 14, kind: input, shape index: {}]   ;;  %s3541_s15 = inlined_call_operand.vmem [shape: f32[2,1,128], index: 15, kind: input, shape index: {}]   ;;  %s3542_s16 = inlined_call_operand.vmem [shape: f32[16,128], index: 16, kind: output, shape index: {}]  }
   0x1   :  { %3552 = sst [smem:[#allocation15_spill]] %s3526_s0 }
   0x2   :  { %3553 = sst [smem:[#allocation16_spill]] %s3527_s1 }
   0x3   :  { %3554 = sst [smem:[#allocation17_spill]] %s3528_s2 }
   0x4   :  { %3555 = sst [smem:[#allocation18_spill]] %s3529_s3 }
   0x5   :  { %3556 = sst [smem:[#allocation19_spill]] %s3530_s4 }
   0x6   :  { %3557 = sst [smem:[#allocation20_spill]] %s3532_s6 }
   0x7   :  { %3558 = sst [smem:[#allocation21_spill]] %s3536_s10 }
   0x8   :  { %3559 = sst [smem:[#allocation22_spill]] %s3537_s11 }
   0x9   :  { %3560 = sst [smem:[#allocation23_spill]] %s3538_s12 }
   0xa   :  { %3561 = sst [smem:[#allocation24_spill]] %s3539_s13 }
   0xb   :  { %3562 = sst [smem:[#allocation25_spill]] %s3540_s14 }
   0xc   :  { %3563 = sst [smem:[#allocation26_spill]] %s3541_s15 }
   0xd   :  { %3564 = sst [smem:[#allocation27_spill]] %s3542_s16 }
   0xe   :  { %21 = vsyncpa [#allocation3], 0 }
   0xf   :  { %23 = vsyncpa [#allocation3 + $0x1], 0 }
  0x10   :  { %24 = vsyncpa [#allocation5], 0 }
  0x11   :  { %26 = vsyncpa [#allocation5 + $0x1], 0 }
  0x12   :  { %27 = vsyncpa [#allocation8], 0 }
  0x13   :  { %29 = vsyncpa [#allocation8 + $0x1], 0  ;;  %s3020_s21 = smov 0   ;;  %s3022_s22 = smov 0  }
  0x14   :  { %s3024_s23 = smov 0   ;;  %s3026_s24 = smov 0  }
  0x15 LB: > { %3565 = sst [smem:[#allocation12_spill]] %s2921_s23  ;;  %s3039_s25 = sadd.s32 4294967295, %s2925_s24   ;;  %s2925_s24 = sphi %s3026_s24, %s3593_s24   ;;  %s2921_s23 = sphi %s3024_s23, %s3595_s23   ;;  %s2917_s22 = sphi %s3022_s22, %s3597_s22   ;;  %s2913_s21 = sphi %s3020_s21, %s3596_s21  }
  0x16   : > { %s3042_s26 = sadd.s32 1, %s2925_s24   ;;  %s126_s28 = sadd.s32 1, %s2921_s23 }
  0x17   : > { %3566 = sst [smem:[#allocation13_spill]] %s3042_s26  ;;  %s123_s27 = ssub.s32 %s2925_s24, %s3042_s26 }
  0x18   : > { %p124_p0 = scmp.eq.s32.totalorder %s123_s27, 0  ;;  %p133_p1 = scmp.ne.s32.totalorder %s2921_s23, %s2917_s22 }
  0x19   : > { %p134_p2 = scmp.eq.s32.totalorder %s2925_s24, 0  ;;  %p139_p3 = scmp.ne.s32.totalorder %s2917_s22, %s2913_s21 }
  0x1a   : > { %s3052_s29 = scalar_select %p124_p0, %s2921_s23, %s126_s28  }
  0x1b   : > { %p135_p4 = por %p134_p2, %p133_p1  ;;  %p140_p5 = scmp.eq.s32.totalorder %s3039_s25, 0 }
  0x1c   : > { %3567 = sst [smem:[#allocation14_spill]] %s3052_s29  ;;  %p2674_p6 = scmp.lt.s32.totalorder %s2925_s24, 2 }
  0x1d   : > { %p3056_p7 = por %p140_p5, %p139_p3  ;;  %s3061_s0 = sand.u32 1, %s2921_s23  }
  0x1e   : > { %p3063_p8 = pnand %p2674_p6, %p135_p4  ;;  %s511_s18 = sand.u32 1, %s2925_s24  }
  0x1f   : > { %s3069_s19 = sshll.u32 %s3061_s0, 7  ;;  %s3072_s20 = sshll.u32 %s2925_s24, 7 }
  0x20   : > { %s515_s21 = scalar_lea.vmem [#allocation4], %s3069_s19  ;;  %s3570_s6 = sld [smem:[#allocation20_spill]] }
  0x21   : > { %s523_s27 = sshll.u32 %s515_s21, 4  ;;  %s3079_s1 = scalar_lea.sflag [#allocation5], %s511_s18  ;;  %s524_s27 = int_to_ptr.vmem [resolvable:$true] %s523_s27 }
  0x22   : > { %p2767_p10 = pneg %p3063_p8 }
  0x26   : > { %s520_s23 = scalar_lea.hbm %s3570_s6, %s3072_s20  ;;  %s2770_s29 = scalar_lea.hbm %s3570_s6, 256 }
  0x27   : > { %s521_s26 = sshll.u32 %s520_s23, 4  ;;  %s522_s26 = int_to_ptr.hbm [resolvable:$true] %s521_s26 }
  0x28   : > { %s2763_s16 = sshra.s32 %s522_s26, 4  ;;  %s2764_s16 = int_to_ptr.hbm [resolvable:$true] %s2763_s16 }
  0x29   : > { %s2765_s3 = scalar_lea.hbm %s2764_s16, 128  ;;  %p2771_p13 = scmp.lt.s32.totalorder %s2764_s16, %s3570_s6 }
  0x2a   : > { %p2766_p9 = scmp.ne.s32.totalorder %s2764_s16, %s2765_s3  ;;  %p2772_p0 = scmp.lt.s32.totalorder %s2770_s29, %s2765_s3 }
  0x2c   : > { %p2768_p11 = pnand %p2767_p10, %p2766_p9  ;;  %p2773_p1 = por %p2772_p0, %p2771_p13 }
  0x2e   : > { %p2769_p12 = pneg %p2768_p11 }
  0x30   : > { %p2774_p2 = pnand %p2773_p1, %p2769_p12 }
  0x32   : > { %2777 = shalt.err (!%p2774_p2)
}
  0x33   : > { %s3550_s23 = smov 64   ;;  %s3551_s18 = smov 4  }
  0x34   : > { %2667 = dma.hbm_to_vmem [thread:$0]  (!%p3063_p8), %s522_s26, 2048, %s524_s27, %s3079_s1, %s3550_s23, %s3550_s23, %s3551_s18  }
  0x35   : > { %p2156_p3 = scmp.ge.s32.totalorder %s2925_s24, 1  ;;  %p618_p4 = scmp.lt.s32.totalorder %s2925_s24, 3 }
  0x36   : > { %s2649_s2 = smul.u32 384, %s3061_s0  ;;  %s3572_s4 = sld [smem:[#allocation19_spill]] }
  0x37   : > { %p3101_p5 = pnand %p2156_p3, %p618_p4  ;;  %s2650_s15 = smul.u32 384, %s2925_s24 }
  0x38   : > { %s486_s28 = scalar_lea.vmem [#allocation2], %s2649_s2  ;;  %s483_s13 = scalar_lea.sflag [#allocation3], %s3061_s0 }
  0x39   : > { %s494_s6 = sshll.u32 %s486_s28, 4  ;;  %s495_s6 = int_to_ptr.vmem [resolvable:$true] %s494_s6 }
  0x3c   : > { %s491_s29 = scalar_lea.hbm %s3572_s4, %s2650_s15  ;;  %s2800_s18 = scalar_lea.hbm %s3572_s4, 768 }
  0x3d   : > { %s492_s14 = sshll.u32 %s491_s29, 4  ;;  %s493_s14 = int_to_ptr.hbm [resolvable:$true] %s492_s14 }
  0x3e   : > { %s2793_s26 = sshra.s32 %s493_s14, 4  ;;  %s2794_s26 = int_to_ptr.hbm [resolvable:$true] %s2793_s26 }
  0x3f   : > { %s2795_s27 = scalar_lea.hbm %s2794_s26, 384  ;;  %p2801_p12 = scmp.lt.s32.totalorder %s2794_s26, %s3572_s4 }
  0x40   : > { %p2796_p6 = scmp.ne.s32.totalorder %s2794_s26, %s2795_s27  ;;  %p2802_p13 = scmp.lt.s32.totalorder %s2800_s18, %s2795_s27 }
  0x42   : > { %p2798_p9 = pnand %p2796_p6, %p2767_p10  ;;  %p2803_p0 = por %p2802_p13, %p2801_p12 }
  0x44   : > { %p2799_p11 = pneg %p2798_p9 }
  0x46   : > { %p2804_p1 = pnand %p2803_p0, %p2799_p11 }
  0x48   : > { %2807 = shalt.err (!%p2804_p1)
}
  0x49   : > { %s2929_s2 = smov 384   ;;  %s2930_s21 = smov 24  }
  0x4a   : > { %2664 = dma.hbm_to_vmem [thread:$0]  (!%p3063_p8), %s493_s14, 6144, %s495_s6, %s483_s13, %s2929_s2, %s2929_s2, %s2930_s21  }
  0x4b   : > { %s3573_s10 = sld [smem:[#allocation21_spill]]  ;;  %s555_s11 = scalar_lea.vmem [#allocation6], %s3069_s19 }
  0x4c   : > { %s563_s16 = sshll.u32 %s555_s11, 4  ;;  %s564_s16 = int_to_ptr.vmem [resolvable:$true] %s563_s16 }
  0x51   : > { %s560_s23 = scalar_lea.hbm %s3573_s10, %s3072_s20  ;;  %s2830_s6 = scalar_lea.hbm %s3573_s10, 256 }
  0x52   : > { %s561_s24 = sshll.u32 %s560_s23, 4  ;;  %s562_s24 = int_to_ptr.hbm [resolvable:$true] %s561_s24 }
  0x53   : > { %s2823_s18 = sshra.s32 %s562_s24, 4  ;;  %s2824_s18 = int_to_ptr.hbm [resolvable:$true] %s2823_s18 }
  0x54   : > { %s2825_s26 = scalar_lea.hbm %s2824_s18, 128  ;;  %p2831_p6 = scmp.lt.s32.totalorder %s2824_s18, %s3573_s10 }
  0x55   : > { %p2826_p2 = scmp.ne.s32.totalorder %s2824_s18, %s2825_s26  ;;  %p2832_p9 = scmp.lt.s32.totalorder %s2830_s6, %s2825_s26 }
  0x57   : > { %p2828_p3 = pnand %p2826_p2, %p2767_p10  ;;  %p2833_p11 = por %p2832_p9, %p2831_p6 }
  0x59   : > { %p2829_p4 = pneg %p2828_p3 }
  0x5b   : > { %p2834_p12 = pnand %p2833_p11, %p2829_p4 }
  0x5d   : > { %2837 = shalt.err (!%p2834_p12)
}
  0x5e   : > { %s2931_s11 = smov 128   ;;  %s2932_s2 = smov 8  }
  0x5f   : > { %2670 = dma.hbm_to_vmem [thread:$0]  (!%p3063_p8), %s562_s24, 2048, %s564_s16, %s3079_s1, %s2931_s11, %s2931_s11, %s2932_s2  }
  0x60   : > { %s3574_s12 = sld [smem:[#allocation23_spill]]  ;;  %s584_s23 = scalar_lea.vmem [#allocation7], %s3069_s19 }
  0x61   : > { %s592_s18 = sshll.u32 %s584_s23, 4  ;;  %s581_s27 = scalar_lea.sflag [#allocation8], %s3061_s0  ;;  %s593_s18 = int_to_ptr.vmem [resolvable:$true] %s592_s18 }
  0x66   : > { %s589_s28 = scalar_lea.hbm %s3574_s12, %s3072_s20  ;;  %s2860_s24 = scalar_lea.hbm %s3574_s12, 256 }
  0x67   : > { %s590_s26 = sshll.u32 %s589_s28, 4  ;;  %s591_s26 = int_to_ptr.hbm [resolvable:$true] %s590_s26 }
  0x68   : > { %s2853_s15 = sshra.s32 %s591_s26, 4  ;;  %s2854_s15 = int_to_ptr.hbm [resolvable:$true] %s2853_s15 }
  0x69   : > { %s2855_s6 = scalar_lea.hbm %s2854_s15, 128  ;;  %p2861_p2 = scmp.lt.s32.totalorder %s2854_s15, %s3574_s12 }
  0x6a   : > { %p2856_p13 = scmp.ne.s32.totalorder %s2854_s15, %s2855_s6  ;;  %p2862_p3 = scmp.lt.s32.totalorder %s2860_s24, %s2855_s6 }
  0x6c   : > { %p2858_p0 = pnand %p2856_p13, %p2767_p10  ;;  %p2863_p4 = por %p2862_p3, %p2861_p2 }
  0x6e   : > { %p2859_p1 = pneg %p2858_p0 }
  0x70   : > { %p2864_p6 = pnand %p2863_p4, %p2859_p1 }
  0x72   : > { %2867 = shalt.err (!%p2864_p6)
}
  0x73   : > { %s3575_s0 = smov 4   ;;  %s3576_s19 = smov 64  }
  0x74   : > { %2673 = dma.hbm_to_vmem [thread:$0]  (!%p3063_p8), %s591_s26, 2048, %s593_s18, %s581_s27, %s3576_s19, %s3576_s19, %s3575_s0  }
  0x75   : > { %622 = sbr.rel (%p3101_p5) target bundleno = 2018 (0x7e2), region = 84  ;;  %s624_s14 = sand.u32 (!%p3101_p5), 1, %s2917_s22  }
  0x76   : > { %s2651_s11 = smul.u32 (!%p3101_p5), 384, %s624_s14  ;;  %s625_s2 = scalar_lea.sflag (!%p3101_p5), [#allocation3], %s624_s14 }
  0x78   : > { %s3161_s21 = scalar_lea.vmem (!%p3101_p5), [#allocation2], %s2651_s11 }
  0x7a   : > { %2900 = dma.done.wait (%p3056_p7), %s625_s2, 6144  }
  0x7b   : > { %2902 = vsyncadd (%p3056_p7), %s625_s2, 4294961152  ;;  %s634_s17 = sand.u32 1, %s3039_s25   ;;  %s2157_s29 = sshll.u32 %s624_s14, 7 }
  0x7c   : > { %s635_s28 = scalar_lea.sflag [#allocation5], %s634_s17  ;;  %s3168_s23 = scalar_lea.vmem [#allocation4], %s2157_s29 }
  0x7d   : > { %2904 = dma.done.wait (%p3056_p7), %s635_s28, 4096  }
  0x7e   : > { %2906 = vsyncadd (%p3056_p7), %s635_s28, 4294963200  ;;  %s3174_s3 = scalar_lea.vmem [#allocation6], %s2157_s29  ;;  %s655_s18 = scalar_lea.sflag [#allocation8], %s624_s14 }
  0x7f   : > { %s3176_s26 = scalar_lea.vmem [#allocation7], %s2157_s29 }
  0x80   : > { %2908 = dma.done.wait (%p3056_p7), %s655_s18, 2048  }
  0x81   : > { %2910 = vsyncadd (%p3056_p7), %s655_s18, 4294965248  ;;  %p744_p8 = scmp.lt.s32.totalorder %s3039_s25, 1  ;;  %s3577_s18 = sld [smem:[#allocation22_spill]] }
  0x82   : > { %s3578_s1 = sld [smem:[#allocation24_spill]]  ;;  %p2161_p7 = scmp.ne.s32.totalorder %s3039_s25, 0 }
  0x83   : > { %s3184_s27 = scalar_select %p744_p8, %s3039_s25, 1 }
  0x84   : > { %s3579_s10 = sld [smem:[#allocation25_spill]] }
  0x85   : > { %s2652_s15 = smul.u32 6, %s3184_s27  ;;  %s2160_s17 = sshll.u32 %s3184_s27, 1 }
  0x86   : > { %s3580_s12 = sld [smem:[#allocation26_spill]] }
  0x87   : > { %s3202_s2 = scalar_lea.vmem %s3531_s5, %s2652_s15  ;;  %s3208_s4 = scalar_lea.vmem %s3577_s18, %s2160_s17 }
  0x88   : > { %s763_s30 = scalar_lea.vmem %s3578_s1, %s3184_s27  ;;  %774 = sbr.rel (%p2161_p7) target bundleno = 419 (0x1a3), region = 104 }
  0x89   : > { %s3581_s29 = sld [smem:[#allocation15_spill]] (!%p2161_p7) }
  0x8a   : > { %s766_s20 = scalar_lea.vmem %s3579_s10, %s3184_s27  ;;  %s3582_s25 = sld [smem:[#allocation17_spill]] (!%p2161_p7) }
  0x8b   : > { %s3583_s19 = sld [smem:[#allocation18_spill]] (!%p2161_p7) }
  0x8c   : > { %s769_s14 = scalar_lea.vmem %s3580_s12, %s3184_s27  ;;  %s3584_s13 = sld [smem:[#allocation27_spill]] (!%p2161_p7) }
  0x8d   : > { %v2933_v2 = vmov 128.0  }
  0x8e   : > { %2717 = vrcp.f32 %v2933_v2 }
  0x8f   : > { %v775_v0 = vld [vmem:[%s3581_s29] sm:$0xff]  ;;  %v776_v1 = vld [vmem:[%s3581_s29 + $0x8] sm:$0xff] }
  0x90   : > { %779 = vadd.xlane.f32.xlu0 %v775_v0  ;;  %v2715_v31 = vld [vmem:[%s3582_s25] ss:$0 sm:$0xff] }
  0x91   : > { %v2716_v34 = vld [vmem:[%s3583_s19] ss:$0 sm:$0xff] }
  0x94   : > { %v2718_v3 = vpop.eup %2717 }
  0x95   : > { %v784_v4 = vmul.f32 128.0, %v2718_v3  ;;  %vm788_vm0 = vweird.f32 %v2718_v3 }
  0x97   : > { %v785_v5 = vsub.f32 1.0, %v784_v4 }
  0x98   : > { %781 = vadd.xlane.f32.xlu0 %v776_v1 }
  0x99   : > { %v786_v6 = vmul.f32 %v2718_v3, %v785_v5 }
  0x9b   : > { %v787_v7 = vadd.f32 %v2718_v3, %v786_v6 }
  0x9d   : > { %v789_v8 = vsel %vm788_vm0, %v2718_v3, %v787_v7 }
 0x103   : > { %v780_v9 = vpop.xlane.xlu0 %779 }
 0x104   : > { %v790_v10 = vmul.f32 %v789_v8, %v780_v9 }
 0x106   : > { %v792_v11 = vsub.f32 %v775_v0, %v790_v10 }
 0x108   : > { %v794_v12 = vmul.f32 %v792_v11, %v792_v11 }
 0x10a   : > { %796 = vadd.xlane.f32.xlu1 %v794_v12 }
 0x10b   : > { %v782_v13 = vpop.xlane.xlu0 %781 }
 0x10c   : > { %v791_v14 = vmul.f32 %v789_v8, %v782_v13 }
 0x10e   : > { %v793_v15 = vsub.f32 %v776_v1, %v791_v14 }
 0x110   : > { %v795_v16 = vmul.f32 %v793_v15, %v793_v15 }
 0x112   : > { %798 = vadd.xlane.f32.xlu1 %v795_v16 }
 0x17d   : > { %v797_v17 = vpop.xlane.xlu1 %796 }
 0x17e   : > { %v800_v18 = vmul.f32 %v797_v17, %v789_v8 }
 0x180   : > { %v802_v19 = vadd.f32 1e-12, %v800_v18 }
 0x182   : > { %2719 = vrsqrt.f32 %v802_v19  ;;  %vm810_vm2 = vweird.f32 %v802_v19 }
 0x185   : > { %v799_v20 = vpop.xlane.xlu1 %798 }
 0x186   : > { %v801_v21 = vmul.f32 %v799_v20, %v789_v8 }
 0x188   : > { %v2720_v22 = vpop.eup %2719  ;;  %v803_v23 = vadd.f32 1e-12, %v801_v21 }
 0x189   : > { %v805_v24 = vmul.f32 %v2720_v22, %v802_v19  ;;  %vm811_vm1 = vweird.f32 %v2720_v22 }
 0x18a   : > { %2721 = vrsqrt.f32 %v803_v23  ;;  %vm812_vm3 = vmor %vm810_vm2, %vm811_vm1  ;;  %vm820_vm5 = vweird.f32 %v803_v23 }
 0x18b   : > { %v806_v25 = vmul.f32 %v2720_v22, %v805_v24 }
 0x18d   : > { %v807_v26 = vmul.f32 0.5, %v806_v25 }
 0x18f   : > { %v808_v27 = vsub.f32 1.5, %v807_v26 }
 0x190   : > { %v2722_v28 = vpop.eup %2721 }
 0x191   : > { %v809_v29 = vmul.f32 %v2720_v22, %v808_v27  ;;  %v815_v30 = vmul.f32 %v2722_v28, %v803_v23  ;;  %vm821_vm4 = vweird.f32 %v2722_v28 }
 0x192   : > { %vm822_vm6 = vmor %vm820_vm5, %vm821_vm4 }
 0x193   : > { %v813_v32 = vsel %vm812_vm3, %v2720_v22, %v809_v29  ;;  %v816_v33 = vmul.f32 %v2722_v28, %v815_v30 }
 0x194   : > { %v824_v35 = vmul.f32 %v813_v32, %v792_v11 }
 0x195   : > { %v817_v36 = vmul.f32 0.5, %v816_v33 }
 0x196   : > { %v829_v37 = vmul.f32 %v2715_v31, %v824_v35 }
 0x197   : > { %v818_v38 = vsub.f32 1.5, %v817_v36 }
 0x198   : > { %v834_v39 = vadd.f32 %v2716_v34, %v829_v37 }
 0x199   : > { %v819_v40 = vmul.f32 %v2722_v28, %v818_v38 }
 0x19a   : > { %836 = vst [vmem:[%s3584_s13] sm:$0xff] %v834_v39 }
 0x19b   : > { %v823_v41 = vsel %vm822_vm6, %v2722_v28, %v819_v40 }
 0x19c   : > { %v825_v42 = vmul.f32 %v823_v41, %v793_v15 }
 0x19e   : > { %v830_v43 = vmul.f32 %v2715_v31, %v825_v42 }
 0x1a0   : > { %v835_v44 = vadd.f32 %v2716_v34, %v830_v43 }
 0x1a2   : > { %837 = vst [vmem:[%s3584_s13 + $0x8] sm:$0xff] %v835_v44 }
 0x1a3 PF: > { %v2340_v45 = vld [vmem:[%s3161_s21 + $0x158] sm:$0xf]  ;;  %v2599_v46 = vld [vmem:[%s3161_s21 + $0x16c] sm:$0xf0]  ;;  %v2316_v47 = vld [vmem:[%s3161_s21 + $0x128] sm:$0xf]  ;;  %s3587_s19 = scalar_lea.vmem %s3533_s7, %s3184_s27  ;;  %s3588_s6 = scalar_lea.vmem %s3534_s8, %s3184_s27 }
 0x1a4   : > { %v2341_v48 = vor.u32 %v2599_v46, %v2340_v45  ;;  %v2593_v49 = vld [vmem:[%s3161_s21 + $0x13c] sm:$0xf0]  ;;  %v2596_v50 = vld [vmem:[%s3161_s21 + $0x15c] sm:$0xf]  ;;  %v2342_v51 = vld [vmem:[%s3161_s21 + $0x170] sm:$0xf0]  ;;  %s3589_s0 = scalar_lea.vmem %s3535_s9, %s3184_s27 }
 0x1a5   : > { %v2317_v52 = vor.u32 %v2593_v49, %v2316_v47  ;;  %v2292_v53 = vld [vmem:[%s3161_s21 + $0xf8] sm:$0xf]  ;;  %v2345_v54 = vor.u32 %v2596_v50, %v2342_v51  ;;  %v2590_v55 = vld [vmem:[%s3161_s21 + $0x12c] sm:$0xf]  ;;  %v2318_v56 = vld [vmem:[%s3161_s21 + $0x140] sm:$0xf0] }
 0x1a6   : > { %1173 = vmatpush.bf16.msra.mxu2 %v2341_v48  ;;  %v2587_v57 = vld [vmem:[%s3161_s21 + $0x10c] sm:$0xf0]  ;;  %v2598_v59 = vld [vmem:[%s3161_s21 + $0x164] sm:$0xf0]  ;;  %v2321_v60 = vor.u32 %v2590_v55, %v2318_v56  ;;  %v2584_v62 = vld [vmem:[%s3161_s21 + $0xfc] sm:$0xf] }
 0x1a7   : > { %v2332_v58 = vld [vmem:[%s3161_s21 + $0x150] sm:$0xf]  ;;  %1187 = vmatpush.bf16.msra.mxu3 %v2345_v54  ;;  %v2294_v63 = vld [vmem:[%s3161_s21 + $0x110] sm:$0xf0]  ;;  %v2308_v0 = vld [vmem:[%s3161_s21 + $0x120] sm:$0xf]  ;;  %v2293_v2 = vor.u32 %v2587_v57, %v2292_v53 }
 0x1a8   : > { %v2333_v61 = vor.u32 %v2598_v59, %v2332_v58  ;;  %v2592_v1 = vld [vmem:[%s3161_s21 + $0x134] sm:$0xf0]  ;;  %v2268_v3 = vld [vmem:[%s3161_s21 + $0xc8] sm:$0xf]  ;;  %v2581_v5 = vld [vmem:[%s3161_s21 + $0xdc] sm:$0xf0]  ;;  %v2297_v8 = vor.u32 %v2584_v62, %v2294_v63 }
 0x1a9   : > { %v2309_v4 = vor.u32 %v2592_v1, %v2308_v0  ;;  %v2284_v6 = vld [vmem:[%s3161_s21 + $0xf0] sm:$0xf]  ;;  %v2586_v7 = vld [vmem:[%s3161_s21 + $0x104] sm:$0xf0]  ;;  %v2578_v9 = vld [vmem:[%s3161_s21 + $0xcc] sm:$0xf]  ;;  %v2269_v11 = vor.u32 %v2581_v5, %v2268_v3 }
 0x1aa   : > { %1174 = vmatpush.bf16.msra.mxu2 %v2317_v52  ;;  %1145 = vmatpush.bf16.msra.mxu0 %v2333_v61  ;;  %v2270_v10 = vld [vmem:[%s3161_s21 + $0xe0] sm:$0xf0]  ;;  %v2244_v12 = vld [vmem:[%s3161_s21 + $0x98] sm:$0xf]  ;;  %v2575_v13 = vld [vmem:[%s3161_s21 + $0xac] sm:$0xf0]  ;;  %v2285_v14 = vor.u32 %v2586_v7, %v2284_v6 }
 0x1ab   : > { %1188 = vmatpush.bf16.msra.mxu3 %v2321_v60  ;;  %v2260_v15 = vld [vmem:[%s3161_s21 + $0xc0] sm:$0xf]  ;;  %v2580_v16 = vld [vmem:[%s3161_s21 + $0xd4] sm:$0xf0]  ;;  %v2595_v17 = vld [vmem:[%s3161_s21 + $0x154] sm:$0xf]  ;;  %v2273_v18 = vor.u32 %v2578_v9, %v2270_v10  ;;  %v2245_v23 = vor.u32 %v2575_v13, %v2244_v12 }
 0x1ac   : > { %v2334_v19 = vld [vmem:[%s3161_s21 + $0x168] sm:$0xf0]  ;;  %v2572_v20 = vld [vmem:[%s3161_s21 + $0x9c] sm:$0xf]  ;;  %v2246_v21 = vld [vmem:[%s3161_s21 + $0xb0] sm:$0xf0]  ;;  %v2261_v25 = vor.u32 %v2580_v16, %v2260_v15 }
 0x1ad   : > { %v2337_v22 = vor.u32 %v2595_v17, %v2334_v19  ;;  %v2220_v24 = vld [vmem:[%s3161_s21 + $0x68] sm:$0xf]  ;;  %v2589_v26 = vld [vmem:[%s3161_s21 + $0x124] sm:$0xf]  ;;  %v2310_v27 = vld [vmem:[%s3161_s21 + $0x138] sm:$0xf0]  ;;  %v2249_v32 = vor.u32 %v2572_v20, %v2246_v21 }
 0x1ae   : > { %1175 = vmatpush.bf16.msra.mxu2 %v2293_v2  ;;  %1146 = vmatpush.bf16.msra.mxu0 %v2309_v4  ;;  %v2569_v28 = vld [vmem:[%s3161_s21 + $0x7c] sm:$0xf0]  ;;  %v2236_v29 = vld [vmem:[%s3161_s21 + $0x90] sm:$0xf]  ;;  %v2574_v30 = vld [vmem:[%s3161_s21 + $0xa4] sm:$0xf0]  ;;  %v2313_v31 = vor.u32 %v2589_v26, %v2310_v27 }
 0x1af   : > { %1189 = vmatpush.bf16.msra.mxu3 %v2297_v8  ;;  %1159 = vmatpush.bf16.msra.mxu1 %v2337_v22  ;;  %v2583_v33 = vld [vmem:[%s3161_s21 + $0xf4] sm:$0xf]  ;;  %v2286_v34 = vld [vmem:[%s3161_s21 + $0x108] sm:$0xf0]  ;;  %v2222_v36 = vld [vmem:[%s3161_s21 + $0x80] sm:$0xf0]  ;;  %v2221_v37 = vor.u32 %v2569_v28, %v2220_v24  ;;  %v2237_v39 = vor.u32 %v2574_v30, %v2236_v29 }
 0x1b0   : > { %v2566_v35 = vld [vmem:[%s3161_s21 + $0x6c] sm:$0xf]  ;;  %v2196_v38 = vld [vmem:[%s3161_s21 + $0x38] sm:$0xf]  ;;  %v2563_v40 = vld [vmem:[%s3161_s21 + $0x4c] sm:$0xf0]  ;;  %v2289_v43 = vor.u32 %v2583_v33, %v2286_v34 }
 0x1b1   : > { %v2212_v41 = vld [vmem:[%s3161_s21 + $0x60] sm:$0xf]  ;;  %v2568_v42 = vld [vmem:[%s3161_s21 + $0x74] sm:$0xf0]  ;;  %v2225_v44 = vor.u32 %v2566_v35, %v2222_v36  ;;  %v2560_v45 = vld [vmem:[%s3161_s21 + $0x3c] sm:$0xf]  ;;  %v2197_v51 = vor.u32 %v2563_v40, %v2196_v38 }
 0x1b2   : > { %1176 = vmatpush.bf16.msra.mxu2 %v2269_v11  ;;  %1147 = vmatpush.bf16.msra.mxu0 %v2285_v14  ;;  %v2577_v46 = vld [vmem:[%s3161_s21 + $0xc4] sm:$0xf]  ;;  %v2262_v47 = vld [vmem:[%s3161_s21 + $0xd8] sm:$0xf0]  ;;  %v2172_v48 = vld [vmem:[%s3161_s21 + $0x8] sm:$0xf]  ;;  %v2213_v52 = vor.u32 %v2568_v42, %v2212_v41 }
 0x1b3   : > { %1190 = vmatpush.bf16.msra.mxu3 %v2273_v18  ;;  %1160 = vmatpush.bf16.msra.mxu1 %v2313_v31  ;;  %v2557_v49 = vld [vmem:[%s3161_s21 + $0x1c] sm:$0xf0]  ;;  %v2198_v50 = vld [vmem:[%s3161_s21 + $0x50] sm:$0xf0]  ;;  %v2188_v53 = vld [vmem:[%s3161_s21 + $0x30] sm:$0xf]  ;;  %v2265_v55 = vor.u32 %v2577_v46, %v2262_v47 }
 0x1b4   : > { %v2562_v54 = vld [vmem:[%s3161_s21 + $0x44] sm:$0xf0]  ;;  %v2201_v56 = vor.u32 %v2560_v45, %v2198_v50  ;;  %v2571_v57 = vld [vmem:[%s3161_s21 + $0x94] sm:$0xf]  ;;  %v2238_v58 = vld [vmem:[%s3161_s21 + $0xa8] sm:$0xf0]  ;;  %v2173_v61 = vor.u32 %v2557_v49, %v2172_v48 }
 0x1b5   : > { %v2554_v59 = vld [vmem:[%s3161_s21 + $0xc] sm:$0xf]  ;;  %v2174_v60 = vld [vmem:[%s3161_s21 + $0x20] sm:$0xf0]  ;;  %s3585_s17 = sld [smem:[#allocation27_spill]]  ;;  %v2189_v0 = vor.u32 %v2562_v54, %v2188_v53  ;;  %v2241_v3 = vor.u32 %v2571_v57, %v2238_v58  ;;  %vm1250_vm7 = vcmask 130048  }
 0x1b6   : > { %1177 = vmatpush.bf16.msra.mxu2 %v2245_v23  ;;  %1148 = vmatpush.bf16.msra.mxu0 %v2261_v25  ;;  %v2164_v1 = vld [vmem:[%s3161_s21] sm:$0xf]  ;;  %v2556_v2 = vld [vmem:[%s3161_s21 + $0x14] sm:$0xf0]  ;;  %v2177_v4 = vor.u32 %v2554_v59, %v2174_v60  ;;  %v2565_v5 = vld [vmem:[%s3161_s21 + $0x64] sm:$0xf] }
 0x1b7   : > { %1191 = vmatpush.bf16.msra.mxu3 %v2249_v32  ;;  %1161 = vmatpush.bf16.msra.mxu1 %v2289_v43  ;;  %v2214_v6 = vld [vmem:[%s3161_s21 + $0x78] sm:$0xf0]  ;;  %v2165_v8 = vor.u32 %v2556_v2, %v2164_v1  ;;  %v2559_v10 = vld [vmem:[%s3161_s21 + $0x34] sm:$0xf]  ;;  %v2190_v11 = vld [vmem:[%s3161_s21 + $0x48] sm:$0xf0] }
 0x1b8   : > { %v2217_v9 = vor.u32 %v2565_v5, %v2214_v6  ;;  %v2193_v12 = vor.u32 %v2559_v10, %v2190_v11  ;;  %v2553_v13 = vld [vmem:[%s3161_s21 + $0x4] sm:$0xf]  ;;  %v2166_v14 = vld [vmem:[%s3161_s21 + $0x18] sm:$0xf0]  ;;  %v2348_v20 = vld [vmem:[%s3161_s21 + $0x160] sm:$0xf] }
 0x1b9   : > { %v2169_v15 = vor.u32 %v2553_v13, %v2166_v14  ;;  %v3324_v18 = vld [vmem:[%s3202_s2] sm:$0x3f]  ;;  %v2600_v21 = vld [vmem:[%s3161_s21 + $0x174] sm:$0xf0]  ;;  %v2324_v22 = vld [vmem:[%s3161_s21 + $0x130] sm:$0xf] }
 0x1ba   : > { %1178 = vmatpush.bf16.msra.mxu2 %v2221_v37  ;;  %1149 = vmatpush.bf16.msra.mxu0 %v2237_v39  ;;  %v895_v23 = vperm.slane %v3324_v18, 2  ;;  %v896_v24 = vperm.slane %v3324_v18, 3  ;;  %v2349_v25 = vor.u32 %v2600_v21, %v2348_v20  ;;  %v2594_v26 = vld [vmem:[%s3161_s21 + $0x144] sm:$0xf0]  ;;  %v2597_v28 = vld [vmem:[%s3161_s21 + $0x164] sm:$0xf] }
 0x1bb   : > { %1192 = vmatpush.bf16.msra.mxu3 %v2225_v44  ;;  %v3300_v62 = vld [vmem:[%s3585_s17] sm:$0xff]  ;;  %v3305_v63 = vld [vmem:[%s3585_s17 + $0x8] sm:$0xff]  ;;  %1162 = vmatpush.bf16.msra.mxu1 %v2265_v55  ;;  %v2325_v27 = vor.u32 %v2594_v26, %v2324_v22  ;;  %v2350_v29 = vld [vmem:[%s3161_s21 + $0x178] sm:$0xf0]  ;;  %v893_v39 = vperm.slane %v3324_v18, 0  ;;  %s3586_s25 = sld [smem:[#allocation16_spill]] }
 0x1bc   : > { %v3313_v7 = vpack.c.bf16 %v3305_v63, %v3300_v62  ;;  %v2300_v31 = vld [vmem:[%s3161_s21 + $0x100] sm:$0xf]  ;;  %v2588_v32 = vld [vmem:[%s3161_s21 + $0x114] sm:$0xf0]  ;;  %v2353_v33 = vor.u32 %v2597_v28, %v2350_v29  ;;  %v2591_v34 = vld [vmem:[%s3161_s21 + $0x134] sm:$0xf] }
 0x1bd   : > { %v2326_v38 = vld [vmem:[%s3161_s21 + $0x148] sm:$0xf0]  ;;  %v2301_v45 = vor.u32 %v2588_v32, %v2300_v31  ;;  %v2585_v46 = vld [vmem:[%s3161_s21 + $0x104] sm:$0xf]  ;;  %v2302_v47 = vld [vmem:[%s3161_s21 + $0x118] sm:$0xf0] }
 0x1be   : > { %1179 = vmatpush.bf16.msra.mxu2 %v2197_v51  ;;  %1150 = vmatpush.bf16.msra.mxu0 %v2213_v52  ;;  %v2329_v41 = vor.u32 %v2591_v34, %v2326_v38  ;;  %v2276_v48 = vld [vmem:[%s3161_s21 + $0xd0] sm:$0xf]  ;;  %v2582_v49 = vld [vmem:[%s3161_s21 + $0xe4] sm:$0xf0]  ;;  %v2305_v53 = vor.u32 %v2585_v46, %v2302_v47  ;;  %v2579_v55 = vld [vmem:[%s3161_s21 + $0xd4] sm:$0xf] }
 0x1bf   : > { %1193 = vmatpush.bf16.msra.mxu3 %v2201_v56  ;;  %1163 = vmatpush.bf16.msra.mxu1 %v2241_v3  ;;  %v2277_v54 = vor.u32 %v2582_v49, %v2276_v48  ;;  %v2278_v56 = vld [vmem:[%s3161_s21 + $0xe8] sm:$0xf0]  ;;  %v2252_v57 = vld [vmem:[%s3161_s21 + $0xa0] sm:$0xf]  ;;  %v2576_v58 = vld [vmem:[%s3161_s21 + $0xb4] sm:$0xf0] }
 0x1c0   : > { %v2573_v1 = vld [vmem:[%s3161_s21 + $0xa4] sm:$0xf]  ;;  %v2254_v2 = vld [vmem:[%s3161_s21 + $0xb8] sm:$0xf0]  ;;  %v2228_v3 = vld [vmem:[%s3161_s21 + $0x70] sm:$0xf] }
 0x1c1   : > { %v2257_v5 = vor.u32 %v2573_v1, %v2254_v2  ;;  %v2204_v10 = vld [vmem:[%s3161_s21 + $0x40] sm:$0xf]  ;;  %v2564_v11 = vld [vmem:[%s3161_s21 + $0x54] sm:$0xf0]  ;;  %v2558_v20 = vld [vmem:[%s3161_s21 + $0x24] sm:$0xf0] }
 0x1c2   : > { %1180 = vmatpush.bf16.msra.mxu2 %v2173_v61  ;;  %1151 = vmatpush.bf16.msra.mxu0 %v2189_v0  ;;  %v2281_v61 = vor.u32 %v2579_v55, %v2278_v56  ;;  %v2253_v0 = vor.u32 %v2576_v58, %v2252_v57  ;;  %v2555_v26 = vld [vmem:[%s3161_s21 + $0x14] sm:$0xf]  ;;  %v897_v47 = vperm.slane %v3324_v18, 4 }
 0x1c3   : > { %1194 = vmatpush.bf16.msra.mxu3 %v2177_v4  ;;  %1164 = vmatpush.bf16.msra.mxu1 %v2217_v9  ;;  %v2570_v4 = vld [vmem:[%s3161_s21 + $0x84] sm:$0xf0]  ;;  %v2230_v9 = vld [vmem:[%s3161_s21 + $0x88] sm:$0xf0] }
 0x1c4   : > { %v2229_v6 = vor.u32 %v2570_v4, %v2228_v3 }
 0x1c5   : > { %1181 = vmatmul.bf16.vlgmr.msra.gmra.mxu2 %v3313_v7 }
 0x1c6   : > { %1152 = vmatpush.bf16.msra.mxu0 %v2165_v8  ;;  %1195 = vmatmul.bf16.vlgmr.msra.gmra.mxu3 %v3313_v7  ;;  %v2567_v8 = vld [vmem:[%s3161_s21 + $0x74] sm:$0xf] }
 0x1c7   : > { %1165 = vmatpush.bf16.msra.mxu1 %v2193_v12  ;;  %v894_v12 = vperm.slane %v3324_v18, 1  ;;  %v2233_v13 = vor.u32 %v2567_v8, %v2230_v9 }
 0x1c9   : > { %1153 = vmatmul.bf16.vlgmr.msra.gmra.mxu0 %v3313_v7 }
 0x1ca   : > { %1201 = vmatpush.bf16.msrb.mxu0 %v2349_v25 }
 0x1cb   : > { %1166 = vmatpush.bf16.msra.mxu1 %v2169_v15  ;;  %v2205_v15 = vor.u32 %v2564_v11, %v2204_v10 }
 0x1ce   : > { %1167 = vmatmul.bf16.vlgmr.msra.gmra.mxu1 %v3313_v7  ;;  %1202 = vmatpush.bf16.msrb.mxu0 %v2325_v27  ;;  %v2182_v27 = vld [vmem:[%s3161_s21 + $0x28] sm:$0xf0] }
 0x1cf   : > { %1215 = vmatpush.bf16.msrb.mxu1 %v2353_v33  ;;  %v2185_v28 = vor.u32 %v2555_v26, %v2182_v27  ;;  %v2615_v26 = vld [vmem:[%s3168_s23 + $0x70] sm:$0xff]  ;;  %v2602_v27 = vld [vmem:[%s3168_s23 + $0x8] sm:$0xff] }
 0x1d2   : > { %1203 = vmatpush.bf16.msrb.mxu0 %v2301_v45 }
 0x1d3   : > { %1216 = vmatpush.bf16.msrb.mxu1 %v2329_v41 }
 0x1d6   : > { %1204 = vmatpush.bf16.msrb.mxu0 %v2277_v54 }
 0x1d7   : > { %1217 = vmatpush.bf16.msrb.mxu1 %v2305_v53  ;;  %v898_v53 = vperm.slane %v3324_v18, 5 }
 0x1da   : > { %1205 = vmatpush.bf16.msrb.mxu0 %v2253_v0 }
 0x1db   : > { %1218 = vmatpush.bf16.msrb.mxu1 %v2281_v61 }
 0x1de   : > { %1206 = vmatpush.bf16.msrb.mxu0 %v2229_v6 }
 0x1df   : > { %1219 = vmatpush.bf16.msrb.mxu1 %v2257_v5 }
 0x1e2   : > { %1207 = vmatpush.bf16.msrb.mxu0 %v2205_v15 }
 0x1e3   : > { %1220 = vmatpush.bf16.msrb.mxu1 %v2233_v13 }
 0x246   : > { %v1154_v17 = vpop.f32.mrf.mxu0 }
 0x247   : > { %v1155_v51 = vadd.f32 %v1154_v17, %v893_v39  ;;  %v2206_v17 = vld [vmem:[%s3161_s21 + $0x58] sm:$0xf0] }
 0x248   : > { %v1182_v16 = vpop.f32.mrf.mxu2 }
 0x249   : > { %v1196_v19 = vpop.f32.mrf.mxu3  ;;  %v1183_v35 = vadd.f32 %v1182_v16, %v895_v23  ;;  %v2561_v16 = vld [vmem:[%s3161_s21 + $0x44] sm:$0xf] }
 0x24a   : > { %v1197_v37 = vadd.f32 %v1196_v19, %v896_v24  ;;  %v2180_v19 = vld [vmem:[%s3161_s21 + $0x10] sm:$0xf] }
 0x24b   : > { %v1168_v59 = vpop.f32.mrf.mxu1 }
 0x24c   : > { %v1169_v21 = vadd.f32 %v1168_v59, %v894_v12 }
 0x24e   : > { %v1156_v43 = vpop.f32.mrf.mxu0 }
 0x24f   : > { %v1157_v52 = vadd.f32 %v1156_v43, %v893_v39 }
 0x250   : > { %v1184_v30 = vpop.f32.mrf.mxu2 }
 0x251   : > { %v1185_v36 = vadd.f32 %v1184_v30, %v895_v23  ;;  %v1198_v40 = vpop.f32.mrf.mxu3  ;;  %v1229_v60 = vpack.c.bf16 %v1157_v52, %v1155_v51  ;;  %v2209_v23 = vor.u32 %v2561_v16, %v2206_v17  ;;  %v840_v30 = vld [vmem:[%s3586_s25] sm:$0xff] }
 0x252   : > { %v1199_v44 = vadd.f32 %v1198_v40, %v896_v24  ;;  %v2181_v24 = vor.u32 %v2558_v20, %v2180_v19  ;;  %v2608_v19 = vld [vmem:[%s3168_s23 + $0x38] sm:$0xff]  ;;  %v2607_v20 = vld [vmem:[%s3168_s23 + $0x30] sm:$0xff] }
 0x253   : > { %v1230_v42 = vpack.c.bf16 %v1185_v36, %v1183_v35  ;;  %v1170_v14 = vpop.f32.mrf.mxu1  ;;  %1221 = vmatpush.bf16.msrb.mxu1 %v2209_v23  ;;  %v841_v35 = vld [vmem:[%s3586_s25 + $0x8] sm:$0xff]  ;;  %v2616_v23 = vld [vmem:[%s3168_s23 + $0x78] sm:$0xff] }
 0x254   : > { %v1292_v50 = vpack.c.bf16 %v1199_v44, %v1197_v37  ;;  %v1171_v22 = vadd.f32 %v1170_v14, %v894_v12  ;;  %1208 = vmatpush.bf16.msrb.mxu0 %v2181_v24  ;;  %v2604_v24 = vld [vmem:[%s3168_s23 + $0x18] sm:$0xff] }
 0x255   : > { %1239 = vmatpush.bf16.xpose.msrb.mxu2 %v1230_v42 }
 0x256   : > { %v1291_v25 = vpack.c.bf16 %v1171_v22, %v1169_v21  ;;  %v2606_v21 = vld [vmem:[%s3168_s23 + $0x28] sm:$0xff]  ;;  %v2605_v22 = vld [vmem:[%s3168_s23 + $0x20] sm:$0xff] }
 0x257   : > { %1209 = vmatmul.bf16.vlgmr.msrb.gmra.mxu0 %v3313_v7  ;;  %1222 = vmatpush.bf16.msrb.mxu1 %v2185_v28  ;;  %v2614_v28 = vld [vmem:[%s3168_s23 + $0x68] sm:$0xff] }
 0x258   : > { %1486 = vmatpush.bf16.msra.mxu0 %v2608_v19  ;;  %v2480_v19 = vld [vmem:[%s3174_s3 + $0x78] sm:$0xf0] }
 0x25a   : > { %1223 = vmatmul.bf16.vlgmr.msrb.gmra.mxu1 %v3313_v7 }
 0x25b   : > { %1500 = vmatpush.bf16.msra.mxu1 %v2616_v23  ;;  %v2629_v23 = vld [vmem:[%s3174_s3 + $0x64] sm:$0xf] }
 0x25c   : > { %1240 = vmatmul.bf16.vlgmr.msrb.gmra.mxu2 %v1229_v60  ;;  %1487 = vmatpush.bf16.msra.mxu0 %v2607_v20 }
 0x25d   : > { %1301 = vmatpush.bf16.xpose.msra.mxu2 %v1292_v50 }
 0x25f   : > { %1501 = vmatpush.bf16.msra.mxu1 %v2615_v26 }
 0x260   : > { %1488 = vmatpush.bf16.msra.mxu0 %v2606_v21  ;;  %v2470_v21 = vld [vmem:[%s3174_s3 + $0x60] sm:$0xf] }
 0x263   : > { %1502 = vmatpush.bf16.msra.mxu1 %v2614_v28  ;;  %v2628_v28 = vld [vmem:[%s3174_s3 + $0x54] sm:$0xf0] }
 0x264   : > { %1489 = vmatpush.bf16.msra.mxu0 %v2605_v22  ;;  %v2630_v22 = vld [vmem:[%s3174_s3 + $0x64] sm:$0xf0] }
 0x268   : > { %1490 = vmatpush.bf16.msra.mxu0 %v2604_v24  ;;  %v2471_v24 = vor.u32 %v2630_v22, %v2470_v21  ;;  %v2724_v21 = vld [vmem:[%s3588_s6] ss:$0 sm:$0xff] }
 0x26c   : > { %1302 = vmatmul.bf16.vlgmr.msra.gmra.mxu2 %v1291_v25  ;;  %v2603_v25 = vld [vmem:[%s3168_s23 + $0x10] sm:$0xff] }
 0x26d   : > { %1491 = vmatpush.bf16.msra.mxu0 %v2603_v25  ;;  %v2472_v25 = vld [vmem:[%s3174_s3 + $0x68] sm:$0xf0] }
 0x26e   : > { %v2475_v26 = vor.u32 %v2629_v23, %v2472_v25 }
 0x271   : > { %1492 = vmatpush.bf16.msra.mxu0 %v2602_v27  ;;  %v2462_v27 = vld [vmem:[%s3174_s3 + $0x50] sm:$0xf] }
 0x2d4   : > { %v1210_v46 = vpop.f32.mrf.mxu0 }
 0x2d5   : > { %v1211_v48 = vadd.f32 %v1210_v46, %v897_v47 }
 0x2d7   : > { %v1224_v52 = vpop.f32.mrf.mxu1 }
 0x2d8   : > { %v1225_v54 = vadd.f32 %v1224_v52, %v898_v53 }
 0x2dc   : > { %v1212_v49 = vpop.f32.mrf.mxu0 }
 0x2dd   : > { %v1213_v50 = vadd.f32 %v1212_v49, %v897_v47 }
 0x2df   : > { %v1241_v29 = vpop.f32.mrf.mxu2  ;;  %v1231_v51 = vpack.c.bf16 %v1213_v50, %v1211_v48  ;;  %v1226_v55 = vpop.f32.mrf.mxu1 }
 0x2e0   : > { %v1246_v31 = vmul.f32 0.125, %v1241_v29  ;;  %v1227_v56 = vadd.f32 %v1226_v55, %v898_v53  ;;  %v2601_v29 = vld [vmem:[%s3168_s23] sm:$0xff] }
 0x2e1   : > { %1280 = vmatpush.bf16.msrb.mxu3 %v1231_v51  ;;  %1493 = vmatpush.bf16.msra.mxu0 %v2601_v29  ;;  %v2723_v53 = vld [vmem:[%s3587_s19] ss:$0 sm:$0xff]  ;;  %v2627_v29 = vld [vmem:[%s3174_s3 + $0x54] sm:$0xf] }
 0x2e2   : > { %v1248_v32 = vadd.f32 %v1246_v31, %v840_v30  ;;  %v1293_v57 = vpack.c.bf16 %v1227_v56, %v1225_v54  ;;  %v2612_v31 = vld [vmem:[%s3168_s23 + $0x58] sm:$0xff] }
 0x2e4   : > { %v1251_v33 = vsel %vm1250_vm7, %v1248_v32, -inf }
 0x2e5   : > { %1252 = vmax.xlane.f32.xlu0 %v1251_v33  ;;  %1341 = vmatpush.bf16.msra.mxu3 %v1293_v57  ;;  %v2610_v33 = vld [vmem:[%s3168_s23 + $0x48] sm:$0xff] }
 0x2e7   : > { %v1243_v34 = vpop.f32.mrf.mxu2 }
 0x2e8   : > { %v1247_v36 = vmul.f32 0.125, %v1243_v34 }
 0x2ea   : > { %v1249_v37 = vadd.f32 %v1247_v36, %v841_v35 }
 0x2ec   : > { %v1254_v7 = vsel %vm1250_vm7, %v1249_v37, -inf }
 0x2ed   : > { %1255 = vmax.xlane.f32.xlu0 %v1254_v7 }
 0x2ef   : > { %v1303_v38 = vpop.f32.mrf.mxu2 }
 0x2f0   : > { %v1308_v39 = vmul.f32 0.125, %v1303_v38 }
 0x2f2   : > { %v1310_v40 = vadd.f32 %v1308_v39, %v840_v30  ;;  %v2613_v30 = vld [vmem:[%s3168_s23 + $0x60] sm:$0xff] }
 0x2f3   : > { %1503 = vmatpush.bf16.msra.mxu1 %v2613_v30  ;;  %v2463_v30 = vor.u32 %v2628_v28, %v2462_v27 }
 0x2f4   : > { %v1312_v41 = vsel %vm1250_vm7, %v1310_v40, -inf }
 0x2f5   : > { %1313 = vmax.xlane.f32.xlu1 %v1312_v41 }
 0x2f7   : > { %v1305_v42 = vpop.f32.mrf.mxu2  ;;  %1504 = vmatpush.bf16.msra.mxu1 %v2612_v31  ;;  %v2464_v31 = vld [vmem:[%s3174_s3 + $0x58] sm:$0xf0] }
 0x2f8   : > { %v1309_v43 = vmul.f32 0.125, %v1305_v42 }
 0x2fa   : > { %v1311_v44 = vadd.f32 %v1309_v43, %v841_v35  ;;  %v2609_v35 = vld [vmem:[%s3168_s23 + $0x40] sm:$0xff] }
 0x2fc   : > { %v1315_v45 = vsel %vm1250_vm7, %v1311_v44, -inf }
 0x2fd   : > { %1316 = vmax.xlane.f32.xlu1 %v1315_v45 }
 0x358   : > { %v1253_v58 = vpop.xlane.xlu0 %1252 }
 0x359   : > { %v1257_v59 = vsub.f32 %v1248_v32, %v1253_v58  ;;  %v2611_v32 = vld [vmem:[%s3168_s23 + $0x50] sm:$0xff] }
 0x35a   : > { %1505 = vmatpush.bf16.msra.mxu1 %v2611_v32  ;;  %v2467_v32 = vor.u32 %v2627_v29, %v2464_v31  ;;  %v2639_v31 = vld [vmem:[%s3176_s26 + $0x30] sm:$0xff] }
 0x35b   : > { %v1259_v60 = vmul.f32 1.442695, %v1257_v59 }
 0x35d   : > { %2729 = vpow2.f32 %v1259_v60 }
 0x35e   : > { %1506 = vmatpush.bf16.msra.mxu1 %v2610_v33  ;;  %v2454_v33 = vld [vmem:[%s3174_s3 + $0x40] sm:$0xf] }
 0x360   : > { %v1256_v61 = vpop.xlane.xlu0 %1255 }
 0x361   : > { %v1258_v0 = vsub.f32 %v1249_v37, %v1256_v61 }
 0x362   : > { %1507 = vmatpush.bf16.msra.mxu1 %v2609_v35  ;;  %v2625_v35 = vld [vmem:[%s3174_s3 + $0x44] sm:$0xf] }
 0x363   : > { %v2730_v1 = vpop.eup %2729  ;;  %v1261_v2 = vmul.f32 1.442695, %v1258_v0 }
 0x364   : > { %v1263_v3 = vsel %vm1250_vm7, %v2730_v1, 0.0 }
 0x365   : > { %2731 = vpow2.f32 %v1261_v2  ;;  %1264 = vadd.xlane.f32.xlu2 %v1263_v3 }
 0x368   : > { %v1314_v4 = vpop.xlane.xlu1 %1313 }
 0x369   : > { %v1318_v5 = vsub.f32 %v1310_v40, %v1314_v4 }
 0x36b   : > { %v2732_v18 = vpop.eup %2731  ;;  %v1320_v6 = vmul.f32 1.442695, %v1318_v5 }
 0x36c   : > { %v1266_v8 = vsel %vm1250_vm7, %v2732_v18, 0.0  ;;  %v1269_v9 = vpack.c.bf16 %v2732_v18, %v2730_v1  ;;  %v2934_v1 = vmov 128.0  }
 0x36d   : > { %2733 = vpow2.f32 %v1320_v6  ;;  %1267 = vadd.xlane.f32.xlu2 %v1266_v8 }
 0x36e   : > { %2354 = vmatmul.msk.bf16.vlgmr.msrb.gmra.mxu3 %vm1250_vm7, %v1269_v9 }
 0x370   : > { %v1317_v10 = vpop.xlane.xlu1 %1316 }
 0x371   : > { %v1319_v11 = vsub.f32 %v1311_v44, %v1317_v10 }
 0x373   : > { %v2734_v12 = vpop.eup %2733  ;;  %v1322_v13 = vmul.f32 1.442695, %v1319_v11 }
 0x374   : > { %v1324_v14 = vsel %vm1250_vm7, %v2734_v12, 0.0 }
 0x375   : > { %2735 = vpow2.f32 %v1322_v13  ;;  %1325 = vadd.xlane.f32.xlu0 %v1324_v14  ;;  %v2478_v14 = vld [vmem:[%s3174_s3 + $0x70] sm:$0xf] }
 0x37b   : > { %v2736_v15 = vpop.eup %2735 }
 0x37c   : > { %v1330_v16 = vpack.c.bf16 %v2736_v15, %v2734_v12  ;;  %v1327_v17 = vsel %vm1250_vm7, %v2736_v15, 0.0  ;;  %v2632_v15 = vld [vmem:[%s3174_s3 + $0x74] sm:$0xf0] }
 0x37d   : > { %1328 = vadd.xlane.f32.xlu1 %v1327_v17  ;;  %v2479_v17 = vor.u32 %v2632_v15, %v2478_v14 }
 0x37e   : > { %2355 = vmatmul.msk.bf16.vlgmr.msra.gmra.mxu3 %vm1250_vm7, %v1330_v16  ;;  %v2631_v16 = vld [vmem:[%s3174_s3 + $0x74] sm:$0xf] }
 0x37f   : > { %v2483_v20 = vor.u32 %v2631_v16, %v2480_v19  ;;  %1678 = vmatpush.bf16.msrb.mxu2 %v2479_v17 }
 0x381   : > { %1692 = vmatpush.bf16.msrb.mxu3 %v2483_v20 }
 0x383   : > { %1679 = vmatpush.bf16.msrb.mxu2 %v2471_v24 }
 0x385   : > { %1693 = vmatpush.bf16.msrb.mxu3 %v2475_v26 }
 0x387   : > { %1680 = vmatpush.bf16.msrb.mxu2 %v2463_v30  ;;  %v2648_v30 = vld [vmem:[%s3176_s26 + $0x78] sm:$0xff] }
 0x388   : > { %1890 = vmatpush.bf16.msrb.mxu1 %v2648_v30 }
 0x389   : > { %1694 = vmatpush.bf16.msrb.mxu3 %v2467_v32  ;;  %v2647_v32 = vld [vmem:[%s3176_s26 + $0x70] sm:$0xff] }
 0x38c   : > { %1891 = vmatpush.bf16.msrb.mxu1 %v2647_v32 }
 0x3d8   : > { %v1265_v34 = vpop.xlane.xlu2 %1264 }
 0x3d9   : > { %2737 = vrcp.f32 %v1265_v34  ;;  %v2626_v34 = vld [vmem:[%s3174_s3 + $0x44] sm:$0xf0] }
 0x3df   : > { %v2738_v7 = vpop.eup %2737 }
 0x3e0   : > { %v1268_v36 = vpop.xlane.xlu2 %1267 }
 0x3e1   : > { %2739 = vrcp.f32 %v1268_v36  ;;  %v2455_v36 = vor.u32 %v2626_v34, %v2454_v33  ;;  %v2638_v33 = vld [vmem:[%s3176_s26 + $0x28] sm:$0xff] }
 0x3e2   : > { %v2646_v34 = vld [vmem:[%s3176_s26 + $0x68] sm:$0xff] }
 0x3e3   : > { %1681 = vmatpush.bf16.msrb.mxu2 %v2455_v36  ;;  %1892 = vmatpush.bf16.msrb.mxu1 %v2646_v34  ;;  %v2645_v36 = vld [vmem:[%s3176_s26 + $0x60] sm:$0xff] }
 0x3e7   : > { %v2740_v38 = vpop.eup %2739  ;;  %1893 = vmatpush.bf16.msrb.mxu1 %v2645_v36 }
 0x3e8   : > { %v1326_v43 = vpop.xlane.xlu0 %1325 }
 0x3e9   : > { %2741 = vrcp.f32 %v1326_v43 }
 0x3ef   : > { %v2742_v46 = vpop.eup %2741 }
 0x3f0   : > { %v1329_v44 = vpop.xlane.xlu1 %1328 }
 0x3f1   : > { %v1282_v37 = vpop.f32.mrf.mxu3  ;;  %2743 = vrcp.f32 %v1329_v44  ;;  %v2438_v44 = vld [vmem:[%s3174_s3 + $0x20] sm:$0xf] }
 0x3f2   : > { %v1289_v40 = vmul.f32 %v2738_v7, %v1282_v37  ;;  %2745 = vrcp.f32 %v2934_v1  ;;  %v2456_v37 = vld [vmem:[%s3174_s3 + $0x48] sm:$0xf0] }
 0x3f3   : > { %v2459_v7 = vor.u32 %v2625_v35, %v2456_v37  ;;  %v2637_v35 = vld [vmem:[%s3176_s26 + $0x20] sm:$0xff]  ;;  %v2636_v37 = vld [vmem:[%s3176_s26 + $0x18] sm:$0xff] }
 0x3f5   : > { %1695 = vmatpush.bf16.msrb.mxu3 %v2459_v7  ;;  %v2644_v7 = vld [vmem:[%s3176_s26 + $0x58] sm:$0xff] }
 0x3f6   : > { %1894 = vmatpush.bf16.msrb.mxu1 %v2644_v7 }
 0x3f7   : > { %v2744_v47 = vpop.eup %2743 }
 0x3f8   : > { %v2746_v2 = vpop.eup %2745 }
 0x3f9   : > { %v1284_v39 = vpop.f32.mrf.mxu3  ;;  %v1523_v3 = vmul.f32 128.0, %v2746_v2  ;;  %vm1527_vm8 = vweird.f32 %v2746_v2 }
 0x3fa   : > { %v1290_v41 = vmul.f32 %v2740_v38, %v1284_v39  ;;  %v2446_v38 = vld [vmem:[%s3174_s3 + $0x30] sm:$0xf]  ;;  %v2624_v39 = vld [vmem:[%s3174_s3 + $0x34] sm:$0xf0] }
 0x3fb   : > { %v1524_v4 = vsub.f32 1.0, %v1523_v3 }
 0x3fc   : > { %v1385_v42 = vpack.c.bf16 %v1290_v41, %v1289_v40  ;;  %v2623_v40 = vld [vmem:[%s3174_s3 + $0x34] sm:$0xf]  ;;  %v2447_v41 = vor.u32 %v2624_v39, %v2446_v38 }
 0x3fd   : > { %v1525_v5 = vmul.f32 %v2746_v2, %v1524_v4  ;;  %v2635_v38 = vld [vmem:[%s3176_s26 + $0x10] sm:$0xff] }
 0x3fe   : > { %1494 = vmatmul.bf16.vlgmr.msra.gmra.mxu0 %v1385_v42  ;;  %v2448_v42 = vld [vmem:[%s3174_s3 + $0x38] sm:$0xf0]  ;;  %1682 = vmatpush.bf16.msrb.mxu2 %v2447_v41  ;;  %v2643_v39 = vld [vmem:[%s3176_s26 + $0x50] sm:$0xff]  ;;  %v2634_v41 = vld [vmem:[%s3176_s26 + $0x8] sm:$0xff] }
 0x3ff   : > { %v1526_v18 = vadd.f32 %v2746_v2, %v1525_v5  ;;  %v2451_v43 = vor.u32 %v2623_v40, %v2448_v42  ;;  %v1591_v40 = vld [vmem:[%s3208_s4] sm:$0x3]  ;;  %1895 = vmatpush.bf16.msrb.mxu1 %v2643_v39  ;;  %v2642_v42 = vld [vmem:[%s3176_s26 + $0x48] sm:$0xff] }
 0x401   : > { %v1343_v45 = vpop.f32.mrf.mxu3  ;;  %1696 = vmatpush.bf16.msrb.mxu3 %v2451_v43  ;;  %v1594_v43 = vperm.slane %v1591_v40, 0 }
 0x402   : > { %v1350_v49 = vmul.f32 %v2742_v46, %v1343_v45  ;;  %v2622_v45 = vld [vmem:[%s3174_s3 + $0x24] sm:$0xf0]  ;;  %v2621_v46 = vld [vmem:[%s3174_s3 + $0x24] sm:$0xf] }
 0x403   : > { %1896 = vmatpush.bf16.msrb.mxu1 %v2642_v42 }
 0x409   : > { %v1345_v48 = vpop.f32.mrf.mxu3 }
 0x40a   : > { %v1351_v50 = vmul.f32 %v2744_v47, %v1345_v48  ;;  %v2439_v47 = vor.u32 %v2622_v45, %v2438_v44  ;;  %v2440_v48 = vld [vmem:[%s3174_s3 + $0x28] sm:$0xf0]  ;;  %v1595_v44 = vperm.slane %v1591_v40, 1 }
 0x40c   : > { %v1386_v51 = vpack.c.bf16 %v1351_v50, %v1350_v49  ;;  %v2443_v49 = vor.u32 %v2621_v46, %v2440_v48  ;;  %1683 = vmatpush.bf16.msrb.mxu2 %v2439_v47  ;;  %v2430_v50 = vld [vmem:[%s3174_s3 + $0x10] sm:$0xf]  ;;  %v2633_v47 = vld [vmem:[%s3176_s26] sm:$0xff] }
 0x40d   : > { %v2641_v48 = vld [vmem:[%s3176_s26 + $0x40] sm:$0xff] }
 0x40e   : > { %1508 = vmatmul.bf16.vlgmr.msra.gmra.mxu1 %v1386_v51  ;;  %1697 = vmatpush.bf16.msrb.mxu3 %v2443_v49  ;;  %v2620_v51 = vld [vmem:[%s3174_s3 + $0x14] sm:$0xf0] }
 0x40f   : > { %1897 = vmatpush.bf16.msrb.mxu1 %v2641_v48 }
 0x47b   : > { %v1495_v52 = vpop.f32.mrf.mxu0 }
 0x47c   : > { %v1496_v54 = vadd.f32 %v2723_v53, %v1495_v52  ;;  %v2619_v52 = vld [vmem:[%s3174_s3 + $0x14] sm:$0xf] }
 0x483   : > { %v1497_v58 = vpop.f32.mrf.mxu0 }
 0x484   : > { %v1498_v59 = vadd.f32 %v2723_v53, %v1497_v58  ;;  %v2431_v53 = vor.u32 %v2620_v51, %v2430_v50  ;;  %v2617_v58 = vld [vmem:[%s3174_s3 + $0x4] sm:$0xf] }
 0x486   : > { %1684 = vmatpush.bf16.msrb.mxu2 %v2431_v53 }
 0x48b   : > { %v1509_v55 = vpop.f32.mrf.mxu1 }
 0x48c   : > { %v1510_v56 = vadd.f32 %v1509_v55, %v1496_v54  ;;  %v2432_v54 = vld [vmem:[%s3174_s3 + $0x18] sm:$0xf0] }
 0x48d   : > { %v2435_v55 = vor.u32 %v2619_v52, %v2432_v54 }
 0x48e   : > { %v1514_v57 = vadd.f32 %v1510_v56, %v3300_v62  ;;  %v3405_v62 = vsel %vm1527_vm8, %v2746_v2, %v1526_v18  ;;  %v2422_v56 = vld [vmem:[%s3174_s3] sm:$0xf] }
 0x48f   : > { %1698 = vmatpush.bf16.msrb.mxu3 %v2435_v55 }
 0x490   : > { %1518 = vadd.xlane.f32.xlu2 %v1514_v57 }
 0x493   : > { %v1511_v60 = vpop.f32.mrf.mxu1 }
 0x494   : > { %v1512_v61 = vadd.f32 %v1511_v60, %v1498_v59 }
 0x496   : > { %v1515_v0 = vadd.f32 %v1512_v61, %v3305_v63  ;;  %v2424_v61 = vld [vmem:[%s3174_s3 + $0x8] sm:$0xf0] }
 0x497   : > { %v2427_v1 = vor.u32 %v2617_v58, %v2424_v61 }
 0x498   : > { %1520 = vadd.xlane.f32.xlu0 %v1515_v0 }
 0x499   : > { %1699 = vmatpush.bf16.msrb.mxu3 %v2427_v1 }
 0x503   : > { %v1519_v6 = vpop.xlane.xlu2 %1518 }
 0x504   : > { %v1529_v8 = vmul.f32 %v3405_v62, %v1519_v6 }
 0x506   : > { %v3408_v9 = vsub.f32 %v1514_v57, %v1529_v8  ;;  %v2618_v57 = vld [vmem:[%s3174_s3 + $0x4] sm:$0xf0] }
 0x507   : > { %v2423_v60 = vor.u32 %v2618_v57, %v2422_v56 }
 0x508   : > { %v1533_v63 = vmul.f32 %v3408_v9, %v3408_v9 }
 0x509   : > { %1685 = vmatpush.bf16.msrb.mxu2 %v2423_v60 }
 0x50a   : > { %1535 = vadd.xlane.f32.xlu1 %v1533_v63 }
 0x50b   : > { %v1521_v10 = vpop.xlane.xlu0 %1520 }
 0x50c   : > { %v1530_v11 = vmul.f32 %v3405_v62, %v1521_v10 }
 0x50e   : > { %v3413_v12 = vsub.f32 %v1515_v0, %v1530_v11 }
 0x510   : > { %v1534_v13 = vmul.f32 %v3413_v12, %v3413_v12 }
 0x512   : > { %1537 = vadd.xlane.f32.xlu2 %v1534_v13 }
 0x57d   : > { %v1536_v59 = vpop.xlane.xlu1 %1535 }
 0x57e   : > { %v1539_v0 = vmul.f32 %v1536_v59, %v3405_v62 }
 0x580   : > { %v1541_v2 = vadd.f32 1e-12, %v1539_v0 }
 0x582   : > { %2747 = vrsqrt.f32 %v1541_v2  ;;  %vm1549_vm10 = vweird.f32 %v1541_v2 }
 0x585   : > { %v1538_v3 = vpop.xlane.xlu2 %1537 }
 0x586   : > { %v1540_v4 = vmul.f32 %v1538_v3, %v3405_v62 }
 0x588   : > { %v2748_v5 = vpop.eup %2747  ;;  %v1542_v18 = vadd.f32 1e-12, %v1540_v4 }
 0x589   : > { %v1544_v6 = vmul.f32 %v2748_v5, %v1541_v2  ;;  %vm1550_vm9 = vweird.f32 %v2748_v5 }
 0x58a   : > { %2749 = vrsqrt.f32 %v1542_v18  ;;  %vm1551_vm11 = vmor %vm1549_vm10, %vm1550_vm9  ;;  %vm1559_vm13 = vweird.f32 %v1542_v18 }
 0x58b   : > { %v1545_v8 = vmul.f32 %v2748_v5, %v1544_v6 }
 0x58d   : > { %v1546_v63 = vmul.f32 0.5, %v1545_v8 }
 0x58f   : > { %v1547_v10 = vsub.f32 1.5, %v1546_v63 }
 0x590   : > { %v2750_v11 = vpop.eup %2749 }
 0x591   : > { %v1548_v13 = vmul.f32 %v2748_v5, %v1547_v10  ;;  %v1554_v14 = vmul.f32 %v2750_v11, %v1542_v18  ;;  %vm1560_vm12 = vweird.f32 %v2750_v11 }
 0x592   : > { %vm1561_vm14 = vmor %vm1559_vm13, %vm1560_vm12 }
 0x593   : > { %v1555_v15 = vmul.f32 %v2750_v11, %v1554_v14  ;;  %v1552_v16 = vsel %vm1551_vm11, %v2748_v5, %v1548_v13 }
 0x594   : > { %v1563_v20 = vmul.f32 %v1552_v16, %v3408_v9  ;;  %v2725_v9 = vld [vmem:[%s3589_s0] ss:$0 sm:$0xff] }
 0x595   : > { %v1556_v17 = vmul.f32 0.5, %v1555_v15 }
 0x596   : > { %v1568_v25 = vmul.f32 %v2724_v21, %v1563_v20 }
 0x597   : > { %v1557_v19 = vsub.f32 1.5, %v1556_v17 }
 0x598   : > { %v3463_v27 = vadd.f32 %v2725_v9, %v1568_v25 }
 0x599   : > { %v1558_v22 = vmul.f32 %v2750_v11, %v1557_v19 }
 0x59b   : > { %v1562_v23 = vsel %vm1561_vm14, %v2750_v11, %v1558_v22 }
 0x59c   : > { %v1564_v24 = vmul.f32 %v1562_v23, %v3413_v12  ;;  %v2640_v12 = vld [vmem:[%s3176_s26 + $0x38] sm:$0xff] }
 0x59d   : > { %1876 = vmatpush.bf16.msrb.mxu0 %v2640_v12 }
 0x59e   : > { %v1569_v26 = vmul.f32 %v2724_v21, %v1564_v24 }
 0x5a0   : > { %v3465_v28 = vadd.f32 %v2725_v9, %v1569_v26 }
 0x5a1   : > { %1877 = vmatpush.bf16.msrb.mxu0 %v2639_v31 }
 0x5a2   : > { %v1592_v29 = vpack.c.bf16 %v3465_v28, %v3463_v27 }
 0x5a4   : > { %1686 = vmatmul.bf16.vlgmr.msrb.gmra.mxu2 %v1592_v29  ;;  %1700 = vmatmul.bf16.vlgmr.msrb.gmra.mxu3 %v1592_v29 }
 0x5a5   : > { %1878 = vmatpush.bf16.msrb.mxu0 %v2638_v33  ;;  %v2726_v33 = vld [vmem:[%s763_s30] ss:$0 sm:$0xff] }
 0x5a9   : > { %1879 = vmatpush.bf16.msrb.mxu0 %v2637_v35 }
 0x5ad   : > { %1880 = vmatpush.bf16.msrb.mxu0 %v2636_v37 }
 0x5b1   : > { %1881 = vmatpush.bf16.msrb.mxu0 %v2635_v38 }
 0x5b5   : > { %1882 = vmatpush.bf16.msrb.mxu0 %v2634_v41 }
 0x5b9   : > { %1883 = vmatpush.bf16.msrb.mxu0 %v2633_v47 }
 0x627   : > { %v1687_v45 = vpop.f32.mrf.mxu2  ;;  %v1701_v46 = vpop.f32.mrf.mxu3 }
 0x628   : > { %v1688_v49 = vadd.f32 %v1687_v45, %v1594_v43  ;;  %v1702_v50 = vadd.f32 %v1701_v46, %v1595_v44 }
 0x62a   : > { %v1706_v51 = vmul.f32 %v1688_v49, %v1688_v49  ;;  %v1707_v52 = vmul.f32 %v1702_v50, %v1702_v50 }
 0x62c   : > { %v1710_v53 = vmul.f32 %v1706_v51, %v1688_v49  ;;  %v1711_v54 = vmul.f32 %v1707_v52, %v1702_v50 }
 0x62e   : > { %v1714_v55 = vmul.f32 0.044715, %v1710_v53  ;;  %v1715_v56 = vmul.f32 0.044715, %v1711_v54 }
 0x62f   : > { %v1689_v57 = vpop.f32.mrf.mxu2  ;;  %v1703_v58 = vpop.f32.mrf.mxu3 }
 0x630   : > { %v1718_v59 = vadd.f32 %v1714_v55, %v1688_v49  ;;  %v1719_v60 = vadd.f32 %v1715_v56, %v1702_v50  ;;  %v1690_v61 = vadd.f32 %v1689_v57, %v1594_v43  ;;  %v1704_v0 = vadd.f32 %v1703_v58, %v1595_v44 }
 0x632   : > { %v1722_v1 = vmul.f32 0.7978846, %v1718_v59  ;;  %v1708_v2 = vmul.f32 %v1690_v61, %v1690_v61  ;;  %v1709_v3 = vmul.f32 %v1704_v0, %v1704_v0  ;;  %v1723_v4 = vmul.f32 0.7978846, %v1719_v60 }
 0x634   : > { %v1712_v5 = vmul.f32 %v1708_v2, %v1690_v61  ;;  %v1713_v18 = vmul.f32 %v1709_v3, %v1704_v0  ;;  %2751 = vtanh.f32 %v1722_v1  ;;  %v2727_v1 = vld [vmem:[%s766_s20] ss:$0 sm:$0xff] }
 0x635   : > { %2753 = vtanh.f32 %v1723_v4  ;;  %v2728_v3 = vld [vmem:[%s769_s14] ss:$0 sm:$0xff] }
 0x636   : > { %v1716_v6 = vmul.f32 0.044715, %v1712_v5  ;;  %v1717_v8 = vmul.f32 0.044715, %v1713_v18 }
 0x638   : > { %v1720_v63 = vadd.f32 %v1716_v6, %v1690_v61  ;;  %v1721_v10 = vadd.f32 %v1717_v8, %v1704_v0 }
 0x63a   : > { %v1724_v11 = vmul.f32 0.7978846, %v1720_v63  ;;  %v1725_v13 = vmul.f32 0.7978846, %v1721_v10  ;;  %v2752_v14 = vpop.eup %2751 }
 0x63b   : > { %v2754_v15 = vpop.eup %2753  ;;  %v1730_v16 = vadd.f32 1.0, %v2752_v14 }
 0x63c   : > { %2755 = vtanh.f32 %v1724_v11  ;;  %v1731_v17 = vadd.f32 1.0, %v2754_v15 }
 0x63d   : > { %2757 = vtanh.f32 %v1725_v13  ;;  %v1734_v21 = vmul.f32 0.5, %v1730_v16 }
 0x63e   : > { %v1735_v23 = vmul.f32 0.5, %v1731_v17 }
 0x63f   : > { %v1738_v26 = vmul.f32 %v1734_v21, %v1688_v49 }
 0x640   : > { %v1739_v12 = vmul.f32 %v1735_v23, %v1702_v50 }
 0x642   : > { %v2756_v19 = vpop.eup %2755 }
 0x643   : > { %v2758_v20 = vpop.eup %2757  ;;  %v1732_v22 = vadd.f32 1.0, %v2756_v19 }
 0x644   : > { %v1733_v24 = vadd.f32 1.0, %v2758_v20 }
 0x645   : > { %v1736_v25 = vmul.f32 0.5, %v1732_v22 }
 0x646   : > { %v1737_v9 = vmul.f32 0.5, %v1733_v24 }
 0x647   : > { %v1740_v29 = vmul.f32 %v1736_v25, %v1690_v61 }
 0x648   : > { %v1741_v30 = vmul.f32 %v1737_v9, %v1704_v0 }
 0x649   : > { %v1775_v31 = vpack.c.bf16 %v1740_v29, %v1738_v26 }
 0x64a   : > { %v1776_v32 = vpack.c.bf16 %v1741_v30, %v1739_v12 }
 0x64b   : > { %1884 = vmatmul.bf16.vlgmr.msrb.gmra.mxu0 %v1775_v31 }
 0x64c   : > { %1898 = vmatmul.bf16.vlgmr.msrb.gmra.mxu1 %v1776_v32 }
 0x6c8   : > { %v1885_v34 = vpop.f32.mrf.mxu0 }
 0x6c9   : > { %v1886_v35 = vadd.f32 %v2726_v33, %v1885_v34  ;;  %v1899_v36 = vpop.f32.mrf.mxu1 }
 0x6cb   : > { %v1900_v37 = vadd.f32 %v1899_v36, %v1886_v35 }
 0x6cd   : > { %v1904_v7 = vadd.f32 %v1900_v37, %v3463_v27 }
 0x6cf   : > { %1908 = vadd.xlane.f32.xlu0 %v1904_v7 }
 0x6d0   : > { %v1887_v38 = vpop.f32.mrf.mxu0 }
 0x6d1   : > { %v1888_v39 = vadd.f32 %v2726_v33, %v1887_v38  ;;  %v1901_v40 = vpop.f32.mrf.mxu1 }
 0x6d3   : > { %v1902_v41 = vadd.f32 %v1901_v40, %v1888_v39 }
 0x6d5   : > { %v1905_v42 = vadd.f32 %v1902_v41, %v3465_v28 }
 0x6d7   : > { %1910 = vadd.xlane.f32.xlu1 %v1905_v42 }
 0x742   : > { %v1909_v43 = vpop.xlane.xlu0 %1908 }
 0x743   : > { %v1912_v44 = vmul.f32 %v1909_v43, %v3405_v62 }
 0x745   : > { %v1914_v45 = vsub.f32 %v1904_v7, %v1912_v44 }
 0x747   : > { %v1916_v46 = vmul.f32 %v1914_v45, %v1914_v45 }
 0x749   : > { %1918 = vadd.xlane.f32.xlu2 %v1916_v46 }
 0x74a   : > { %v1911_v47 = vpop.xlane.xlu1 %1910 }
 0x74b   : > { %v1913_v48 = vmul.f32 %v1911_v47, %v3405_v62 }
 0x74d   : > { %v1915_v49 = vsub.f32 %v1905_v42, %v1913_v48 }
 0x74f   : > { %v1917_v50 = vmul.f32 %v1915_v49, %v1915_v49 }
 0x751   : > { %1920 = vadd.xlane.f32.xlu0 %v1917_v50 }
 0x7bc   : > { %v1919_v27 = vpop.xlane.xlu2 %1918 }
 0x7bd   : > { %v1922_v51 = vmul.f32 %v1919_v27, %v3405_v62 }
 0x7bf   : > { %v1924_v52 = vadd.f32 1e-12, %v1922_v51 }
 0x7c1   : > { %2759 = vrsqrt.f32 %v1924_v52  ;;  %vm1932_vm0 = vweird.f32 %v1924_v52 }
 0x7c4   : > { %v1921_v28 = vpop.xlane.xlu0 %1920 }
 0x7c5   : > { %v1923_v53 = vmul.f32 %v1921_v28, %v3405_v62 }
 0x7c7   : > { %v2760_v54 = vpop.eup %2759  ;;  %v1925_v55 = vadd.f32 1e-12, %v1923_v53 }
 0x7c8   : > { %v1927_v56 = vmul.f32 %v2760_v54, %v1924_v52  ;;  %vm1933_vm15 = vweird.f32 %v2760_v54 }
 0x7c9   : > { %2761 = vrsqrt.f32 %v1925_v55  ;;  %vm1934_vm1 = vmor %vm1932_vm0, %vm1933_vm15  ;;  %vm1942_vm3 = vweird.f32 %v1925_v55 }
 0x7ca   : > { %v1928_v57 = vmul.f32 %v2760_v54, %v1927_v56 }
 0x7cc   : > { %v1929_v58 = vmul.f32 0.5, %v1928_v57 }
 0x7ce   : > { %v1930_v59 = vsub.f32 1.5, %v1929_v58 }
 0x7cf   : > { %v2762_v60 = vpop.eup %2761 }
 0x7d0   : > { %v1931_v61 = vmul.f32 %v2760_v54, %v1930_v59  ;;  %v1937_v0 = vmul.f32 %v2762_v60, %v1925_v55  ;;  %vm1943_vm2 = vweird.f32 %v2762_v60 }
 0x7d1   : > { %vm1944_vm4 = vmor %vm1942_vm3, %vm1943_vm2 }
 0x7d2   : > { %v1935_v62 = vsel %vm1934_vm1, %v2760_v54, %v1931_v61  ;;  %v1938_v2 = vmul.f32 %v2762_v60, %v1937_v0 }
 0x7d3   : > { %v1946_v4 = vmul.f32 %v1935_v62, %v1914_v45 }
 0x7d4   : > { %v1939_v5 = vmul.f32 0.5, %v1938_v2 }
 0x7d5   : > { %v1951_v18 = vmul.f32 %v2727_v1, %v1946_v4 }
 0x7d6   : > { %v1940_v6 = vsub.f32 1.5, %v1939_v5 }
 0x7d7   : > { %v1956_v8 = vadd.f32 %v2728_v3, %v1951_v18 }
 0x7d8   : > { %v1941_v63 = vmul.f32 %v2762_v60, %v1940_v6 }
 0x7d9   : > { %1958 = vst [vmem:[%s3585_s17] sm:$0xff] %v1956_v8 }
 0x7da   : > { %v1945_v10 = vsel %vm1944_vm4, %v2762_v60, %v1941_v63 }
 0x7db   : > { %v1947_v11 = vmul.f32 %v1945_v10, %v1915_v49 }
 0x7dd   : > { %v1952_v13 = vmul.f32 %v2727_v1, %v1947_v11 }
 0x7df   : > { %v1957_v14 = vadd.f32 %v2728_v3, %v1952_v13 }
 0x7e1   : > { %1959 = vst [vmem:[%s3585_s17 + $0x8] sm:$0xff] %v1957_v14 }
 0x7e2 PF: > { %s3593_s24 = sld [smem:[#allocation13_spill]]  ;;  %s3596_s21 = smov %s2917_s22 }
 0x7e3   : > { %s3594_s14 = sld [smem:[#allocation12_spill]] }
 0x7e4   : > { %s3595_s23 = sld [smem:[#allocation14_spill]] }
 0x7e8   : > { %p32_p10 = scmp.ge.s32.totalorder %s3593_s24, 4  }
 0x7e9   : > { %s3597_s22 = smov %s3594_s14 }
 0x7ea   :  { %34 = sbr.rel (!%p32_p10) target bundleno = 21 (0x15), region = 185 }
 0x7ef   :  { %1971 = vsyncpa [#allocation3], 1 }
 0x7f0   :  { %1973 = vsyncpa [#allocation3 + $0x1], 1 }
 0x7f1   :  { %1974 = vsyncpa [#allocation5], 1 }
 0x7f2   :  { %1976 = vsyncpa [#allocation5 + $0x1], 1 }
 0x7f3   :  { %1977 = vsyncpa [#allocation8], 1 }
 0x7f4   :  { %1979 = vsyncpa [#allocation8 + $0x1], 1 }

</bundles_post_ra>
